<compile_context>
chip_gen: v5e
topology: v5e:2x2
jax: 0.10.0
libtpu: 0.0.40
codegen_flags: <defaults>
</compile_context>

<pallas_src>
import functools

import jax
import jax.numpy as jnp
from jax.experimental import pallas as pl
from jax.experimental.pallas import tpu as pltpu


def _residual_block_kernel(alpha_ref, x_ref, mask_ref, pw_w_ref, pw_b_ref,
                           dw_w_ref, dw_b_ref, bn_scale_ref, bn_shift_ref,
                           o_ref, *, Wp, Np, n_blocks):
    x0 = x_ref[0]                       # (Cp, Np) f32, one batch element (row-padded layout)
    mask = mask_ref[...]                # (1, Np)  1.0 on real pixels, 0.0 on halo/padding
    y = x0
    for blk in range(n_blocks):
        # ---- pointwise 1x1 conv on the MXU (previous block's BN pre-folded into W, b) ----
        y = jnp.dot(pw_w_ref[blk], y, preferred_element_type=jnp.float32)
        y = y + pw_b_ref[blk]                            # (Cp, 1) bias, lane-broadcast

        # ---- re-establish the zero halo once per block (replaces 9 per-tap mask muls) ----
        y = y * mask

        # ---- depthwise 3x3 'same' conv ------------------------------------------------
        # Horizontal neighbours: 2 unit lane-rolls, reused by all three kernel rows.
        yl = pltpu.roll(y, shift=1, axis=1)              # value at (r, c-1)
        yr = pltpu.roll(y, shift=Np - 1, axis=1)         # value at (r, c+1)
        w = lambda kh, kw: dw_w_ref[blk, 3 * kh + kw]    # (Cp, 1) per-channel tap weight
        row0 = w(0, 0) * yl + w(0, 1) * y + w(0, 2) * yr   # kernel row kh=0 (dh=-1)
        row1 = w(1, 0) * yl + w(1, 1) * y + w(1, 2) * yr   # kernel row kh=1 (dh= 0)
        row2 = w(2, 0) * yl + w(2, 1) * y + w(2, 2) * yr   # kernel row kh=2 (dh=+1)
        # Vertical neighbours: rolls by +-Wp lanes = whole-vreg moves (Wp % 128 == 0).
        acc = (row1
               + pltpu.roll(row0, shift=Wp, axis=1)
               + pltpu.roll(row2, shift=Np - Wp, axis=1))
        y = acc + dw_b_ref[blk]

        # ---- PReLU (single shared slope per block, PyTorch default num_parameters=1) ----
        a = alpha_ref[blk]
        y = jnp.where(y > 0, y, a * y)

        # ---- BatchNorm2d (inference): only the LAST block's BN is applied here; earlier
        #      BNs were folded into the next block's 1x1 conv in the wrapper.
        if blk == n_blocks - 1:
            y = y * bn_scale_ref[...] + bn_shift_ref[...]

    # ---- residual skip connection ----
    o_ref[0] = (x0 + y).astype(o_ref.dtype)


def residual_block_forward(x, params, *, bn_eps=1e-5):
    """x: (B, C, H, W) float32 (NCHW, as in PyTorch). Returns (B, C, H, W)."""
    B, C, H, W = x.shape
    n_blocks = params["pw_w"].shape[0]
    f32 = jnp.float32

    Cp = max(8, pl.cdiv(C, 8) * 8)         # sublane-aligned channels (round to 128 for big C)
    Wp = pl.cdiv(W + 1, 128) * 128         # lane-dense image rows + >=1 zero halo column
    Hh = H + 1                             # >=1 zero halo row (handles top wrap & bottom)
    Np = Hh * Wp

    # --- pad x into the row-padded flattened layout (B, Cp, Hh*Wp) in the wrapper ---
    xp = jnp.pad(x.astype(f32), ((0, 0), (0, Cp - C), (0, Hh - H), (0, Wp - W)))
    xf = xp.reshape(B, Cp, Np)

    # --- spatial validity mask: 1 on real pixels, 0 on halo/padding ---
    mask = jnp.zeros((Hh, Wp), f32).at[:H, :W].set(1.0).reshape(1, Np)

    # --- fold BN of block k into the 1x1 conv of block k+1 (exact: the conv is linear) ---
    scale = params["bn_gamma"] / jnp.sqrt(params["bn_var"] + bn_eps)   # (n, C)
    shift = params["bn_beta"] - params["bn_mean"] * scale              # (n, C)
    pw_w_list, pw_b_list = [], []
    for k in range(n_blocks):
        wk = params["pw_w"][k]
        bk = params["pw_b"][k]
        if k > 0:
            bk = bk + params["pw_w"][k] @ shift[k - 1]     # W @ t_prev + b
            wk = wk * scale[k - 1][None, :]                # W @ diag(s_prev)
        pw_w_list.append(wk)
        pw_b_list.append(bk)
    pw_w_f = jnp.stack(pw_w_list)
    pw_b_f = jnp.stack(pw_b_list)

    # --- pack parameters into kernel-friendly, channel-padded layouts ---
    pw_w = jnp.zeros((n_blocks, Cp, Cp), f32).at[:, :C, :C].set(pw_w_f)
    pw_b = jnp.zeros((n_blocks, Cp, 1), f32).at[:, :C, 0].set(pw_b_f)
    dww = params["dw_w"].reshape(n_blocks, C, 9)           # flat tap index = 3*kh + kw
    dw_w = jnp.zeros((n_blocks, 9, Cp, 1), f32).at[:, :, :C, 0].set(
        jnp.transpose(dww, (0, 2, 1)))
    dw_b = jnp.zeros((n_blocks, Cp, 1), f32).at[:, :C, 0].set(params["dw_b"])
    bn_scale = jnp.zeros((Cp, 1), f32).at[:C, 0].set(scale[n_blocks - 1])
    bn_shift = jnp.zeros((Cp, 1), f32).at[:C, 0].set(shift[n_blocks - 1])
    alpha = params["alpha"].astype(f32)

    kernel = functools.partial(_residual_block_kernel, Wp=Wp, Np=Np, n_blocks=n_blocks)

    # --- VMEM budget: in/out blocks (double buffered) + in-kernel temporaries + params ---
    block_bytes = 4 * Cp * Np
    param_bytes = 4 * (pw_w.size + pw_b.size + dw_w.size + dw_b.size
                       + bn_scale.size + bn_shift.size + mask.size)
    est_vmem = 4 * block_bytes + 10 * block_bytes + param_bytes + (2 << 20)
    vmem_limit = int(min(48 << 20, max(16 << 20, 2 * est_vmem)))

    flops = int(2 * B * n_blocks * Cp * Cp * Np + 24 * B * n_blocks * Cp * Np)
    bytes_accessed = int(8 * B * Cp * Np + param_bytes + 4 * alpha.size)

    out = pl.pallas_call(
        kernel,
        out_shape=jax.ShapeDtypeStruct((B, Cp, Np), f32),
        grid_spec=pltpu.PrefetchScalarGridSpec(
            num_scalar_prefetch=0,
            grid=(B,),
            in_specs=[
                pl.BlockSpec(memory_space=pltpu.MemorySpace.SMEM),           # alpha (n,)
                pl.BlockSpec((1, Cp, Np), lambda b: (b, 0, 0)),              # x tile
                pl.BlockSpec((1, Np), lambda b: (0, 0)),                     # halo mask
                pl.BlockSpec((n_blocks, Cp, Cp), lambda b: (0, 0, 0)),       # pw weight (BN-folded)
                pl.BlockSpec((n_blocks, Cp, 1), lambda b: (0, 0, 0)),        # pw bias
                pl.BlockSpec((n_blocks, 9, Cp, 1), lambda b: (0, 0, 0, 0)),  # dw weight
                pl.BlockSpec((n_blocks, Cp, 1), lambda b: (0, 0, 0)),        # dw bias
                pl.BlockSpec((Cp, 1), lambda b: (0, 0)),                     # last-block BN scale
                pl.BlockSpec((Cp, 1), lambda b: (0, 0)),                     # last-block BN shift
            ],
            out_specs=pl.BlockSpec((1, Cp, Np), lambda b: (b, 0, 0)),
        ),
        compiler_params=pltpu.CompilerParams(
            dimension_semantics=("parallel",),       # batch shards across TCs on v7x only
            vmem_limit_bytes=vmem_limit,
        ),
        cost_estimate=pl.CostEstimate(flops=flops, transcendentals=0,
                                      bytes_accessed=bytes_accessed),
    )(alpha, xf, mask, pw_w, pw_b, dw_w, dw_b, bn_scale, bn_shift)

    return out.reshape(B, Cp, Hh, Wp)[:, :C, :H, :W]


def init_residual_block_params(key, C, n_blocks=3):
    """PyTorch-default init: Conv2d ~ U(-k,k) with k=1/sqrt(fan_in); PReLU alpha=0.25;
       BatchNorm2d gamma=1, beta=0, running_mean=0, running_var=1."""
    keys = jax.random.split(key, 4 * n_blocks)
    k_pw = 1.0 / (C ** 0.5)      # pointwise fan_in = C*1*1
    k_dw = 1.0 / 3.0             # depthwise fan_in = 1*3*3
    pw_w = jnp.stack([jax.random.uniform(keys[4 * i + 0], (C, C), jnp.float32, -k_pw, k_pw)
                      for i in range(n_blocks)])
    pw_b = jnp.stack([jax.random.uniform(keys[4 * i + 1], (C,), jnp.float32, -k_pw, k_pw)
                      for i in range(n_blocks)])
    dw_w = jnp.stack([jax.random.uniform(keys[4 * i + 2], (C, 3, 3), jnp.float32, -k_dw, k_dw)
                      for i in range(n_blocks)])
    dw_b = jnp.stack([jax.random.uniform(keys[4 * i + 3], (C,), jnp.float32, -k_dw, k_dw)
                      for i in range(n_blocks)])
    return {
        "pw_w": pw_w, "pw_b": pw_b, "dw_w": dw_w, "dw_b": dw_b,
        "alpha": jnp.full((n_blocks,), 0.25, jnp.float32),
        "bn_gamma": jnp.ones((n_blocks, C), jnp.float32),
        "bn_beta": jnp.zeros((n_blocks, C), jnp.float32),
        "bn_mean": jnp.zeros((n_blocks, C), jnp.float32),
        "bn_var": jnp.ones((n_blocks, C), jnp.float32),
    }


def residual_block_reference(x, params, *, bn_eps=1e-5):
    """Pure-JAX reference: x + (Conv1x1 -> depthwise3x3 -> PReLU -> BN(eval)) * n."""
    B, C, H, W = x.shape
    n_blocks = params["pw_w"].shape[0]
    y = x
    for blk in range(n_blocks):
        y = (jnp.einsum("oc,bchw->bohw", params["pw_w"][blk], y,
                        precision=jax.lax.Precision.HIGHEST)
             + params["pw_b"][blk][None, :, None, None])
        yp = jnp.pad(y, ((0, 0), (0, 0), (1, 1), (1, 1)))
        acc = jnp.zeros_like(y)
        for kh in range(3):
            for kw in range(3):
                acc = acc + (params["dw_w"][blk][:, kh, kw][None, :, None, None]
                             * yp[:, :, kh:kh + H, kw:kw + W])
        y = acc + params["dw_b"][blk][None, :, None, None]
        a = params["alpha"][blk]
        y = jnp.where(y > 0, y, a * y)
        scale = params["bn_gamma"][blk] / jnp.sqrt(params["bn_var"][blk] + bn_eps)
        shift = params["bn_beta"][blk] - params["bn_mean"][blk] * scale
        y = y * scale[None, :, None, None] + shift[None, :, None, None]
    return x + y


if __name__ == "__main__":
    # Small shapes consistent with the module: batch=2, channels=4, spatial=16x16, n=3.
    B, C, H, W = 2, 4, 16, 16
    n_blocks = 3

    key = jax.random.PRNGKey(0)
    kx, kp = jax.random.split(key)
    x = jax.random.normal(kx, (B, C, H, W), jnp.float32)
    params = init_residual_block_params(kp, C, n_blocks)

    out = jax.block_until_ready(residual_block_forward(x, params))

    ref = residual_block_reference(x, params)
    err = float(jnp.max(jnp.abs(out - ref)))
    assert out.shape == (B, C, H, W)
    # Tolerance covers MXU f32 multi-pass accumulation vs. Precision.HIGHEST reference.
    assert err < 2e-3, f"max abs error {err}"

    print("KERNEL_OK")
</pallas_src>

<mosaic_0001>
module attributes {stable_mosaic.version = 11 : i64} {
  func.func @_residual_block_kernel(%arg0: i32, %arg1: memref<3xf32, #tpu.memory_space<smem>>, %arg2: memref<1x8x2176xf32, #tpu.memory_space<vmem>>, %arg3: memref<1x2176xf32, #tpu.memory_space<vmem>>, %arg4: memref<3x8x8xf32, #tpu.memory_space<vmem>>, %arg5: memref<3x8x1xf32, #tpu.memory_space<vmem>>, %arg6: memref<3x9x8x1xf32, #tpu.memory_space<vmem>>, %arg7: memref<3x8x1xf32, #tpu.memory_space<vmem>>, %arg8: memref<8x1xf32, #tpu.memory_space<vmem>>, %arg9: memref<8x1xf32, #tpu.memory_space<vmem>>, %arg10: memref<1x8x2176xf32, #tpu.memory_space<vmem>>) attributes {dimension_semantics = [#tpu.dimension_semantics<parallel>], iteration_bounds = array<i64: 2>, scalar_prefetch = 0 : i64, scratch_operands = 0 : i64, tpu.core_type = #tpu.core_type<tc>, window_params = [{transform_indices = @transform_0, window_bounds = array<i64: 3>}, {transform_indices = @transform_1, window_bounds = array<i64: 1, 8, 2176>}, {pipeline_mode = #tpu.pipeline_mode<synchronous>, transform_indices = @transform_2, window_bounds = array<i64: 1, 2176>}, {pipeline_mode = #tpu.pipeline_mode<synchronous>, transform_indices = @transform_3, window_bounds = array<i64: 3, 8, 8>}, {pipeline_mode = #tpu.pipeline_mode<synchronous>, transform_indices = @transform_4, window_bounds = array<i64: 3, 8, 1>}, {pipeline_mode = #tpu.pipeline_mode<synchronous>, transform_indices = @transform_5, window_bounds = array<i64: 3, 9, 8, 1>}, {pipeline_mode = #tpu.pipeline_mode<synchronous>, transform_indices = @transform_6, window_bounds = array<i64: 3, 8, 1>}, {pipeline_mode = #tpu.pipeline_mode<synchronous>, transform_indices = @transform_7, window_bounds = array<i64: 8, 1>}, {pipeline_mode = #tpu.pipeline_mode<synchronous>, transform_indices = @transform_8, window_bounds = array<i64: 8, 1>}, {transform_indices = @transform_9, window_bounds = array<i64: 1, 8, 2176>}]} {
    %c0 = arith.constant 0 : index
    %c0_0 = arith.constant 0 : index
    %c0_1 = arith.constant 0 : index
    %0 = vector.load %arg2[%c0, %c0_0, %c0_1] : memref<1x8x2176xf32, #tpu.memory_space<vmem>>, vector<1x8x2176xf32>
    %1 = vector.shape_cast %0 : vector<1x8x2176xf32> to vector<8x2176xf32>
    %c0_2 = arith.constant 0 : index
    %c0_3 = arith.constant 0 : index
    %2 = vector.load %arg3[%c0_2, %c0_3] : memref<1x2176xf32, #tpu.memory_space<vmem>>, vector<1x2176xf32>
    %c0_4 = arith.constant 0 : index
    %c0_5 = arith.constant 0 : index
    %c0_6 = arith.constant 0 : index
    %3 = vector.load %arg4[%c0_4, %c0_5, %c0_6] : memref<3x8x8xf32, #tpu.memory_space<vmem>>, vector<1x8x8xf32>
    %4 = vector.shape_cast %3 : vector<1x8x8xf32> to vector<8x8xf32>
    %cst = arith.constant dense<0.000000e+00> : vector<8x2176xf32>
    %5 = tpu.matmul %4, %1, %cst {dimension_numbers = #tpu.dot_dimension_numbers<[1], [0], [0], [1], [0, 0, 1, 1], [], []>} : vector<8x8xf32>, vector<8x2176xf32>, vector<8x2176xf32> -> vector<8x2176xf32>
    %c0_7 = arith.constant 0 : index
    %c0_8 = arith.constant 0 : index
    %c0_9 = arith.constant 0 : index
    %6 = vector.load %arg5[%c0_7, %c0_8, %c0_9] : memref<3x8x1xf32, #tpu.memory_space<vmem>>, vector<1x8x1xf32>
    %7 = vector.shape_cast %6 : vector<1x8x1xf32> to vector<8x1xf32>
    %8 = vector.broadcast %7 : vector<8x1xf32> to vector<8x2176xf32>
    %9 = arith.addf %5, %8 : vector<8x2176xf32>
    %10 = vector.broadcast %2 : vector<1x2176xf32> to vector<8x2176xf32>
    %11 = arith.mulf %9, %10 : vector<8x2176xf32>
    %c1_i32 = arith.constant 1 : i32
    %12 = tpu.dynamic_rotate %11 by %c1_i32 dim 1 : vector<8x2176xf32>, i32 -> vector<8x2176xf32>
    %c2175_i32 = arith.constant 2175 : i32
    %13 = tpu.dynamic_rotate %11 by %c2175_i32 dim 1 : vector<8x2176xf32>, i32 -> vector<8x2176xf32>
    %c0_10 = arith.constant 0 : index
    %c0_11 = arith.constant 0 : index
    %c0_12 = arith.constant 0 : index
    %c0_13 = arith.constant 0 : index
    %14 = vector.load %arg6[%c0_10, %c0_11, %c0_12, %c0_13] : memref<3x9x8x1xf32, #tpu.memory_space<vmem>>, vector<1x1x8x1xf32>
    %15 = vector.shape_cast %14 : vector<1x1x8x1xf32> to vector<8x1xf32>
    %16 = vector.broadcast %15 : vector<8x1xf32> to vector<8x2176xf32>
    %17 = arith.mulf %16, %12 : vector<8x2176xf32>
    %c0_14 = arith.constant 0 : index
    %c1 = arith.constant 1 : index
    %c0_15 = arith.constant 0 : index
    %c0_16 = arith.constant 0 : index
    %18 = vector.load %arg6[%c0_14, %c1, %c0_15, %c0_16] : memref<3x9x8x1xf32, #tpu.memory_space<vmem>>, vector<1x1x8x1xf32>
    %19 = vector.shape_cast %18 : vector<1x1x8x1xf32> to vector<8x1xf32>
    %20 = vector.broadcast %19 : vector<8x1xf32> to vector<8x2176xf32>
    %21 = arith.mulf %20, %11 : vector<8x2176xf32>
    %22 = arith.addf %17, %21 : vector<8x2176xf32>
    %c0_17 = arith.constant 0 : index
    %c2 = arith.constant 2 : index
    %c0_18 = arith.constant 0 : index
    %c0_19 = arith.constant 0 : index
    %23 = vector.load %arg6[%c0_17, %c2, %c0_18, %c0_19] : memref<3x9x8x1xf32, #tpu.memory_space<vmem>>, vector<1x1x8x1xf32>
    %24 = vector.shape_cast %23 : vector<1x1x8x1xf32> to vector<8x1xf32>
    %25 = vector.broadcast %24 : vector<8x1xf32> to vector<8x2176xf32>
    %26 = arith.mulf %25, %13 : vector<8x2176xf32>
    %27 = arith.addf %22, %26 : vector<8x2176xf32>
    %c0_20 = arith.constant 0 : index
    %c3 = arith.constant 3 : index
    %c0_21 = arith.constant 0 : index
    %c0_22 = arith.constant 0 : index
    %28 = vector.load %arg6[%c0_20, %c3, %c0_21, %c0_22] : memref<3x9x8x1xf32, #tpu.memory_space<vmem>>, vector<1x1x8x1xf32>
    %29 = vector.shape_cast %28 : vector<1x1x8x1xf32> to vector<8x1xf32>
    %30 = vector.broadcast %29 : vector<8x1xf32> to vector<8x2176xf32>
    %31 = arith.mulf %30, %12 : vector<8x2176xf32>
    %c0_23 = arith.constant 0 : index
    %c4 = arith.constant 4 : index
    %c0_24 = arith.constant 0 : index
    %c0_25 = arith.constant 0 : index
    %32 = vector.load %arg6[%c0_23, %c4, %c0_24, %c0_25] : memref<3x9x8x1xf32, #tpu.memory_space<vmem>>, vector<1x1x8x1xf32>
    %33 = vector.shape_cast %32 : vector<1x1x8x1xf32> to vector<8x1xf32>
    %34 = vector.broadcast %33 : vector<8x1xf32> to vector<8x2176xf32>
    %35 = arith.mulf %34, %11 : vector<8x2176xf32>
    %36 = arith.addf %31, %35 : vector<8x2176xf32>
    %c0_26 = arith.constant 0 : index
    %c5 = arith.constant 5 : index
    %c0_27 = arith.constant 0 : index
    %c0_28 = arith.constant 0 : index
    %37 = vector.load %arg6[%c0_26, %c5, %c0_27, %c0_28] : memref<3x9x8x1xf32, #tpu.memory_space<vmem>>, vector<1x1x8x1xf32>
    %38 = vector.shape_cast %37 : vector<1x1x8x1xf32> to vector<8x1xf32>
    %39 = vector.broadcast %38 : vector<8x1xf32> to vector<8x2176xf32>
    %40 = arith.mulf %39, %13 : vector<8x2176xf32>
    %41 = arith.addf %36, %40 : vector<8x2176xf32>
    %c0_29 = arith.constant 0 : index
    %c6 = arith.constant 6 : index
    %c0_30 = arith.constant 0 : index
    %c0_31 = arith.constant 0 : index
    %42 = vector.load %arg6[%c0_29, %c6, %c0_30, %c0_31] : memref<3x9x8x1xf32, #tpu.memory_space<vmem>>, vector<1x1x8x1xf32>
    %43 = vector.shape_cast %42 : vector<1x1x8x1xf32> to vector<8x1xf32>
    %44 = vector.broadcast %43 : vector<8x1xf32> to vector<8x2176xf32>
    %45 = arith.mulf %44, %12 : vector<8x2176xf32>
    %c0_32 = arith.constant 0 : index
    %c7 = arith.constant 7 : index
    %c0_33 = arith.constant 0 : index
    %c0_34 = arith.constant 0 : index
    %46 = vector.load %arg6[%c0_32, %c7, %c0_33, %c0_34] : memref<3x9x8x1xf32, #tpu.memory_space<vmem>>, vector<1x1x8x1xf32>
    %47 = vector.shape_cast %46 : vector<1x1x8x1xf32> to vector<8x1xf32>
    %48 = vector.broadcast %47 : vector<8x1xf32> to vector<8x2176xf32>
    %49 = arith.mulf %48, %11 : vector<8x2176xf32>
    %50 = arith.addf %45, %49 : vector<8x2176xf32>
    %c0_35 = arith.constant 0 : index
    %c8 = arith.constant 8 : index
    %c0_36 = arith.constant 0 : index
    %c0_37 = arith.constant 0 : index
    %51 = vector.load %arg6[%c0_35, %c8, %c0_36, %c0_37] : memref<3x9x8x1xf32, #tpu.memory_space<vmem>>, vector<1x1x8x1xf32>
    %52 = vector.shape_cast %51 : vector<1x1x8x1xf32> to vector<8x1xf32>
    %53 = vector.broadcast %52 : vector<8x1xf32> to vector<8x2176xf32>
    %54 = arith.mulf %53, %13 : vector<8x2176xf32>
    %55 = arith.addf %50, %54 : vector<8x2176xf32>
    %c128_i32 = arith.constant 128 : i32
    %56 = tpu.dynamic_rotate %27 by %c128_i32 dim 1 : vector<8x2176xf32>, i32 -> vector<8x2176xf32>
    %57 = arith.addf %41, %56 : vector<8x2176xf32>
    %c2048_i32 = arith.constant 2048 : i32
    %58 = tpu.dynamic_rotate %55 by %c2048_i32 dim 1 : vector<8x2176xf32>, i32 -> vector<8x2176xf32>
    %59 = arith.addf %57, %58 : vector<8x2176xf32>
    %c0_38 = arith.constant 0 : index
    %c0_39 = arith.constant 0 : index
    %c0_40 = arith.constant 0 : index
    %60 = vector.load %arg7[%c0_38, %c0_39, %c0_40] : memref<3x8x1xf32, #tpu.memory_space<vmem>>, vector<1x8x1xf32>
    %61 = vector.shape_cast %60 : vector<1x8x1xf32> to vector<8x1xf32>
    %62 = vector.broadcast %61 : vector<8x1xf32> to vector<8x2176xf32>
    %63 = arith.addf %59, %62 : vector<8x2176xf32>
    %c0_41 = arith.constant 0 : index
    %64 = memref.load %arg1[%c0_41] : memref<3xf32, #tpu.memory_space<smem>>
    %cst_42 = arith.constant 0.000000e+00 : f32
    %65 = vector.broadcast %cst_42 : f32 to vector<8x2176xf32>
    %66 = arith.cmpf ogt, %63, %65 : vector<8x2176xf32>
    %67 = vector.broadcast %64 : f32 to vector<8x2176xf32>
    %68 = arith.mulf %67, %63 : vector<8x2176xf32>
    %69 = arith.select %66, %63, %68 : vector<8x2176xi1>, vector<8x2176xf32>
    %c1_43 = arith.constant 1 : index
    %c0_44 = arith.constant 0 : index
    %c0_45 = arith.constant 0 : index
    %70 = vector.load %arg4[%c1_43, %c0_44, %c0_45] : memref<3x8x8xf32, #tpu.memory_space<vmem>>, vector<1x8x8xf32>
    %71 = vector.shape_cast %70 : vector<1x8x8xf32> to vector<8x8xf32>
    %cst_46 = arith.constant dense<0.000000e+00> : vector<8x2176xf32>
    %72 = tpu.matmul %71, %69, %cst_46 {dimension_numbers = #tpu.dot_dimension_numbers<[1], [0], [0], [1], [0, 0, 1, 1], [], []>} : vector<8x8xf32>, vector<8x2176xf32>, vector<8x2176xf32> -> vector<8x2176xf32>
    %c1_47 = arith.constant 1 : index
    %c0_48 = arith.constant 0 : index
    %c0_49 = arith.constant 0 : index
    %73 = vector.load %arg5[%c1_47, %c0_48, %c0_49] : memref<3x8x1xf32, #tpu.memory_space<vmem>>, vector<1x8x1xf32>
    %74 = vector.shape_cast %73 : vector<1x8x1xf32> to vector<8x1xf32>
    %75 = vector.broadcast %74 : vector<8x1xf32> to vector<8x2176xf32>
    %76 = arith.addf %72, %75 : vector<8x2176xf32>
    %77 = vector.broadcast %2 : vector<1x2176xf32> to vector<8x2176xf32>
    %78 = arith.mulf %76, %77 : vector<8x2176xf32>
    %c1_i32_50 = arith.constant 1 : i32
    %79 = tpu.dynamic_rotate %78 by %c1_i32_50 dim 1 : vector<8x2176xf32>, i32 -> vector<8x2176xf32>
    %c2175_i32_51 = arith.constant 2175 : i32
    %80 = tpu.dynamic_rotate %78 by %c2175_i32_51 dim 1 : vector<8x2176xf32>, i32 -> vector<8x2176xf32>
    %c1_52 = arith.constant 1 : index
    %c0_53 = arith.constant 0 : index
    %c0_54 = arith.constant 0 : index
    %c0_55 = arith.constant 0 : index
    %81 = vector.load %arg6[%c1_52, %c0_53, %c0_54, %c0_55] : memref<3x9x8x1xf32, #tpu.memory_space<vmem>>, vector<1x1x8x1xf32>
    %82 = vector.shape_cast %81 : vector<1x1x8x1xf32> to vector<8x1xf32>
    %83 = vector.broadcast %82 : vector<8x1xf32> to vector<8x2176xf32>
    %84 = arith.mulf %83, %79 : vector<8x2176xf32>
    %c1_56 = arith.constant 1 : index
    %c1_57 = arith.constant 1 : index
    %c0_58 = arith.constant 0 : index
    %c0_59 = arith.constant 0 : index
    %85 = vector.load %arg6[%c1_56, %c1_57, %c0_58, %c0_59] : memref<3x9x8x1xf32, #tpu.memory_space<vmem>>, vector<1x1x8x1xf32>
    %86 = vector.shape_cast %85 : vector<1x1x8x1xf32> to vector<8x1xf32>
    %87 = vector.broadcast %86 : vector<8x1xf32> to vector<8x2176xf32>
    %88 = arith.mulf %87, %78 : vector<8x2176xf32>
    %89 = arith.addf %84, %88 : vector<8x2176xf32>
    %c1_60 = arith.constant 1 : index
    %c2_61 = arith.constant 2 : index
    %c0_62 = arith.constant 0 : index
    %c0_63 = arith.constant 0 : index
    %90 = vector.load %arg6[%c1_60, %c2_61, %c0_62, %c0_63] : memref<3x9x8x1xf32, #tpu.memory_space<vmem>>, vector<1x1x8x1xf32>
    %91 = vector.shape_cast %90 : vector<1x1x8x1xf32> to vector<8x1xf32>
    %92 = vector.broadcast %91 : vector<8x1xf32> to vector<8x2176xf32>
    %93 = arith.mulf %92, %80 : vector<8x2176xf32>
    %94 = arith.addf %89, %93 : vector<8x2176xf32>
    %c1_64 = arith.constant 1 : index
    %c3_65 = arith.constant 3 : index
    %c0_66 = arith.constant 0 : index
    %c0_67 = arith.constant 0 : index
    %95 = vector.load %arg6[%c1_64, %c3_65, %c0_66, %c0_67] : memref<3x9x8x1xf32, #tpu.memory_space<vmem>>, vector<1x1x8x1xf32>
    %96 = vector.shape_cast %95 : vector<1x1x8x1xf32> to vector<8x1xf32>
    %97 = vector.broadcast %96 : vector<8x1xf32> to vector<8x2176xf32>
    %98 = arith.mulf %97, %79 : vector<8x2176xf32>
    %c1_68 = arith.constant 1 : index
    %c4_69 = arith.constant 4 : index
    %c0_70 = arith.constant 0 : index
    %c0_71 = arith.constant 0 : index
    %99 = vector.load %arg6[%c1_68, %c4_69, %c0_70, %c0_71] : memref<3x9x8x1xf32, #tpu.memory_space<vmem>>, vector<1x1x8x1xf32>
    %100 = vector.shape_cast %99 : vector<1x1x8x1xf32> to vector<8x1xf32>
    %101 = vector.broadcast %100 : vector<8x1xf32> to vector<8x2176xf32>
    %102 = arith.mulf %101, %78 : vector<8x2176xf32>
    %103 = arith.addf %98, %102 : vector<8x2176xf32>
    %c1_72 = arith.constant 1 : index
    %c5_73 = arith.constant 5 : index
    %c0_74 = arith.constant 0 : index
    %c0_75 = arith.constant 0 : index
    %104 = vector.load %arg6[%c1_72, %c5_73, %c0_74, %c0_75] : memref<3x9x8x1xf32, #tpu.memory_space<vmem>>, vector<1x1x8x1xf32>
    %105 = vector.shape_cast %104 : vector<1x1x8x1xf32> to vector<8x1xf32>
    %106 = vector.broadcast %105 : vector<8x1xf32> to vector<8x2176xf32>
    %107 = arith.mulf %106, %80 : vector<8x2176xf32>
    %108 = arith.addf %103, %107 : vector<8x2176xf32>
    %c1_76 = arith.constant 1 : index
    %c6_77 = arith.constant 6 : index
    %c0_78 = arith.constant 0 : index
    %c0_79 = arith.constant 0 : index
    %109 = vector.load %arg6[%c1_76, %c6_77, %c0_78, %c0_79] : memref<3x9x8x1xf32, #tpu.memory_space<vmem>>, vector<1x1x8x1xf32>
    %110 = vector.shape_cast %109 : vector<1x1x8x1xf32> to vector<8x1xf32>
    %111 = vector.broadcast %110 : vector<8x1xf32> to vector<8x2176xf32>
    %112 = arith.mulf %111, %79 : vector<8x2176xf32>
    %c1_80 = arith.constant 1 : index
    %c7_81 = arith.constant 7 : index
    %c0_82 = arith.constant 0 : index
    %c0_83 = arith.constant 0 : index
    %113 = vector.load %arg6[%c1_80, %c7_81, %c0_82, %c0_83] : memref<3x9x8x1xf32, #tpu.memory_space<vmem>>, vector<1x1x8x1xf32>
    %114 = vector.shape_cast %113 : vector<1x1x8x1xf32> to vector<8x1xf32>
    %115 = vector.broadcast %114 : vector<8x1xf32> to vector<8x2176xf32>
    %116 = arith.mulf %115, %78 : vector<8x2176xf32>
    %117 = arith.addf %112, %116 : vector<8x2176xf32>
    %c1_84 = arith.constant 1 : index
    %c8_85 = arith.constant 8 : index
    %c0_86 = arith.constant 0 : index
    %c0_87 = arith.constant 0 : index
    %118 = vector.load %arg6[%c1_84, %c8_85, %c0_86, %c0_87] : memref<3x9x8x1xf32, #tpu.memory_space<vmem>>, vector<1x1x8x1xf32>
    %119 = vector.shape_cast %118 : vector<1x1x8x1xf32> to vector<8x1xf32>
    %120 = vector.broadcast %119 : vector<8x1xf32> to vector<8x2176xf32>
    %121 = arith.mulf %120, %80 : vector<8x2176xf32>
    %122 = arith.addf %117, %121 : vector<8x2176xf32>
    %c128_i32_88 = arith.constant 128 : i32
    %123 = tpu.dynamic_rotate %94 by %c128_i32_88 dim 1 : vector<8x2176xf32>, i32 -> vector<8x2176xf32>
    %124 = arith.addf %108, %123 : vector<8x2176xf32>
    %c2048_i32_89 = arith.constant 2048 : i32
    %125 = tpu.dynamic_rotate %122 by %c2048_i32_89 dim 1 : vector<8x2176xf32>, i32 -> vector<8x2176xf32>
    %126 = arith.addf %124, %125 : vector<8x2176xf32>
    %c1_90 = arith.constant 1 : index
    %c0_91 = arith.constant 0 : index
    %c0_92 = arith.constant 0 : index
    %127 = vector.load %arg7[%c1_90, %c0_91, %c0_92] : memref<3x8x1xf32, #tpu.memory_space<vmem>>, vector<1x8x1xf32>
    %128 = vector.shape_cast %127 : vector<1x8x1xf32> to vector<8x1xf32>
    %129 = vector.broadcast %128 : vector<8x1xf32> to vector<8x2176xf32>
    %130 = arith.addf %126, %129 : vector<8x2176xf32>
    %c1_93 = arith.constant 1 : index
    %131 = memref.load %arg1[%c1_93] : memref<3xf32, #tpu.memory_space<smem>>
    %cst_94 = arith.constant 0.000000e+00 : f32
    %132 = vector.broadcast %cst_94 : f32 to vector<8x2176xf32>
    %133 = arith.cmpf ogt, %130, %132 : vector<8x2176xf32>
    %134 = vector.broadcast %131 : f32 to vector<8x2176xf32>
    %135 = arith.mulf %134, %130 : vector<8x2176xf32>
    %136 = arith.select %133, %130, %135 : vector<8x2176xi1>, vector<8x2176xf32>
    %c2_95 = arith.constant 2 : index
    %c0_96 = arith.constant 0 : index
    %c0_97 = arith.constant 0 : index
    %137 = vector.load %arg4[%c2_95, %c0_96, %c0_97] : memref<3x8x8xf32, #tpu.memory_space<vmem>>, vector<1x8x8xf32>
    %138 = vector.shape_cast %137 : vector<1x8x8xf32> to vector<8x8xf32>
    %cst_98 = arith.constant dense<0.000000e+00> : vector<8x2176xf32>
    %139 = tpu.matmul %138, %136, %cst_98 {dimension_numbers = #tpu.dot_dimension_numbers<[1], [0], [0], [1], [0, 0, 1, 1], [], []>} : vector<8x8xf32>, vector<8x2176xf32>, vector<8x2176xf32> -> vector<8x2176xf32>
    %c2_99 = arith.constant 2 : index
    %c0_100 = arith.constant 0 : index
    %c0_101 = arith.constant 0 : index
    %140 = vector.load %arg5[%c2_99, %c0_100, %c0_101] : memref<3x8x1xf32, #tpu.memory_space<vmem>>, vector<1x8x1xf32>
    %141 = vector.shape_cast %140 : vector<1x8x1xf32> to vector<8x1xf32>
    %142 = vector.broadcast %141 : vector<8x1xf32> to vector<8x2176xf32>
    %143 = arith.addf %139, %142 : vector<8x2176xf32>
    %144 = vector.broadcast %2 : vector<1x2176xf32> to vector<8x2176xf32>
    %145 = arith.mulf %143, %144 : vector<8x2176xf32>
    %c1_i32_102 = arith.constant 1 : i32
    %146 = tpu.dynamic_rotate %145 by %c1_i32_102 dim 1 : vector<8x2176xf32>, i32 -> vector<8x2176xf32>
    %c2175_i32_103 = arith.constant 2175 : i32
    %147 = tpu.dynamic_rotate %145 by %c2175_i32_103 dim 1 : vector<8x2176xf32>, i32 -> vector<8x2176xf32>
    %c2_104 = arith.constant 2 : index
    %c0_105 = arith.constant 0 : index
    %c0_106 = arith.constant 0 : index
    %c0_107 = arith.constant 0 : index
    %148 = vector.load %arg6[%c2_104, %c0_105, %c0_106, %c0_107] : memref<3x9x8x1xf32, #tpu.memory_space<vmem>>, vector<1x1x8x1xf32>
    %149 = vector.shape_cast %148 : vector<1x1x8x1xf32> to vector<8x1xf32>
    %150 = vector.broadcast %149 : vector<8x1xf32> to vector<8x2176xf32>
    %151 = arith.mulf %150, %146 : vector<8x2176xf32>
    %c2_108 = arith.constant 2 : index
    %c1_109 = arith.constant 1 : index
    %c0_110 = arith.constant 0 : index
    %c0_111 = arith.constant 0 : index
    %152 = vector.load %arg6[%c2_108, %c1_109, %c0_110, %c0_111] : memref<3x9x8x1xf32, #tpu.memory_space<vmem>>, vector<1x1x8x1xf32>
    %153 = vector.shape_cast %152 : vector<1x1x8x1xf32> to vector<8x1xf32>
    %154 = vector.broadcast %153 : vector<8x1xf32> to vector<8x2176xf32>
    %155 = arith.mulf %154, %145 : vector<8x2176xf32>
    %156 = arith.addf %151, %155 : vector<8x2176xf32>
    %c2_112 = arith.constant 2 : index
    %c2_113 = arith.constant 2 : index
    %c0_114 = arith.constant 0 : index
    %c0_115 = arith.constant 0 : index
    %157 = vector.load %arg6[%c2_112, %c2_113, %c0_114, %c0_115] : memref<3x9x8x1xf32, #tpu.memory_space<vmem>>, vector<1x1x8x1xf32>
    %158 = vector.shape_cast %157 : vector<1x1x8x1xf32> to vector<8x1xf32>
    %159 = vector.broadcast %158 : vector<8x1xf32> to vector<8x2176xf32>
    %160 = arith.mulf %159, %147 : vector<8x2176xf32>
    %161 = arith.addf %156, %160 : vector<8x2176xf32>
    %c2_116 = arith.constant 2 : index
    %c3_117 = arith.constant 3 : index
    %c0_118 = arith.constant 0 : index
    %c0_119 = arith.constant 0 : index
    %162 = vector.load %arg6[%c2_116, %c3_117, %c0_118, %c0_119] : memref<3x9x8x1xf32, #tpu.memory_space<vmem>>, vector<1x1x8x1xf32>
    %163 = vector.shape_cast %162 : vector<1x1x8x1xf32> to vector<8x1xf32>
    %164 = vector.broadcast %163 : vector<8x1xf32> to vector<8x2176xf32>
    %165 = arith.mulf %164, %146 : vector<8x2176xf32>
    %c2_120 = arith.constant 2 : index
    %c4_121 = arith.constant 4 : index
    %c0_122 = arith.constant 0 : index
    %c0_123 = arith.constant 0 : index
    %166 = vector.load %arg6[%c2_120, %c4_121, %c0_122, %c0_123] : memref<3x9x8x1xf32, #tpu.memory_space<vmem>>, vector<1x1x8x1xf32>
    %167 = vector.shape_cast %166 : vector<1x1x8x1xf32> to vector<8x1xf32>
    %168 = vector.broadcast %167 : vector<8x1xf32> to vector<8x2176xf32>
    %169 = arith.mulf %168, %145 : vector<8x2176xf32>
    %170 = arith.addf %165, %169 : vector<8x2176xf32>
    %c2_124 = arith.constant 2 : index
    %c5_125 = arith.constant 5 : index
    %c0_126 = arith.constant 0 : index
    %c0_127 = arith.constant 0 : index
    %171 = vector.load %arg6[%c2_124, %c5_125, %c0_126, %c0_127] : memref<3x9x8x1xf32, #tpu.memory_space<vmem>>, vector<1x1x8x1xf32>
    %172 = vector.shape_cast %171 : vector<1x1x8x1xf32> to vector<8x1xf32>
    %173 = vector.broadcast %172 : vector<8x1xf32> to vector<8x2176xf32>
    %174 = arith.mulf %173, %147 : vector<8x2176xf32>
    %175 = arith.addf %170, %174 : vector<8x2176xf32>
    %c2_128 = arith.constant 2 : index
    %c6_129 = arith.constant 6 : index
    %c0_130 = arith.constant 0 : index
    %c0_131 = arith.constant 0 : index
    %176 = vector.load %arg6[%c2_128, %c6_129, %c0_130, %c0_131] : memref<3x9x8x1xf32, #tpu.memory_space<vmem>>, vector<1x1x8x1xf32>
    %177 = vector.shape_cast %176 : vector<1x1x8x1xf32> to vector<8x1xf32>
    %178 = vector.broadcast %177 : vector<8x1xf32> to vector<8x2176xf32>
    %179 = arith.mulf %178, %146 : vector<8x2176xf32>
    %c2_132 = arith.constant 2 : index
    %c7_133 = arith.constant 7 : index
    %c0_134 = arith.constant 0 : index
    %c0_135 = arith.constant 0 : index
    %180 = vector.load %arg6[%c2_132, %c7_133, %c0_134, %c0_135] : memref<3x9x8x1xf32, #tpu.memory_space<vmem>>, vector<1x1x8x1xf32>
    %181 = vector.shape_cast %180 : vector<1x1x8x1xf32> to vector<8x1xf32>
    %182 = vector.broadcast %181 : vector<8x1xf32> to vector<8x2176xf32>
    %183 = arith.mulf %182, %145 : vector<8x2176xf32>
    %184 = arith.addf %179, %183 : vector<8x2176xf32>
    %c2_136 = arith.constant 2 : index
    %c8_137 = arith.constant 8 : index
    %c0_138 = arith.constant 0 : index
    %c0_139 = arith.constant 0 : index
    %185 = vector.load %arg6[%c2_136, %c8_137, %c0_138, %c0_139] : memref<3x9x8x1xf32, #tpu.memory_space<vmem>>, vector<1x1x8x1xf32>
    %186 = vector.shape_cast %185 : vector<1x1x8x1xf32> to vector<8x1xf32>
    %187 = vector.broadcast %186 : vector<8x1xf32> to vector<8x2176xf32>
    %188 = arith.mulf %187, %147 : vector<8x2176xf32>
    %189 = arith.addf %184, %188 : vector<8x2176xf32>
    %c128_i32_140 = arith.constant 128 : i32
    %190 = tpu.dynamic_rotate %161 by %c128_i32_140 dim 1 : vector<8x2176xf32>, i32 -> vector<8x2176xf32>
    %191 = arith.addf %175, %190 : vector<8x2176xf32>
    %c2048_i32_141 = arith.constant 2048 : i32
    %192 = tpu.dynamic_rotate %189 by %c2048_i32_141 dim 1 : vector<8x2176xf32>, i32 -> vector<8x2176xf32>
    %193 = arith.addf %191, %192 : vector<8x2176xf32>
    %c2_142 = arith.constant 2 : index
    %c0_143 = arith.constant 0 : index
    %c0_144 = arith.constant 0 : index
    %194 = vector.load %arg7[%c2_142, %c0_143, %c0_144] : memref<3x8x1xf32, #tpu.memory_space<vmem>>, vector<1x8x1xf32>
    %195 = vector.shape_cast %194 : vector<1x8x1xf32> to vector<8x1xf32>
    %196 = vector.broadcast %195 : vector<8x1xf32> to vector<8x2176xf32>
    %197 = arith.addf %193, %196 : vector<8x2176xf32>
    %c2_145 = arith.constant 2 : index
    %198 = memref.load %arg1[%c2_145] : memref<3xf32, #tpu.memory_space<smem>>
    %cst_146 = arith.constant 0.000000e+00 : f32
    %199 = vector.broadcast %cst_146 : f32 to vector<8x2176xf32>
    %200 = arith.cmpf ogt, %197, %199 : vector<8x2176xf32>
    %201 = vector.broadcast %198 : f32 to vector<8x2176xf32>
    %202 = arith.mulf %201, %197 : vector<8x2176xf32>
    %203 = arith.select %200, %197, %202 : vector<8x2176xi1>, vector<8x2176xf32>
    %c0_147 = arith.constant 0 : index
    %c0_148 = arith.constant 0 : index
    %204 = vector.load %arg8[%c0_147, %c0_148] : memref<8x1xf32, #tpu.memory_space<vmem>>, vector<8x1xf32>
    %205 = vector.broadcast %204 : vector<8x1xf32> to vector<8x2176xf32>
    %206 = arith.mulf %203, %205 : vector<8x2176xf32>
    %c0_149 = arith.constant 0 : index
    %c0_150 = arith.constant 0 : index
    %207 = vector.load %arg9[%c0_149, %c0_150] : memref<8x1xf32, #tpu.memory_space<vmem>>, vector<8x1xf32>
    %208 = vector.broadcast %207 : vector<8x1xf32> to vector<8x2176xf32>
    %209 = arith.addf %206, %208 : vector<8x2176xf32>
    %210 = arith.addf %1, %209 : vector<8x2176xf32>
    %c0_151 = arith.constant 0 : index
    %c0_152 = arith.constant 0 : index
    %c0_153 = arith.constant 0 : index
    %211 = vector.load %arg10[%c0_151, %c0_152, %c0_153] : memref<1x8x2176xf32, #tpu.memory_space<vmem>>, vector<1x8x2176xf32>
    %212 = vector.shape_cast %211 : vector<1x8x2176xf32> to vector<8x2176xf32>
    %213 = vector.shape_cast %210 : vector<8x2176xf32> to vector<1x8x2176xf32>
    tpu.vector_store %arg10[%c0_151, %c0_152, %c0_153], %213 {strides = array<i32>} : memref<1x8x2176xf32, #tpu.memory_space<vmem>>, vector<1x8x2176xf32>,
    return
  }
  func.func @transform_0(%arg0: i32) -> i32 {
    %c0_i32 = arith.constant 0 : i32
    %c0_i32_0 = arith.constant 0 : i32
    return %c0_i32 : i32
  }
  func.func @transform_1(%arg0: i32) -> (i32, i32, i32) {
    %c0_i32 = arith.constant 0 : i32
    %c0_i32_0 = arith.constant 0 : i32
    %c0_i32_1 = arith.constant 0 : i32
    return %arg0, %c0_i32, %c0_i32_0 : i32, i32, i32
  }
  func.func @transform_2(%arg0: i32) -> (i32, i32) {
    %c0_i32 = arith.constant 0 : i32
    %c0_i32_0 = arith.constant 0 : i32
    %c0_i32_1 = arith.constant 0 : i32
    return %c0_i32, %c0_i32_0 : i32, i32
  }
  func.func @transform_3(%arg0: i32) -> (i32, i32, i32) {
    %c0_i32 = arith.constant 0 : i32
    %c0_i32_0 = arith.constant 0 : i32
    %c0_i32_1 = arith.constant 0 : i32
    %c0_i32_2 = arith.constant 0 : i32
    return %c0_i32, %c0_i32_0, %c0_i32_1 : i32, i32, i32
  }
  func.func @transform_4(%arg0: i32) -> (i32, i32, i32) {
    %c0_i32 = arith.constant 0 : i32
    %c0_i32_0 = arith.constant 0 : i32
    %c0_i32_1 = arith.constant 0 : i32
    %c0_i32_2 = arith.constant 0 : i32
    return %c0_i32, %c0_i32_0, %c0_i32_1 : i32, i32, i32
  }
  func.func @transform_5(%arg0: i32) -> (i32, i32, i32, i32) {
    %c0_i32 = arith.constant 0 : i32
    %c0_i32_0 = arith.constant 0 : i32
    %c0_i32_1 = arith.constant 0 : i32
    %c0_i32_2 = arith.constant 0 : i32
    %c0_i32_3 = arith.constant 0 : i32
    return %c0_i32, %c0_i32_0, %c0_i32_1, %c0_i32_2 : i32, i32, i32, i32
  }
  func.func @transform_6(%arg0: i32) -> (i32, i32, i32) {
    %c0_i32 = arith.constant 0 : i32
    %c0_i32_0 = arith.constant 0 : i32
    %c0_i32_1 = arith.constant 0 : i32
    %c0_i32_2 = arith.constant 0 : i32
    return %c0_i32, %c0_i32_0, %c0_i32_1 : i32, i32, i32
  }
  func.func @transform_7(%arg0: i32) -> (i32, i32) {
    %c0_i32 = arith.constant 0 : i32
    %c0_i32_0 = arith.constant 0 : i32
    %c0_i32_1 = arith.constant 0 : i32
    return %c0_i32, %c0_i32_0 : i32, i32
  }
  func.func @transform_8(%arg0: i32) -> (i32, i32) {
    %c0_i32 = arith.constant 0 : i32
    %c0_i32_0 = arith.constant 0 : i32
    %c0_i32_1 = arith.constant 0 : i32
    return %c0_i32, %c0_i32_0 : i32, i32
  }
  func.func @transform_9(%arg0: i32) -> (i32, i32, i32) {
    %c0_i32 = arith.constant 0 : i32
    %c0_i32_0 = arith.constant 0 : i32
    %c0_i32_1 = arith.constant 0 : i32
    return %arg0, %c0_i32, %c0_i32_0 : i32, i32, i32
  }
}

</mosaic_0001>

<bundles_post_ra>
// kernel: tpu_custom_call.1
= control target key start
LH: loop header
LB: loop body
LE: loop exit
PB: predicated region body
PF: predicated region fallthrough
CT: control target
= control target key end

     0   :  { %14 = vsyncpa [#allocation5], 0  ;;  %s6511_s0 = inlined_call_operand.vmem [shape: f32[3], index: 0, kind: input, shape index: {}]   ;;  %s6512_s1 = inlined_call_operand.vmem [shape: f32[2,8,2176], index: 1, kind: input, shape index: {}]   ;;  %s6513_s2 = inlined_call_operand.hbm [shape: f32[1,2176], index: 2, kind: input, shape index: {}]   ;;  %s6514_s3 = inlined_call_operand.vmem [shape: f32[3,8,8], index: 3, kind: input, shape index: {}]   ;;  %s6515_s4 = inlined_call_operand.vmem [shape: f32[3,8,1], index: 4, kind: input, shape index: {}]   ;;  %s6516_s5 = inlined_call_operand.vmem [shape: f32[3,9,8,1], index: 5, kind: input, shape index: {}]   ;;  %s6517_s6 = inlined_call_operand.vmem [shape: f32[3,8,1], index: 6, kind: input, shape index: {}]   ;;  %s6518_s7 = inlined_call_operand.vmem [shape: f32[8,1], index: 7, kind: input, shape index: {}]   ;;  %s6519_s8 = inlined_call_operand.vmem [shape: f32[8,1], index: 8, kind: input, shape index: {}]   ;;  %s6520_s9 = inlined_call_operand.hbm [shape: f32[2,8,2176], index: 9, kind: output, shape index: {}]  }
   0x1   :  { %15 = vsyncpa [#allocation3], 0 }
   0x2   :  { %16 = vsyncpa [#allocation4], 0 }
   0x3   :  { %18 = vsyncpa [#allocation4 + $0x1], 0  ;;  %s3656_s30 = smov 0   ;;  %s3658_s10 = smov 0  }
   0x4   :  { %s3660_s11 = smov 0   ;;  %s3662_s12 = smov 0  }
   0x5 LB: > { %s3677_s13 = sadd.s32 4294967295, %s3599_s12   ;;  %s3298_s14 = sadd.s32 4294967294, %s3599_s12   ;;  %s3599_s12 = sphi %s3662_s12, %s6886_s12   ;;  %s3595_s11 = sphi %s3660_s11, %s6885_s11   ;;  %s3591_s10 = sphi %s3658_s10, %s6884_s10   ;;  %s3587_s30 = sphi %s3656_s30, %s6883_s30  }
   0x6   : > { %s3681_s15 = sadd.s32 1, %s3599_s12   ;;  %s225_s16 = sadd.s32 1, %s3595_s11 }
   0x7   : > { %s222_s17 = ssub.s32 %s3599_s12, %s3681_s15  ;;  %p235_p0 = scmp.ne.s32.totalorder %s3595_s11, %s3591_s10 }
   0x8   : > { %p223_p1 = scmp.eq.s32.totalorder %s222_s17, 0  ;;  %p236_p2 = scmp.eq.s32.totalorder %s3677_s13, 1 }
   0x9   : > { %p241_p3 = scmp.ne.s32.totalorder %s3591_s10, %s3587_s30  ;;  %p242_p4 = scmp.eq.s32.totalorder %s3298_s14, 1 }
   0xa   : > { %s3692_s18 = scalar_select %p223_p1, %s3595_s11, %s225_s16  }
   0xb   : > { %p3694_p5 = por %p236_p2, %p235_p0  ;;  %p3698_p6 = por %p242_p4, %p241_p3 }
   0xc   : > { %p3299_p7 = scmp.ge.s32.totalorder %s3599_s12, 1  ;;  %p249_p8 = scmp.lt.s32.totalorder %s3599_s12, 3 }
   0xd   : > { %p3419_p9 = scmp.eq.s32.totalorder %s3677_s13, 0  ;;  %s261_s23 = sshll.u32 %s6511_s0, 4  ;;  %s262_s23 = int_to_ptr.vmem [resolvable:$true] %s261_s23 }
   0xe   : > { %p250_p10 = pnand %p3299_p7, %p249_p8  ;;  %s271_s26 = sshll.u32 %s6513_s2, 4  ;;  %s272_s26 = int_to_ptr.hbm [resolvable:$true] %s271_s26 }
   0xf   : > { %s3601_s27 = smov [#allocation6]   ;;  %s3602_s29 = smov [#allocation2]  }
  0x10   : > { %p3408_p11 = pneg %p250_p10  ;;  %s273_s28 = sshll.u32 %s3601_s27, 4  ;;  %s274_s28 = int_to_ptr.vmem [resolvable:$true] %s273_s28 }
  0x11   : > { %312 = sbr.rel (%p250_p10) target bundleno = 1097 (0x449), region = 56 }
  0x12   : > { %p3409_p12 = pnand %p3419_p9, %p3408_p11 }
  0x14   : > { %3411 = dma.vmem_to_smem (!%p3409_p12), %s262_s23, 16, %s3602_s29, [#allocation5]  }
  0x15   : > { %3414 = dma.hbm_to_vmem [thread:$0]  (!%p3409_p12), %s272_s26, 272, %s274_s28, [#allocation3]  }
  0x16   : > { %3574 = dma.done.wait (%p3419_p9), [#allocation5], 16  }
  0x17   : > { %3576 = vsyncadd (%p3419_p9), [#allocation5], 4294967280 }
  0x18   : > { %3578 = dma.done.wait (%p3419_p9), [#allocation3], 272  }
  0x19   : > { %3580 = vsyncadd (%p3419_p9), [#allocation3], 4294967024 }
  0x1a   : > { %324 = sfence }
  0x1b   : > { %v381_v0 = vld [vmem:[%s6515_s4] sm:$0xff]  ;;  %p355_p13 = scmp.lt.s32.totalorder %s3677_s13, 1  ;;  %v3603_v1 = vmov 0   ;;  %vm387_vm0 = vcmask 64512   ;;  %v3324_v8 = vld [vmem:[%s6516_s5 + $0x8] sm:$0xff]  ;;  %v3326_v18 = vld [vmem:[%s6516_s5 + $0x18] sm:$0xff] }
  0x1c   : > { %3461 = vset.pattern.permute.xlu0 %v3603_v1  ;;  %3462 = vset.pattern.permute.xlu2 %v3603_v1  ;;  %v891_v2 = vld [vmem:[%s6516_s5] sm:$0xff]  ;;  %v3325_v19 = vld [vmem:[%s6516_s5 + $0x10] sm:$0xff]  ;;  %v3328_v24 = vld [vmem:[%s6516_s5 + $0x28] sm:$0xff]  ;;  %s3604_s24 = smov 1   ;;  %s3605_s25 = smov 127  }
  0x1d   : > { %384 = vperm.xlu0 %3461, %v381_v0   ;;  %s356_s17 = scalar_select %p355_p13, %s3677_s13, 1  ;;  %3463 = vset.pattern.permute.xlu1 %v3603_v1  ;;  %v3737_v3 = vld [vmem:[%s6514_s3] sm:$0xff]  ;;  %v3330_v25 = vld [vmem:[%s6516_s5 + $0x38] sm:$0xff]  ;;  %v3329_v28 = vld [vmem:[%s6516_s5 + $0x30] sm:$0xff] }
  0x1e   : > { %894 = vperm.xlu2 %3462, %v891_v2   ;;  %v3327_v17 = vld [vmem:[%s6516_s5 + $0x20] sm:$0xff]  ;;  %1000 = vperm.xlu1 %3463, %v3326_v18   ;;  %v3873_v61 = vld [vmem:[#allocation6 + $0x8] sm:$0xff]  ;;  %s4193_s29 = sld [smem:[#allocation2]] }
  0x1f   : > { %s3396_s23 = smul.u32 136, %s356_s17  ;;  %v1242_v27 = vld [vmem:[%s6517_s6] sm:$0xff]  ;;  %s5200_s14 = sld [smem:[#allocation2 + $0x1]] }
  0x20   : > { %v3331_v29 = vld [vmem:[%s6516_s5 + $0x40] sm:$0xff]  ;;  %s3391_s22 = sld [smem:[#allocation2 + $0x2]] }
  0x21   : > { %s3732_s26 = scalar_lea.vmem %s6512_s1, %s3396_s23  ;;  %v377_v31 = vld [vmem:[#allocation6] sm:$0xff]  ;;  %s352_s23 = sand.u32 1, %s3591_s10  }
  0x22   : > { %v360_v4 = vld [vmem:[%s3732_s26] sm:$0xff]  ;;  %v361_v5 = vld [vmem:[%s3732_s26 + $0x8] sm:$0xff]  ;;  %v362_v6 = vld [vmem:[%s3732_s26 + $0x10] sm:$0xff]  ;;  %v3821_v33 = vperm.slane %v377_v31, 0  ;;  %v3823_v34 = vperm.slane %v377_v31, 1  ;;  %v3843_v43 = vperm.slane %v377_v31, 2 }
  0x23   : > { %406 = vmatpush.msra.mxu0 %v360_v4  ;;  %426 = vmatpush.msra.mxu1 %v361_v5  ;;  %v363_v7 = vld [vmem:[%s3732_s26 + $0x18] sm:$0xff]  ;;  %v364_v9 = vld [vmem:[%s3732_s26 + $0x20] sm:$0xff]  ;;  %v365_v10 = vld [vmem:[%s3732_s26 + $0x28] sm:$0xff]  ;;  %v3849_v46 = vperm.slane %v377_v31, 3  ;;  %v3851_v47 = vperm.slane %v377_v31, 4  ;;  %v3854_v51 = vperm.slane %v377_v31, 5 }
  0x24   : > { %446 = vmatpush.msra.mxu2 %v362_v6  ;;  %466 = vmatpush.msra.mxu3 %v363_v7  ;;  %v366_v11 = vld [vmem:[%s3732_s26 + $0x30] sm:$0xff]  ;;  %v367_v12 = vld [vmem:[%s3732_s26 + $0x38] sm:$0xff]  ;;  %v368_v13 = vld [vmem:[%s3732_s26 + $0x40] sm:$0xff]  ;;  %6591 = vst [vmem:[#allocation11_spill] sm:$0xff] %v3821_v33  ;;  %v3893_v1 = vperm.slane %v377_v31, 6  ;;  %v3907_v6 = vperm.slane %v377_v31, 7 }
  0x25   : > { %3307 = vmatmul.msk.f32.vlgmr.msra.gmra.mxu0 %vm387_vm0, %v3737_v3  ;;  %3308 = vmatmul.msk.f32.vlgmr.msra.gmra.mxu1 %vm387_vm0, %v3737_v3  ;;  %v369_v14 = vld [vmem:[%s3732_s26 + $0x48] sm:$0xff]  ;;  %v370_v15 = vld [vmem:[%s3732_s26 + $0x50] sm:$0xff]  ;;  %v371_v16 = vld [vmem:[%s3732_s26 + $0x58] sm:$0xff]  ;;  %6592 = vst [vmem:[#allocation12_spill] sm:$0xff] %v3823_v34  ;;  %v3910_v7 = vperm.slane %v3873_v61, 0  ;;  %v3973_v31 = vperm.slane %v3873_v61, 3 }
  0x26   : > { %3309 = vmatmul.msk.f32.vlgmr.msra.gmra.mxu2 %vm387_vm0, %v3737_v3  ;;  %3310 = vmatmul.msk.f32.vlgmr.msra.gmra.mxu3 %vm387_vm0, %v3737_v3  ;;  %v372_v20 = vld [vmem:[%s3732_s26 + $0x60] sm:$0xff]  ;;  %v373_v21 = vld [vmem:[%s3732_s26 + $0x68] sm:$0xff]  ;;  %v374_v22 = vld [vmem:[%s3732_s26 + $0x70] sm:$0xff]  ;;  %6593 = vst [vmem:[#allocation13_spill] sm:$0xff] %v3843_v43  ;;  %s6384_s27 = smul.u32 136, %s352_s23  ;;  %s3199_s17 = scalar_lea.sflag [#allocation4], %s352_s23 }
  0x27   : > { %918 = vperm.xlu0 %3461, %v3324_v8   ;;  %486 = vmatpush.msrb.mxu0 %v364_v9  ;;  %v375_v23 = vld [vmem:[%s3732_s26 + $0x78] sm:$0xff]  ;;  %v376_v26 = vld [vmem:[%s3732_s26 + $0x80] sm:$0xff]  ;;  %6594 = vst [vmem:[#allocation14_spill] sm:$0xff] %v3849_v46 }
  0x28   : > { %506 = vmatpush.msrb.mxu1 %v365_v10  ;;  %526 = vmatpush.msrb.mxu2 %v366_v11  ;;  %6595 = vst [vmem:[#allocation15_spill] sm:$0xff] %v3851_v47  ;;  %s6431_s28 = scalar_lea.vmem [#allocation7], %s6384_s27 }
  0x29   : > { %546 = vmatpush.msrb.mxu3 %v367_v12  ;;  %566 = vmatpush.msra.mxu0 %v368_v13  ;;  %6596 = vst [vmem:[#allocation16_spill] sm:$0xff] %v3854_v51  ;;  %v3918_v12 = vperm.slane %v3873_v61, 1 }
  0x2a   : > { %586 = vmatpush.msra.mxu1 %v369_v14  ;;  %606 = vmatpush.msra.mxu2 %v370_v15  ;;  %6597 = vst [vmem:[#allocation17_spill] sm:$0xff] %v3893_v1 }
  0x2b   : > { %626 = vmatpush.msra.mxu3 %v371_v16  ;;  %1024 = vperm.xlu2 %3462, %v3327_v17   ;;  %6598 = vst [vmem:[#allocation18_spill] sm:$0xff] %v3907_v6 }
  0x2c   : > { %1065 = vperm.xlu1 %3463, %v3328_v24   ;;  %6599 = vst [vmem:[#allocation19_spill] sm:$0xff] %v3910_v7 }
  0x2d   : > { %3311 = vmatmul.msk.f32.vlgmr.msrb.gmra.mxu0 %vm387_vm0, %v3737_v3  ;;  %3312 = vmatmul.msk.f32.vlgmr.msrb.gmra.mxu1 %vm387_vm0, %v3737_v3  ;;  %6600 = vst [vmem:[#allocation20_spill] sm:$0xff] %v3918_v12 }
  0x2e   : > { %3313 = vmatmul.msk.f32.vlgmr.msrb.gmra.mxu2 %vm387_vm0, %v3737_v3  ;;  %3314 = vmatmul.msk.f32.vlgmr.msrb.gmra.mxu3 %vm387_vm0, %v3737_v3  ;;  %6606 = vst [vmem:[#allocation26_spill] sm:$0xff] %v3973_v31 }
  0x2f   : > { %959 = vperm.xlu0 %3461, %v3325_v19   ;;  %646 = vmatpush.msrb.mxu0 %v372_v20 }
  0x30   : > { %666 = vmatpush.msrb.mxu1 %v373_v21  ;;  %686 = vmatpush.msrb.mxu2 %v374_v22 }
  0x31   : > { %706 = vmatpush.msrb.mxu3 %v375_v23 }
  0x33   : > { %1106 = vperm.xlu2 %3462, %v3329_v28  }
  0x34   : > { %1245 = vperm.xlu1 %3463, %v1242_v27  }
  0x35   : > { %3315 = vmatmul.msk.f32.vlgmr.msra.gmra.mxu0 %vm387_vm0, %v3737_v3  ;;  %3316 = vmatmul.msk.f32.vlgmr.msra.gmra.mxu1 %vm387_vm0, %v3737_v3 }
  0x36   : > { %3317 = vmatmul.msk.f32.vlgmr.msra.gmra.mxu2 %vm387_vm0, %v3737_v3  ;;  %3318 = vmatmul.msk.f32.vlgmr.msra.gmra.mxu3 %vm387_vm0, %v3737_v3 }
  0x37   : > { %1130 = vperm.xlu0 %3461, %v3330_v25   ;;  %726 = vmatpush.msra.mxu0 %v376_v26  ;;  %v3958_v25 = vperm.slane %v3873_v61, 2 }
  0x39   : > { %6602 = vst [vmem:[#allocation22_spill] sm:$0xff] %v3958_v25 }
  0x3b   : > { %1171 = vperm.xlu2 %3462, %v3331_v29  }
  0x3d   : > { %3319 = vmatmul.msk.f32.vlgmr.msrb.gmra.mxu0 %vm387_vm0, %v3737_v3  ;;  %3320 = vmatmul.msk.f32.vlgmr.msrb.gmra.mxu1 %vm387_vm0, %v3737_v3 }
  0x3e   : > { %3321 = vmatmul.msk.f32.vlgmr.msrb.gmra.mxu2 %vm387_vm0, %v3737_v3  ;;  %3322 = vmatmul.msk.f32.vlgmr.msrb.gmra.mxu3 %vm387_vm0, %v3737_v3 }
  0x45   : > { %3323 = vmatmul.msk.f32.vlgmr.msra.gmra.mxu0 %vm387_vm0, %v3737_v3 }
  0x78   : > { %v3817_v30 = vpop.permute.xlu2 %894 }
  0x85   : > { %v3827_v39 = vpop.permute.xlu2 %1024 }
  0x8f   : > { %v3819_v32 = vpop.permute.xlu0 %384 }
  0x99   : > { %v3868_v59 = vpop.permute.xlu0 %918 }
  0xa2   : > { %v408_v35 = vpop.f32.mrf.mxu0  ;;  %v428_v36 = vpop.f32.mrf.mxu1 }
  0xa3   : > { %v409_v37 = vadd.f32 %v408_v35, %v3819_v32  ;;  %v429_v38 = vadd.f32 %v428_v36, %v3819_v32  ;;  %v3976_v35 = vperm.slane %v3873_v61, 4 }
  0xa5   : > { %v3830_v40 = vmul.f32 %v3821_v33, %v409_v37  ;;  %v3833_v41 = vmul.f32 %v3823_v34, %v429_v38  ;;  %6607 = vst [vmem:[#allocation27_spill] sm:$0xff] %v3976_v35  ;;  %v3351_v34 = vld [vmem:[%s6516_s5 + $0x48] sm:$0xff] }
  0xa7   : > { %787 = vrot.lane.b32.xlu1 %v3833_v41, %s3604_s24  ;;  %785 = vrot.lane.b32.xlu0 %v3830_v40, %s3604_s24  ;;  %v3841_v42 = vmul.f32 %v3827_v39, %v3833_v41  ;;  %v3847_v44 = vmul.f32 %v3827_v39, %v3830_v40 }
  0xa9   : > { %v448_v45 = vpop.f32.mrf.mxu2  ;;  %v468_v49 = vpop.f32.mrf.mxu3 }
  0xaa   : > { %v449_v48 = vadd.f32 %v448_v45, %v3819_v32  ;;  %v488_v50 = vpop.f32.mrf.mxu0  ;;  %v469_v52 = vadd.f32 %v468_v49, %v3819_v32  ;;  %v508_v54 = vpop.f32.mrf.mxu1 }
  0xab   : > { %v489_v53 = vadd.f32 %v488_v50, %v3819_v32  ;;  %v509_v56 = vadd.f32 %v508_v54, %v3819_v32 }
  0xac   : > { %v3859_v55 = vmul.f32 %v3843_v43, %v449_v48  ;;  %v3863_v57 = vmul.f32 %v3849_v46, %v469_v52  ;;  %v3984_v48 = vperm.slane %v3873_v61, 5  ;;  %v3358_v43 = vld [vmem:[%s6516_s5 + $0x80] sm:$0xff]  ;;  %v3356_v46 = vld [vmem:[%s6516_s5 + $0x70] sm:$0xff] }
  0xad   : > { %v3866_v58 = vmul.f32 %v3851_v47, %v489_v53  ;;  %v3871_v60 = vmul.f32 %v3854_v51, %v509_v56 }
  0xae   : > { %v3877_v62 = vmul.f32 %v3827_v39, %v3859_v55  ;;  %v3885_v63 = vmul.f32 %v3868_v59, %v3863_v57  ;;  %v3889_v0 = vmul.f32 %v3827_v39, %v3863_v57  ;;  %6609 = vst [vmem:[#allocation29_spill] sm:$0xff] %v3984_v48 }
  0xaf   : > { %841 = vrot.lane.b32.xlu1 %v3833_v41, %s3605_s25  ;;  %793 = vrot.lane.b32.xlu2 %v3866_v58, %s3604_s24  ;;  %v3897_v2 = vmul.f32 %v3868_v59, %v3866_v58  ;;  %v3901_v3 = vmul.f32 %v3827_v39, %v3866_v58  ;;  %v3905_v4 = vmul.f32 %v3868_v59, %v3871_v60 }
  0xb0   : > { %839 = vrot.lane.b32.xlu0 %v3830_v40, %s3605_s25  ;;  %v3914_v8 = vmul.f32 %v3827_v39, %v3871_v60 }
  0xb1   : > { %v528_v5 = vpop.f32.mrf.mxu2  ;;  %v548_v10 = vpop.f32.mrf.mxu3 }
  0xb2   : > { %v529_v9 = vadd.f32 %v528_v5, %v3819_v32  ;;  %v568_v11 = vpop.f32.mrf.mxu0  ;;  %v549_v13 = vadd.f32 %v548_v10, %v3819_v32  ;;  %v588_v15 = vpop.f32.mrf.mxu1 }
  0xb3   : > { %v569_v14 = vadd.f32 %v568_v11, %v3819_v32  ;;  %v589_v17 = vadd.f32 %v588_v15, %v3819_v32  ;;  %v4024_v15 = vperm.slane %v3873_v61, 6 }
  0xb4   : > { %v3923_v16 = vmul.f32 %v3893_v1, %v529_v9  ;;  %v3927_v18 = vmul.f32 %v3907_v6, %v549_v13  ;;  %v3355_v6 = vld [vmem:[%s6516_s5 + $0x68] sm:$0xff]  ;;  %v3357_v1 = vld [vmem:[%s6516_s5 + $0x78] sm:$0xff] }
  0xb5   : > { %v3930_v19 = vmul.f32 %v3910_v7, %v569_v14  ;;  %v3933_v20 = vmul.f32 %v3918_v12, %v589_v17  ;;  %6614 = vst [vmem:[#allocation34_spill] sm:$0xff] %v4024_v15 }
  0xb6   : > { %v3937_v21 = vmul.f32 %v3868_v59, %v3923_v16  ;;  %v3941_v22 = vmul.f32 %v3827_v39, %v3923_v16  ;;  %v3962_v26 = vmul.f32 %v3868_v59, %v3927_v18  ;;  %v3966_v27 = vmul.f32 %v3827_v39, %v3927_v18 }
  0xb7   : > { %843 = vrot.lane.b32.xlu1 %v3859_v55, %s3605_s25  ;;  %847 = vrot.lane.b32.xlu2 %v3866_v58, %s3605_s25  ;;  %v3949_v23 = vmul.f32 %v3868_v59, %v3930_v19  ;;  %v3953_v24 = vmul.f32 %v3827_v39, %v3930_v19  ;;  %v3970_v28 = vmul.f32 %v3868_v59, %v3933_v20 }
  0xb8   : > { %6601 = vst [vmem:[#allocation21_spill] sm:$0xff] %v3941_v22  ;;  %789 = vrot.lane.b32.xlu0 %v3859_v55, %s3604_s24  ;;  %v3980_v36 = vmul.f32 %v3827_v39, %v3933_v20 }
  0xb9   : > { %6603 = vst [vmem:[#allocation23_spill] sm:$0xff] %v3962_v26  ;;  %v608_v29 = vpop.f32.mrf.mxu2  ;;  %v628_v38 = vpop.f32.mrf.mxu3 }
  0xba   : > { %6604 = vst [vmem:[#allocation24_spill] sm:$0xff] %v3966_v27  ;;  %v609_v37 = vadd.f32 %v608_v29, %v3819_v32  ;;  %v648_v45 = vpop.f32.mrf.mxu0  ;;  %v629_v49 = vadd.f32 %v628_v38, %v3819_v32  ;;  %v668_v52 = vpop.f32.mrf.mxu1 }
  0xbb   : > { %6605 = vst [vmem:[#allocation25_spill] sm:$0xff] %v3970_v28  ;;  %v649_v50 = vadd.f32 %v648_v45, %v3819_v32  ;;  %v669_v54 = vadd.f32 %v668_v52, %v3819_v32  ;;  %v4039_v45 = vperm.slane %v3873_v61, 7 }
  0xbc   : > { %6608 = vst [vmem:[#allocation28_spill] sm:$0xff] %v3980_v36  ;;  %v3989_v53 = vmul.f32 %v3958_v25, %v609_v37  ;;  %v3993_v56 = vmul.f32 %v3973_v31, %v629_v49  ;;  %v3464_v49 = vld [vmem:[#allocation6 + $0x10] ss:$0 sm:$0xff]  ;;  %v4146_v25 = vpop.permute.xlu0 %959  ;;  %v3353_v31 = vld [vmem:[%s6516_s5 + $0x58] sm:$0xff] }
  0xbd   : > { %v3996_v5 = vmul.f32 %v3976_v35, %v649_v50  ;;  %v3999_v9 = vmul.f32 %v3984_v48, %v669_v54  ;;  %6618 = vst [vmem:[#allocation38_spill] sm:$0xff] %v4039_v45 }
  0xbe   : > { %v4003_v10 = vmul.f32 %v3868_v59, %v3989_v53  ;;  %v4007_v11 = vmul.f32 %v3827_v39, %v3989_v53  ;;  %v4015_v13 = vmul.f32 %v3868_v59, %v3993_v56  ;;  %v4019_v14 = vmul.f32 %v3827_v39, %v3993_v56 }
  0xbf   : > { %791 = vrot.lane.b32.xlu1 %v3863_v57, %s3604_s24  ;;  %851 = vrot.lane.b32.xlu2 %v3923_v16, %s3605_s25  ;;  %v4028_v17 = vmul.f32 %v3868_v59, %v3999_v9  ;;  %v4032_v29 = vmul.f32 %v3827_v39, %v3999_v9  ;;  %v4036_v37 = vmul.f32 %v3868_v59, %v3996_v5 }
  0xc0   : > { %6610 = vst [vmem:[#allocation30_spill] sm:$0xff] %v4003_v10  ;;  %795 = vrot.lane.b32.xlu0 %v3871_v60, %s3604_s24  ;;  %v4043_v50 = vmul.f32 %v3827_v39, %v3996_v5 }
  0xc1   : > { %6611 = vst [vmem:[#allocation31_spill] sm:$0xff] %v4007_v11  ;;  %v688_v38 = vpop.f32.mrf.mxu2  ;;  %v708_v54 = vpop.f32.mrf.mxu3 }
  0xc2   : > { %6612 = vst [vmem:[#allocation32_spill] sm:$0xff] %v4015_v13  ;;  %v689_v52 = vadd.f32 %v688_v38, %v3819_v32  ;;  %v728_v35 = vpop.f32.mrf.mxu0  ;;  %v709_v12 = vadd.f32 %v708_v54, %v3819_v32  ;;  %v3333_v54 = vld [vmem:[%s6515_s4 + $0x8] sm:$0xff]  ;;  %v923_v13 = vmul.f32 %v3868_v59, %v3859_v55 }
  0xc3   : > { %6613 = vst [vmem:[#allocation33_spill] sm:$0xff] %v4019_v14  ;;  %v729_v7 = vadd.f32 %v728_v35, %v3819_v32 }
  0xc4   : > { %6615 = vst [vmem:[#allocation35_spill] sm:$0xff] %v4028_v17  ;;  %v4049_v48 = vmul.f32 %v4024_v15, %v689_v52  ;;  %v4052_v51 = vmul.f32 %v4039_v45, %v709_v12  ;;  %v4124_v52 = vpop.permute.xlu1 %1000  ;;  %v3354_v15 = vld [vmem:[%s6516_s5 + $0x60] sm:$0xff]  ;;  %v3352_v45 = vld [vmem:[%s6516_s5 + $0x50] sm:$0xff] }
  0xc5   : > { %6616 = vst [vmem:[#allocation36_spill] sm:$0xff] %v4032_v29  ;;  %v4054_v61 = vmul.f32 %v3464_v49, %v729_v7  ;;  %v922_v29 = vmul.f32 %v3868_v59, %v3833_v41 }
  0xc6   : > { %6617 = vst [vmem:[#allocation37_spill] sm:$0xff] %v4036_v37  ;;  %v4072_v7 = vmul.f32 %v3868_v59, %v4049_v48  ;;  %v4076_v12 = vmul.f32 %v3868_v59, %v4052_v51  ;;  %v4080_v35 = vmul.f32 %v3827_v39, %v4049_v48  ;;  %v4084_v49 = vmul.f32 %v3827_v39, %v4052_v51 }
  0xc7   : > { %6619 = vst [vmem:[#allocation39_spill] sm:$0xff] %v4043_v50  ;;  %845 = vrot.lane.b32.xlu1 %v3863_v57, %s3605_s25  ;;  %801 = vrot.lane.b32.xlu2 %v3930_v19, %s3604_s24  ;;  %v4062_v38 = vmul.f32 %v3868_v59, %v4054_v61  ;;  %v4066_v32 = vmul.f32 %v3827_v39, %v4054_v61  ;;  %v4116_v39 = vpop.permute.xlu2 %1106 }
  0xc8   : > { %849 = vrot.lane.b32.xlu0 %v3871_v60, %s3605_s25  ;;  %6622 = vst [vmem:[#allocation42_spill] sm:$0xff] %v4072_v7 }
  0xc9   : > { %6620 = vst [vmem:[#allocation40_spill] sm:$0xff] %v4062_v38 }
  0xca   : > { %6621 = vst [vmem:[#allocation41_spill] sm:$0xff] %v4066_v32 }
  0xcb   : > { %6623 = vst [vmem:[#allocation43_spill] sm:$0xff] %v4076_v12 }
  0xcc   : > { %6624 = vst [vmem:[#allocation44_spill] sm:$0xff] %v4080_v35  ;;  %v4144_v33 = vpop.permute.xlu1 %1065  ;;  %v819_v35 = vlaneseq }
  0xcd   : > { %6625 = vst [vmem:[#allocation45_spill] sm:$0xff] %v4084_v49  ;;  %v3359_v49 = vld [vmem:[%s6516_s5 + $0x88] sm:$0xff] }
  0xce   : > { %v4174_v12 = vand.u32 127, %v819_v35 }
  0xcf   : > { %799 = vrot.lane.b32.xlu1 %v3927_v18, %s3604_s24  ;;  %855 = vrot.lane.b32.xlu2 %v3930_v19, %s3605_s25  ;;  %v4133_v47 = vpop.permute.xlu2 %1171 }
  0xd0   : > { %797 = vrot.lane.b32.xlu0 %v3923_v16, %s3604_s24  ;;  %vm821_vm1 = vcmp.lt.s32.totalorder %v4174_v12, 1  ;;  %vm873_vm2 = vcmp.lt.s32.totalorder %v4174_v12, 127 }
  0xd7   : > { %853 = vrot.lane.b32.xlu1 %v3927_v18, %s3605_s25  ;;  %817 = vrot.lane.b32.xlu2 %v4054_v61, %s3604_s24 }
  0xd8   : > { %803 = vrot.lane.b32.xlu0 %v3933_v20, %s3604_s24 }
  0xdf   : > { %815 = vrot.lane.b32.xlu1 %v4052_v51, %s3604_s24  ;;  %871 = vrot.lane.b32.xlu2 %v4054_v61, %s3605_s25 }
  0xe0   : > { %857 = vrot.lane.b32.xlu0 %v3933_v20, %s3605_s25 }
  0xe7   : > { %859 = vrot.lane.b32.xlu1 %v3989_v53, %s3605_s25  ;;  %805 = vrot.lane.b32.xlu2 %v3989_v53, %s3604_s24 }
  0xe8   : > { %807 = vrot.lane.b32.xlu0 %v3993_v56, %s3604_s24 }
  0xef   : > { %809 = vrot.lane.b32.xlu1 %v3996_v5, %s3604_s24  ;;  %811 = vrot.lane.b32.xlu2 %v3999_v9, %s3604_s24 }
  0xf0   : > { %861 = vrot.lane.b32.xlu0 %v3993_v56, %s3605_s25 }
  0xf7   : > { %863 = vrot.lane.b32.xlu1 %v3996_v5, %s3605_s25  ;;  %865 = vrot.lane.b32.xlu2 %v3999_v9, %s3605_s25 }
  0xf8   : > { %867 = vrot.lane.b32.xlu0 %v4049_v48, %s3605_s25 }
  0xff   : > { %813 = vrot.lane.b32.xlu1 %v4049_v48, %s3604_s24  ;;  %869 = vrot.lane.b32.xlu2 %v4052_v51, %s3605_s25 }
 0x100   : > { %1324 = vperm.xlu0 %3461, %v3333_v54  }
 0x107   : > { %1899 = vperm.xlu1 %3463, %v3354_v15   ;;  %1793 = vperm.xlu2 %3462, %v3351_v34   ;;  %v4159_v34 = vpop.permute.xlu1 %1245 }
 0x108   : > { %1817 = vperm.xlu0 %3461, %v3352_v45   ;;  %v1131_v45 = vpop.permute.xlu0 %1130 }
 0x109   : > { %v4148_v54 = vpop.permute.xlu2 %793  ;;  %v4191_v35 = vmul.f32 %v1131_v45, %v3830_v40  ;;  %v4203_v32 = vmul.f32 %v1131_v45, %v3863_v57  ;;  %v4206_v38 = vmul.f32 %v1131_v45, %v3866_v58  ;;  %v4210_v11 = vmul.f32 %v1131_v45, %v3871_v60 }
 0x10a   : > { %v4213_v36 = vmul.f32 %v1131_v45, %v3930_v19  ;;  %v4216_v10 = vmul.f32 %v1131_v45, %v3923_v16  ;;  %v4225_v28 = vmul.f32 %v1131_v45, %v3927_v18  ;;  %v4228_v60 = vmul.f32 %v1131_v45, %v3933_v20 }
 0x10b   : > { %v4231_v19 = vmul.f32 %v1131_v45, %v3989_v53  ;;  %v4234_v16 = vmul.f32 %v1131_v45, %v3993_v56  ;;  %v4243_v18 = vmul.f32 %v1131_v45, %v3999_v9  ;;  %v4246_v20 = vmul.f32 %v1131_v45, %v3996_v5 }
 0x10c   : > { %6627 = vst [vmem:[#allocation47_spill] sm:$0xff] %v4216_v10 }
 0x10d   : > { %6628 = vst [vmem:[#allocation48_spill] sm:$0xff] %v4225_v28 }
 0x10e   : > { %6629 = vst [vmem:[#allocation49_spill] sm:$0xff] %v4228_v60  ;;  %v4263_v60 = vstv %s4193_s29  ;;  %s3397_s29 = smul.u32 136, %s3677_s13 }
 0x10f   : > { %1858 = vperm.xlu1 %3463, %v3353_v31   ;;  %1923 = vperm.xlu2 %3462, %v3355_v6   ;;  %6630 = vst [vmem:[#allocation50_spill] sm:$0xff] %v4231_v19  ;;  %v4255_v19 = vmul.f32 %v1131_v45, %v4052_v51 }
 0x110   : > { %2005 = vperm.xlu0 %3461, %v3357_v1   ;;  %6631 = vst [vmem:[#allocation51_spill] sm:$0xff] %v4234_v16  ;;  %v4252_v16 = vmul.f32 %v1131_v45, %v4049_v48 }
 0x111   : > { %v4161_v15 = vpop.permute.xlu2 %847  ;;  %6633 = vst [vmem:[#allocation53_spill] sm:$0xff] %v4243_v18 }
 0x112   : > { %6634 = vst [vmem:[#allocation54_spill] sm:$0xff] %v4246_v20 }
 0x113   : > { %6635 = vst [vmem:[#allocation55_spill] sm:$0xff] %v4252_v16 }
 0x114   : > { %6636 = vst [vmem:[#allocation56_spill] sm:$0xff] %v4255_v19 }
 0x115   : > { %6637 = vst [vmem:[#allocation57_spill] sm:$0xff] %v4263_v60 }
 0x117   : > { %2029 = vperm.xlu1 %3463, %v3358_v43   ;;  %1964 = vperm.xlu2 %3462, %v3356_v46   ;;  %v1134_v43 = vmul.f32 %v1131_v45, %v3833_v41  ;;  %v1135_v41 = vmul.f32 %v1131_v45, %v3859_v55 }
 0x118   : > { %2070 = vperm.xlu0 %3461, %v3359_v49   ;;  %v4188_v49 = vmul.f32 %v3868_v59, %v3830_v40 }
 0x119   : > { %v788_v1 = vpop.permute.xlu1 %787  ;;  %v4172_v6 = vpop.permute.xlu2 %851 }
 0x11a   : > { %v786_v31 = vpop.permute.xlu0 %785 }
 0x11b   : > { %v837_v46 = vsel %vm821_vm1, %v786_v31, %v788_v1 }
 0x11c   : > { %v898_v55 = vmul.f32 %v3817_v30, %v837_v46  ;;  %v1004_v57 = vmul.f32 %v4124_v52, %v837_v46  ;;  %v1110_v59 = vmul.f32 %v4116_v39, %v837_v46 }
 0x121   : > { %v842_v7 = vpop.permute.xlu1 %841  ;;  %v4176_v50 = vpop.permute.xlu2 %801 }
 0x122   : > { %v4178_v37 = vpop.permute.xlu0 %839 }
 0x123   : > { %v889_v46 = vsel %vm873_vm2, %v4178_v37, %v842_v7 }
 0x124   : > { %v962_v5 = vmul.f32 %v4146_v25, %v889_v46  ;;  %v1068_v20 = vmul.f32 %v4144_v33, %v889_v46  ;;  %v1174_v18 = vmul.f32 %v4133_v47, %v889_v46 }
 0x129   : > { %v4195_v17 = vpop.permute.xlu1 %843  ;;  %v4197_v14 = vpop.permute.xlu2 %855 }
 0x12a   : > { %6626 = vst [vmem:[#allocation46_spill] sm:$0xff] %v4197_v14  ;;  %v790_v40 = vpop.permute.xlu0 %789  ;;  %v888_v58 = vsel %vm873_vm2, %v842_v7, %v4195_v17  ;;  %v4240_v14 = vmul.f32 %v1131_v45, %v4054_v61  ;;  %v939_v7 = vadd.f32 %v922_v29, %v898_v55  ;;  %v1045_v61 = vadd.f32 %v3841_v42, %v1004_v57 }
 0x12b   : > { %v963_v53 = vmul.f32 %v4146_v25, %v888_v58  ;;  %v836_v56 = vsel %vm821_vm1, %v788_v1, %v790_v40  ;;  %v1069_v9 = vmul.f32 %v4144_v33, %v888_v58  ;;  %v1175_v48 = vmul.f32 %v4133_v47, %v888_v58 }
 0x12c   : > { %6632 = vst [vmem:[#allocation52_spill] sm:$0xff] %v4240_v14  ;;  %v1151_v14 = vadd.f32 %v1134_v43, %v1110_v59  ;;  %v899_v1 = vmul.f32 %v3817_v30, %v836_v56  ;;  %v1005_v51 = vmul.f32 %v4124_v52, %v836_v56  ;;  %v1111_v29 = vmul.f32 %v4116_v39, %v836_v56 }
 0x12d   : > { %v980_v43 = vadd.f32 %v963_v53, %v939_v7  ;;  %v1086_v46 = vadd.f32 %v1069_v9, %v1045_v61 }
 0x12e   : > { %v1152_v9 = vadd.f32 %v1135_v41, %v1111_v29 }
 0x131   : > { %v792_v42 = vpop.permute.xlu1 %791  ;;  %v4269_v45 = vpop.permute.xlu2 %817 }
 0x132   : > { %6638 = vst [vmem:[#allocation58_spill] sm:$0xff] %v4269_v45  ;;  %v834_v55 = vsel %vm821_vm1, %v792_v42, %v4148_v54  ;;  %v835_v57 = vsel %vm821_vm1, %v790_v40, %v792_v42  ;;  %v838_v59 = vsel %vm821_vm1, %v4269_v45, %v786_v31  ;;  %v4279_v58 = vpop.permute.xlu0 %795  ;;  %v4288_v42 = vadd.f32 %v1175_v48, %v1151_v14 }
 0x133   : > { %v900_v56 = vmul.f32 %v3817_v30, %v835_v57  ;;  %v901_v19 = vmul.f32 %v3817_v30, %v834_v55  ;;  %v1006_v53 = vmul.f32 %v4124_v52, %v835_v57  ;;  %v1007_v7 = vmul.f32 %v4124_v52, %v834_v55 }
 0x134   : > { %v1112_v16 = vmul.f32 %v4116_v39, %v835_v57  ;;  %v897_v28 = vmul.f32 %v3817_v30, %v838_v59  ;;  %v1003_v40 = vmul.f32 %v4124_v52, %v838_v59  ;;  %v940_v31 = vadd.f32 %v923_v13, %v899_v1 }
 0x135   : > { %v1046_v45 = vadd.f32 %v3877_v62, %v1005_v51  ;;  %v1113_v61 = vmul.f32 %v4116_v39, %v834_v55  ;;  %v941_v60 = vadd.f32 %v3885_v63, %v900_v56  ;;  %v942_v57 = vadd.f32 %v3897_v2, %v901_v19 }
 0x136   : > { %v938_v10 = vadd.f32 %v4188_v49, %v897_v28  ;;  %v1044_v27 = vadd.f32 %v3847_v44, %v1003_v40  ;;  %v1047_v22 = vadd.f32 %v3889_v0, %v1006_v53  ;;  %v1109_v26 = vmul.f32 %v4116_v39, %v838_v59 }
 0x137   : > { %v833_v62 = vsel %vm821_vm1, %v4148_v54, %v4279_v58  ;;  %v1048_v13 = vadd.f32 %v3901_v3, %v1007_v7  ;;  %v1153_v14 = vadd.f32 %v4203_v32, %v1112_v16  ;;  %v1154_v44 = vadd.f32 %v4206_v38, %v1113_v61 }
 0x138   : > { %v902_v63 = vmul.f32 %v3817_v30, %v833_v62  ;;  %v1008_v28 = vmul.f32 %v4124_v52, %v833_v62  ;;  %v979_v2 = vadd.f32 %v962_v5, %v938_v10  ;;  %v1150_v0 = vadd.f32 %v4191_v35, %v1109_v26 }
 0x139   : > { %v1114_v49 = vmul.f32 %v4116_v39, %v833_v62  ;;  %v846_v41 = vpop.permute.xlu1 %845  ;;  %v4309_v19 = vpop.permute.xlu2 %871  ;;  %v4311_v48 = vadd.f32 %v1068_v20, %v1044_v27 }
 0x13a   : > { %v943_v3 = vadd.f32 %v3905_v4, %v902_v63  ;;  %v886_v32 = vsel %vm873_vm2, %v846_v41, %v4161_v15  ;;  %v887_v38 = vsel %vm873_vm2, %v4195_v17, %v846_v41  ;;  %v850_v10 = vpop.permute.xlu0 %849  ;;  %v4320_v54 = vadd.f32 %v1174_v18, %v1150_v0 }
 0x13b   : > { %v1049_v26 = vadd.f32 %v3914_v8, %v1008_v28  ;;  %v964_v35 = vmul.f32 %v4146_v25, %v887_v38  ;;  %v965_v27 = vmul.f32 %v4146_v25, %v886_v32  ;;  %v1070_v16 = vmul.f32 %v4144_v33, %v887_v38 }
 0x13c   : > { %v1071_v4 = vmul.f32 %v4144_v33, %v886_v32  ;;  %v1176_v20 = vmul.f32 %v4133_v47, %v887_v38  ;;  %v1177_v5 = vmul.f32 %v4133_v47, %v886_v32  ;;  %v1155_v1 = vadd.f32 %v4210_v11, %v1114_v49 }
 0x13d   : > { %v981_v17 = vadd.f32 %v964_v35, %v940_v31  ;;  %v1209_v51 = vadd.f32 %v1086_v46, %v979_v2  ;;  %v890_v8 = vsel %vm873_vm2, %v4309_v19, %v4178_v37  ;;  %v982_v18 = vadd.f32 %v965_v27, %v941_v60 }
 0x13e   : > { %v1087_v29 = vadd.f32 %v1070_v16, %v1046_v45  ;;  %v1088_v55 = vadd.f32 %v1071_v4, %v1047_v22  ;;  %v1193_v59 = vadd.f32 %v1176_v20, %v1152_v9  ;;  %v1194_v56 = vadd.f32 %v1177_v5, %v1153_v14 }
 0x13f   : > { %v4335_v53 = vmul.f32 %v4146_v25, %v890_v8  ;;  %v4338_v7 = vmul.f32 %v4144_v33, %v890_v8  ;;  %v884_v11 = vsel %vm873_vm2, %v850_v10, %v4172_v6  ;;  %v885_v37 = vsel %vm873_vm2, %v4161_v15, %v850_v10 }
 0x140   : > { %v1210_v46 = vadd.f32 %v1087_v29, %v980_v43  ;;  %v1211_v40 = vadd.f32 %v1088_v55, %v981_v17  ;;  %v1226_v31 = vadd.f32 %v1209_v51, %v1193_v59  ;;  %v966_v22 = vmul.f32 %v4146_v25, %v885_v37 }
 0x141   : > { %v967_v60 = vmul.f32 %v4146_v25, %v884_v11  ;;  %v1072_v45 = vmul.f32 %v4144_v33, %v885_v37  ;;  %v1073_v61 = vmul.f32 %v4144_v33, %v884_v11  ;;  %v800_v9 = vpop.permute.xlu1 %799  ;;  %v4350_v62 = vpop.permute.xlu2 %805  ;;  %v1178_v43 = vmul.f32 %v4133_v47, %v885_v37 }
 0x142   : > { %v1227_v14 = vadd.f32 %v1210_v46, %v1194_v56  ;;  %v1179_v63 = vmul.f32 %v4133_v47, %v884_v11  ;;  %v830_v15 = vsel %vm821_vm1, %v800_v9, %v4176_v50  ;;  %v798_v28 = vpop.permute.xlu0 %797  ;;  %v4358_v2 = vmul.f32 %v4133_v47, %v890_v8  ;;  %v6639_v11 = vld [vmem:[#allocation23_spill] sm:$0xff] }
 0x143   : > { %v983_v0 = vadd.f32 %v966_v22, %v942_v57  ;;  %v1089_v49 = vadd.f32 %v1072_v45, %v1048_v13  ;;  %v1090_v41 = vadd.f32 %v1073_v61, %v1049_v26  ;;  %v1195_v32 = vadd.f32 %v1178_v43, %v1154_v44  ;;  %v6641_v22 = vld [vmem:[#allocation24_spill] sm:$0xff]  ;;  %v6642_v45 = vld [vmem:[#allocation47_spill] sm:$0xff] }
 0x144   : > { %v1196_v38 = vadd.f32 %v1179_v63, %v1155_v1  ;;  %v905_v10 = vmul.f32 %v3817_v30, %v830_v15  ;;  %v1011_v35 = vmul.f32 %v4124_v52, %v830_v15  ;;  %v1117_v4 = vmul.f32 %v4116_v39, %v830_v15  ;;  %v4402_v63 = vld [vmem:[%s6514_s3 + $0x8] sm:$0xff] }
 0x145   : > { %v1212_v27 = vadd.f32 %v1089_v49, %v982_v18  ;;  %v4362_v16 = vadd.f32 %v1090_v41, %v983_v0  ;;  %v831_v20 = vsel %vm821_vm1, %v798_v28, %v800_v9  ;;  %v984_v5 = vadd.f32 %v967_v60, %v943_v3 }
 0x146   : > { %v1228_v17 = vadd.f32 %v1211_v40, %v1195_v32  ;;  %v4368_v57 = vadd.f32 %v3949_v23, %v905_v10  ;;  %v832_v13 = vsel %vm821_vm1, %v4279_v58, %v798_v28  ;;  %v4376_v26 = vadd.f32 %v3953_v24, %v1011_v35  ;;  %v6640_v40 = vld [vmem:[#allocation21_spill] sm:$0xff]  ;;  %v6645_v28 = vld [vmem:[#allocation46_spill] sm:$0xff] }
 0x147   : > { %v4373_v44 = vadd.f32 %v1212_v27, %v1196_v38  ;;  %v903_v1 = vmul.f32 %v3817_v30, %v832_v13  ;;  %v904_v51 = vmul.f32 %v3817_v30, %v831_v20  ;;  %v1009_v8 = vmul.f32 %v4124_v52, %v832_v13 }
 0x148   : > { %v1010_v3 = vmul.f32 %v4124_v52, %v831_v20  ;;  %v1115_v23 = vmul.f32 %v4116_v39, %v832_v13  ;;  %v1116_v18 = vmul.f32 %v4116_v39, %v831_v20  ;;  %v4385_v29 = vadd.f32 %v4213_v36, %v1117_v4  ;;  %v6643_v36 = vld [vmem:[#allocation57_spill] sm:$0xff] }
 0x149   : > { %v944_v58 = vadd.f32 %v3937_v21, %v903_v1  ;;  %v1249_v24 = vadd.f32 %v4159_v34, %v1226_v31  ;;  %v1250_v55 = vadd.f32 %v4159_v34, %v1227_v14  ;;  %v854_v59 = vpop.permute.xlu1 %853  ;;  %v4390_v56 = vpop.permute.xlu2 %811  ;;  %v945_v46 = vadd.f32 %v6639_v11, %v904_v51  ;;  %v6644_v31 = vld [vmem:[#allocation48_spill] sm:$0xff] }
 0x14a   : > { %v1050_v37 = vadd.f32 %v6640_v40, %v1009_v8  ;;  %v1051_v60 = vadd.f32 %v6641_v22, %v1010_v3  ;;  %v1156_v61 = vadd.f32 %v6642_v45, %v1115_v23  ;;  %v804_v9 = vpop.permute.xlu0 %803  ;;  %v1157_v14 = vadd.f32 %v6644_v31, %v1116_v18  ;;  %v6647_v31 = vld [vmem:[#allocation30_spill] sm:$0xff] }
 0x14b   : > { %vm1267_vm3 = vcmp.gt.f32.partialorder %v1249_v24, 0.0  ;;  %v1285_v43 = vmul.f32 %v6643_v36, %v1249_v24  ;;  %vm1268_vm4 = vcmp.gt.f32.partialorder %v1250_v55, 0.0  ;;  %v1286_v21 = vmul.f32 %v6643_v36, %v1250_v55 }
 0x14c   : > { %v1251_v15 = vadd.f32 %v4159_v34, %v1228_v17  ;;  %v882_v0 = vsel %vm873_vm2, %v854_v59, %v6645_v28  ;;  %v883_v49 = vsel %vm873_vm2, %v4172_v6, %v854_v59  ;;  %v828_v10 = vsel %vm821_vm1, %v804_v9, %v4350_v62 }
 0x14d   : > { %v1302_v41 = vsel %vm1267_vm3, %v1249_v24, %v1285_v43  ;;  %v1303_v32 = vsel %vm1268_vm4, %v1250_v55, %v1286_v21  ;;  %v968_v38 = vmul.f32 %v4146_v25, %v883_v49  ;;  %v1074_v27 = vmul.f32 %v4144_v33, %v883_v49 }
 0x14e   : > { %1365 = vmatpush.msra.mxu2 %v1302_v41  ;;  %1385 = vmatpush.msra.mxu3 %v1303_v32  ;;  %vm1269_vm5 = vcmp.gt.f32.partialorder %v1251_v15, 0.0  ;;  %v1287_v35 = vmul.f32 %v6643_v36, %v1251_v15  ;;  %v1075_v4 = vmul.f32 %v4144_v33, %v882_v0  ;;  %v969_v6 = vmul.f32 %v4146_v25, %v882_v0  ;;  %v6650_v32 = vld [vmem:[#allocation58_spill] sm:$0xff] }
 0x14f   : > { %3335 = vmatmul.msk.f32.vlgmr.msra.gmra.mxu2 %vm387_vm0, %v4402_v63  ;;  %v985_v20 = vadd.f32 %v968_v38, %v944_v58  ;;  %v1180_v17 = vmul.f32 %v4133_v47, %v883_v49  ;;  %v1181_v13 = vmul.f32 %v4133_v47, %v882_v0  ;;  %v1091_v51 = vadd.f32 %v1074_v27, %v1050_v37  ;;  %v6649_v49 = vld [vmem:[#allocation31_spill] sm:$0xff] }
 0x150   : > { %v1304_v1 = vsel %vm1269_vm5, %v1251_v15, %v1287_v35  ;;  %v1092_v8 = vadd.f32 %v1075_v4, %v1051_v60  ;;  %3336 = vmatmul.msk.f32.vlgmr.msra.gmra.mxu3 %vm387_vm0, %v4402_v63  ;;  %v829_v3 = vsel %vm821_vm1, %v4176_v50, %v804_v9  ;;  %v907_v58 = vmul.f32 %v3817_v30, %v828_v10  ;;  %v6651_v35 = vld [vmem:[#allocation49_spill] sm:$0xff] }
 0x151   : > { %1405 = vmatpush.msrb.mxu0 %v1304_v1  ;;  %v1197_v23 = vadd.f32 %v1180_v17, %v1156_v61  ;;  %v1198_v18 = vadd.f32 %v1181_v13, %v1157_v14  ;;  %v906_v24 = vmul.f32 %v3817_v30, %v829_v3  ;;  %v4430_v55 = vpop.permute.xlu1 %815  ;;  %v4432_v59 = vpop.permute.xlu2 %865  ;;  %v1214_v11 = vadd.f32 %v1091_v51, %v984_v5  ;;  %v6646_v61 = vld [vmem:[#allocation25_spill] sm:$0xff]  ;;  %v6648_v5 = vld [vmem:[#allocation28_spill] sm:$0xff]  ;;  %v6652_v1 = vld [vmem:[#allocation50_spill] sm:$0xff] }
 0x152   : > { %v1215_v40 = vadd.f32 %v1092_v8, %v985_v20  ;;  %3337 = vmatmul.msk.f32.vlgmr.msrb.gmra.mxu0 %vm387_vm0, %v4402_v63  ;;  %v1012_v37 = vmul.f32 %v4124_v52, %v829_v3  ;;  %v1013_v50 = vmul.f32 %v4124_v52, %v828_v10  ;;  %v858_v22 = vpop.permute.xlu0 %857  ;;  %v986_v60 = vadd.f32 %v969_v6, %v945_v46 }
 0x153   : > { %v1230_v45 = vadd.f32 %v4362_v16, %v1197_v23  ;;  %v947_v9 = vadd.f32 %v6646_v61, %v906_v24  ;;  %v1118_v43 = vmul.f32 %v4116_v39, %v829_v3  ;;  %v1231_v21 = vadd.f32 %v1214_v11, %v1198_v18  ;;  %v6654_v3 = vld [vmem:[#allocation41_spill] sm:$0xff]  ;;  %v6655_v24 = vld [vmem:[#allocation52_spill] sm:$0xff] }
 0x154   : > { %v4442_v14 = vadd.f32 %v6647_v31, %v907_v58  ;;  %v1053_v15 = vadd.f32 %v6648_v5, %v1012_v37  ;;  %v1119_v0 = vmul.f32 %v4116_v39, %v828_v10  ;;  %v4447_v41 = vadd.f32 %v6649_v49, %v1013_v50 }
 0x155   : > { %v822_v16 = vsel %vm821_vm1, %v4430_v55, %v6650_v32  ;;  %v881_v46 = vsel %vm873_vm2, %v6645_v28, %v858_v22  ;;  %v1253_v38 = vadd.f32 %v4159_v34, %v1230_v45  ;;  %v1159_v27 = vadd.f32 %v6651_v35, %v1118_v43  ;;  %v6653_v28 = vld [vmem:[#allocation40_spill] sm:$0xff] }
 0x156   : > { %v913_v4 = vmul.f32 %v3817_v30, %v822_v16  ;;  %v1019_v10 = vmul.f32 %v4124_v52, %v822_v16  ;;  %v1125_v6 = vmul.f32 %v4116_v39, %v822_v16  ;;  %v970_v20 = vmul.f32 %v4146_v25, %v881_v46 }
 0x157   : > { %v1076_v17 = vmul.f32 %v4144_v33, %v881_v46  ;;  %v1182_v13 = vmul.f32 %v4133_v47, %v881_v46  ;;  %vm1271_vm6 = vcmp.gt.f32.partialorder %v1253_v38, 0.0  ;;  %v4465_v51 = vadd.f32 %v6652_v1, %v1119_v0 }
 0x158   : > { %v954_v8 = vadd.f32 %v6653_v28, %v913_v4  ;;  %v1060_v23 = vadd.f32 %v6654_v3, %v1019_v10  ;;  %v1289_v18 = vmul.f32 %v6643_v36, %v1253_v38  ;;  %v1166_v58 = vadd.f32 %v6655_v24, %v1125_v6  ;;  %v6656_v6 = vld [vmem:[#allocation32_spill] sm:$0xff] }
 0x159   : > { %v1093_v11 = vadd.f32 %v1076_v17, %v4376_v26  ;;  %v1199_v37 = vadd.f32 %v1182_v13, %v4385_v29  ;;  %v1254_v50 = vadd.f32 %v4159_v34, %v1231_v21  ;;  %v860_v45 = vpop.permute.xlu1 %859  ;;  %v4474_v61 = vpop.permute.xlu2 %869  ;;  %v987_v5 = vadd.f32 %v970_v20, %v4368_v57 }
 0x15a   : > { %v995_v43 = vadd.f32 %v4335_v53, %v954_v8  ;;  %v4478_v31 = vadd.f32 %v4338_v7, %v1060_v23  ;;  %v1306_v0 = vsel %vm1271_vm6, %v1253_v38, %v1289_v18  ;;  %v808_v49 = vpop.permute.xlu0 %807  ;;  %v880_v53 = vsel %vm873_vm2, %v858_v22, %v860_v45 }
 0x15b   : > { %v1216_v32 = vadd.f32 %v1093_v11, %v986_v60  ;;  %v1232_v16 = vadd.f32 %v1215_v40, %v1199_v37  ;;  %1445 = vmatpush.msrb.mxu2 %v1306_v0  ;;  %vm1272_vm7 = vcmp.gt.f32.partialorder %v1254_v50, 0.0  ;;  %v1290_v26 = vmul.f32 %v6643_v36, %v1254_v50 }
 0x15c   : > { %v1208_v29 = vadd.f32 %v4311_v48, %v995_v43  ;;  %3339 = vmatmul.msk.f32.vlgmr.msrb.gmra.mxu2 %vm387_vm0, %v4402_v63  ;;  %v874_v7 = vsel %vm873_vm2, %v4474_v61, %v4309_v19  ;;  %v827_v57 = vsel %vm821_vm1, %v4350_v62, %v808_v49  ;;  %v971_v60 = vmul.f32 %v4146_v25, %v880_v53 }
 0x15d   : > { %v1307_v40 = vsel %vm1272_vm7, %v1254_v50, %v1290_v26  ;;  %v1077_v48 = vmul.f32 %v4144_v33, %v880_v53  ;;  %v1183_v21 = vmul.f32 %v4133_v47, %v880_v53  ;;  %v4498_v46 = vadd.f32 %v4358_v2, %v1166_v58 }
 0x15e   : > { %1465 = vmatpush.msrb.mxu3 %v1307_v40  ;;  %v4501_v22 = vmul.f32 %v4146_v25, %v874_v7  ;;  %v4504_v19 = vmul.f32 %v4144_v33, %v874_v7  ;;  %v908_v38 = vmul.f32 %v3817_v30, %v827_v57  ;;  %v4508_v4 = vmul.f32 %v4133_v47, %v874_v7  ;;  %v6661_v7 = vld [vmem:[#allocation37_spill] sm:$0xff]  ;;  %v6662_v40 = vld [vmem:[#allocation39_spill] sm:$0xff] }
 0x15f   : > { %v1094_v62 = vadd.f32 %v1077_v48, %v1053_v15  ;;  %v1200_v35 = vadd.f32 %v1183_v21, %v1159_v27  ;;  %3340 = vmatmul.msk.f32.vlgmr.msrb.gmra.mxu3 %vm387_vm0, %v4402_v63  ;;  %v1014_v2 = vmul.f32 %v4124_v52, %v827_v57  ;;  %v988_v10 = vadd.f32 %v971_v60, %v947_v9  ;;  %v6657_v15 = vld [vmem:[#allocation33_spill] sm:$0xff] }
 0x160   : > { %v4514_v20 = vadd.f32 %v6656_v6, %v908_v38  ;;  %v1255_v17 = vadd.f32 %v4159_v34, %v1232_v16  ;;  %v1225_v13 = vadd.f32 %v1208_v29, %v4288_v42  ;;  %v1120_v8 = vmul.f32 %v4116_v39, %v827_v57  ;;  %v6660_v29 = vld [vmem:[#allocation36_spill] sm:$0xff]  ;;  %v6663_v48 = vld [vmem:[#allocation53_spill] sm:$0xff]  ;;  %v6664_v6 = vld [vmem:[#allocation54_spill] sm:$0xff] }
 0x161   : > { %v1217_v1 = vadd.f32 %v1094_v62, %v987_v5  ;;  %v1233_v28 = vadd.f32 %v1216_v32, %v1200_v35  ;;  %v1055_v27 = vadd.f32 %v6657_v15, %v1014_v2  ;;  %v810_v3 = vpop.permute.xlu1 %809  ;;  %v1252_v24 = vadd.f32 %v4159_v34, %v4373_v44  ;;  %v6658_v32 = vld [vmem:[#allocation51_spill] sm:$0xff] }
 0x162   : > { %vm1273_vm8 = vcmp.gt.f32.partialorder %v1255_v17, 0.0  ;;  %v1291_v23 = vmul.f32 %v6643_v36, %v1255_v17  ;;  %v825_v9 = vsel %vm821_vm1, %v810_v3, %v4390_v56  ;;  %v862_v18 = vpop.permute.xlu0 %861  ;;  %v826_v42 = vsel %vm821_vm1, %v808_v49, %v810_v3  ;;  %v6659_v44 = vld [vmem:[#allocation35_spill] sm:$0xff] }
 0x163   : > { %v910_v58 = vmul.f32 %v3817_v30, %v825_v9  ;;  %v1016_v11 = vmul.f32 %v4124_v52, %v825_v9  ;;  %v1122_v37 = vmul.f32 %v4116_v39, %v825_v9  ;;  %v909_v43 = vmul.f32 %v3817_v30, %v826_v42 }
 0x164   : > { %v1308_v50 = vsel %vm1273_vm8, %v1255_v17, %v1291_v23  ;;  %v1015_v5 = vmul.f32 %v4124_v52, %v826_v42  ;;  %v1121_v0 = vmul.f32 %v4116_v39, %v826_v42  ;;  %v1161_v16 = vadd.f32 %v6658_v32, %v1120_v8 }
 0x165   : > { %1485 = vmatpush.msra.mxu0 %v1308_v50  ;;  %v951_v26 = vadd.f32 %v6659_v44, %v910_v58  ;;  %v1057_v49 = vadd.f32 %v6660_v29, %v1016_v11  ;;  %v879_v53 = vsel %vm873_vm2, %v860_v45, %v862_v18  ;;  %v950_v57 = vadd.f32 %v6661_v7, %v909_v43 }
 0x166   : > { %3341 = vmatmul.msk.f32.vlgmr.msra.gmra.mxu0 %vm387_vm0, %v4402_v63  ;;  %v1056_v60 = vadd.f32 %v6662_v40, %v1015_v5  ;;  %v1163_v21 = vadd.f32 %v6663_v48, %v1122_v37  ;;  %v972_v38 = vmul.f32 %v4146_v25, %v879_v53  ;;  %v1078_v62 = vmul.f32 %v4144_v33, %v879_v53 }
 0x167   : > { %v1184_v35 = vmul.f32 %v4133_v47, %v879_v53  ;;  %v1248_v2 = vadd.f32 %v4159_v34, %v1225_v13  ;;  %vm1270_vm9 = vcmp.gt.f32.partialorder %v1252_v24, 0.0  ;;  %v1162_v45 = vadd.f32 %v6664_v6, %v1121_v0 }
 0x168   : > { %v989_v17 = vadd.f32 %v972_v38, %v4442_v14  ;;  %v1288_v15 = vmul.f32 %v6643_v36, %v1252_v24  ;;  %v1256_v8 = vadd.f32 %v4159_v34, %v1233_v28  ;;  %v1095_v3 = vadd.f32 %v1078_v62, %v4447_v41 }
 0x169   : > { %v1201_v23 = vadd.f32 %v1184_v35, %v4465_v51  ;;  %vm1266_vm10 = vcmp.gt.f32.partialorder %v1248_v2, 0.0  ;;  %v1284_v9 = vmul.f32 %v6643_v36, %v1248_v2  ;;  %v864_v42 = vpop.permute.xlu1 %863 }
 0x16a   : > { %v1305_v58 = vsel %vm1270_vm9, %v1252_v24, %v1288_v15  ;;  %vm1274_vm11 = vcmp.gt.f32.partialorder %v1256_v8, 0.0  ;;  %v1292_v13 = vmul.f32 %v6643_v36, %v1256_v8  ;;  %v877_v14 = vsel %vm873_vm2, %v864_v42, %v4432_v59  ;;  %v868_v11 = vpop.permute.xlu0 %867 }
 0x16b   : > { %v1218_v37 = vadd.f32 %v1095_v3, %v988_v10  ;;  %v1234_v50 = vadd.f32 %v1217_v1, %v1201_v23  ;;  %v1301_v28 = vsel %vm1266_vm10, %v1248_v2, %v1284_v9  ;;  %v878_v41 = vsel %vm873_vm2, %v862_v18, %v864_v42 }
 0x16c   : > { %1345 = vmatpush.msra.mxu1 %v1301_v28  ;;  %v1309_v51 = vsel %vm1274_vm11, %v1256_v8, %v1292_v13  ;;  %v973_v43 = vmul.f32 %v4146_v25, %v878_v41  ;;  %v974_v24 = vmul.f32 %v4146_v25, %v877_v14  ;;  %v1079_v5 = vmul.f32 %v4144_v33, %v878_v41  ;;  %v6668_v28 = vld [vmem:[#allocation45_spill] sm:$0xff] }
 0x16d   : > { %3334 = vmatmul.msk.f32.vlgmr.msra.gmra.mxu1 %vm387_vm0, %v4402_v63  ;;  %v1080_v0 = vmul.f32 %v4144_v33, %v877_v14  ;;  %v1185_v10 = vmul.f32 %v4133_v47, %v878_v41  ;;  %v1186_v1 = vmul.f32 %v4133_v47, %v877_v14  ;;  %v875_v18 = vsel %vm873_vm2, %v868_v11, %v4474_v61  ;;  %v6666_v14 = vld [vmem:[#allocation43_spill] sm:$0xff] }
 0x16e   : > { %1425 = vmatpush.msrb.mxu1 %v1305_v58  ;;  %v990_v32 = vadd.f32 %v973_v43, %v4514_v20  ;;  %v991_v44 = vadd.f32 %v974_v24, %v950_v57  ;;  %v1096_v29 = vadd.f32 %v1079_v5, %v1055_v27  ;;  %v876_v53 = vsel %vm873_vm2, %v4432_v59, %v868_v11  ;;  %v6670_v43 = vld [vmem:[#allocation56_spill] sm:$0xff] }
 0x16f   : > { %v1097_v7 = vadd.f32 %v1080_v0, %v1056_v60  ;;  %v1202_v40 = vadd.f32 %v1185_v10, %v1161_v16  ;;  %v1203_v48 = vadd.f32 %v1186_v1, %v1162_v45  ;;  %v975_v38 = vmul.f32 %v4146_v25, %v876_v53 }
 0x170   : > { %1505 = vmatpush.msra.mxu1 %v1309_v51  ;;  %v1219_v62 = vadd.f32 %v1096_v29, %v989_v17  ;;  %v976_v35 = vmul.f32 %v4146_v25, %v875_v18  ;;  %v1081_v61 = vmul.f32 %v4144_v33, %v876_v53  ;;  %v1082_v2 = vmul.f32 %v4144_v33, %v875_v18 }
 0x171   : > { %v1220_v20 = vadd.f32 %v1097_v7, %v990_v32  ;;  %v1235_v57 = vadd.f32 %v1218_v37, %v1202_v40  ;;  %v992_v27 = vadd.f32 %v975_v38, %v951_v26  ;;  %v1187_v6 = vmul.f32 %v4133_v47, %v876_v53  ;;  %v814_v15 = vpop.permute.xlu1 %813  ;;  %v6667_v37 = vld [vmem:[#allocation44_spill] sm:$0xff] }
 0x172   : > { %v1236_v59 = vadd.f32 %v1219_v62, %v1203_v48  ;;  %v1098_v8 = vadd.f32 %v1081_v61, %v1057_v49  ;;  %v1188_v16 = vmul.f32 %v4133_v47, %v875_v18  ;;  %v1257_v60 = vadd.f32 %v4159_v34, %v1234_v50 }
 0x173   : > { %v1204_v45 = vadd.f32 %v1187_v6, %v1163_v21  ;;  %v823_v25 = vsel %vm821_vm1, %v814_v15, %v4430_v55  ;;  %v824_v33 = vsel %vm821_vm1, %v4390_v56, %v814_v15  ;;  %v1258_v26 = vadd.f32 %v4159_v34, %v1235_v57  ;;  %v6665_v56 = vld [vmem:[#allocation42_spill] sm:$0xff] }
 0x174   : > { %v1221_v17 = vadd.f32 %v1098_v8, %v991_v44  ;;  %vm1275_vm12 = vcmp.gt.f32.partialorder %v1257_v60, 0.0  ;;  %v1293_v3 = vmul.f32 %v6643_v36, %v1257_v60  ;;  %v911_v49 = vmul.f32 %v3817_v30, %v824_v33 }
 0x175   : > { %v1237_v47 = vadd.f32 %v1220_v20, %v1204_v45  ;;  %3338 = vmatmul.msk.f32.vlgmr.msrb.gmra.mxu1 %vm387_vm0, %v4402_v63  ;;  %v912_v21 = vmul.f32 %v3817_v30, %v823_v25  ;;  %v1017_v55 = vmul.f32 %v4124_v52, %v824_v33  ;;  %v1018_v23 = vmul.f32 %v4124_v52, %v823_v25  ;;  %v6669_v52 = vld [vmem:[#allocation55_spill] sm:$0xff]  ;;  %v6671_v45 = vld [vmem:[#allocation14_spill] sm:$0xff] }
 0x176   : > { %v1310_v9 = vsel %vm1275_vm12, %v1257_v60, %v1293_v3  ;;  %v952_v42 = vadd.f32 %v6665_v56, %v911_v49  ;;  %v1123_v58 = vmul.f32 %v4116_v39, %v824_v33  ;;  %v1124_v13 = vmul.f32 %v4116_v39, %v823_v25 }
 0x177   : > { %1525 = vmatpush.msra.mxu2 %v1310_v9  ;;  %v953_v11 = vadd.f32 %v6666_v14, %v912_v21  ;;  %v1058_v50 = vadd.f32 %v6667_v37, %v1017_v55  ;;  %v1059_v41 = vadd.f32 %v6668_v28, %v1018_v23  ;;  %vm1276_vm13 = vcmp.gt.f32.partialorder %v1258_v26, 0.0  ;;  %v6673_v55 = vld [vmem:[#allocation17_spill] sm:$0xff]  ;;  %v6674_v9 = vld [vmem:[#allocation18_spill] sm:$0xff] }
 0x178   : > { %3343 = vmatmul.msk.f32.vlgmr.msra.gmra.mxu2 %vm387_vm0, %v4402_v63  ;;  %v993_v30 = vadd.f32 %v976_v35, %v952_v42  ;;  %v1164_v51 = vadd.f32 %v6669_v52, %v1123_v58  ;;  %v1165_v24 = vadd.f32 %v6670_v43, %v1124_v13  ;;  %v1294_v5 = vmul.f32 %v6643_v36, %v1258_v26 }
 0x179   : > { %v994_v39 = vadd.f32 %v4501_v22, %v953_v11  ;;  %v1099_v0 = vadd.f32 %v1082_v2, %v1058_v50  ;;  %v1100_v10 = vadd.f32 %v4504_v19, %v1059_v41  ;;  %v1259_v1 = vadd.f32 %v4159_v34, %v1236_v59  ;;  %v6675_v50 = vld [vmem:[#allocation26_spill] sm:$0xff] }
 0x17a   : > { %v1205_v18 = vadd.f32 %v1188_v16, %v1164_v51  ;;  %v1206_v32 = vadd.f32 %v4508_v4, %v1165_v24  ;;  %v1311_v44 = vsel %vm1276_vm13, %v1258_v26, %v1294_v5  ;;  %v1260_v29 = vadd.f32 %v4159_v34, %v1237_v47 }
 0x17b   : > { %v1222_v53 = vadd.f32 %v1099_v0, %v992_v27  ;;  %v1223_v7 = vadd.f32 %v1100_v10, %v993_v30  ;;  %v1224_v40 = vadd.f32 %v4478_v31, %v994_v39  ;;  %1545 = vmatpush.msra.mxu3 %v1311_v44  ;;  %vm1277_vm14 = vcmp.gt.f32.partialorder %v1259_v1, 0.0  ;;  %v6676_v30 = vld [vmem:[#allocation22_spill] sm:$0xff]  ;;  %v6677_v10 = vld [vmem:[#allocation11_spill] sm:$0xff] }
 0x17c   : > { %3344 = vmatmul.msk.f32.vlgmr.msra.gmra.mxu3 %vm387_vm0, %v4402_v63  ;;  %v1295_v22 = vmul.f32 %v6643_v36, %v1259_v1  ;;  %vm1278_vm15 = vcmp.gt.f32.partialorder %v1260_v29, 0.0  ;;  %v1296_v19 = vmul.f32 %v6643_v36, %v1260_v29  ;;  %v1238_v48 = vadd.f32 %v1221_v17, %v1205_v18  ;;  %v6672_v17 = vld [vmem:[#allocation13_spill] sm:$0xff]  ;;  %v6678_v18 = vld [vmem:[#allocation38_spill] sm:$0xff] }
 0x17d   : > { %3342 = vmatmul.msk.f32.vlgmr.msra.gmra.mxu1 %vm387_vm0, %v4402_v63  ;;  %v1239_v4 = vadd.f32 %v1222_v53, %v1206_v32  ;;  %v1240_v38 = vadd.f32 %v1223_v7, %v4498_v46  ;;  %v1241_v62 = vadd.f32 %v1224_v40, %v4320_v54 }
 0x17e   : > { %v1312_v31 = vsel %vm1277_vm14, %v1259_v1, %v1295_v22  ;;  %v1313_v35 = vsel %vm1278_vm15, %v1260_v29, %v1296_v19  ;;  %v1261_v61 = vadd.f32 %v4159_v34, %v1238_v48  ;;  %v6679_v29 = vld [vmem:[#allocation12_spill] sm:$0xff]  ;;  %v6680_v19 = vld [vmem:[#allocation34_spill] sm:$0xff] }
 0x17f   : > { %1565 = vmatpush.msrb.mxu0 %v1312_v31  ;;  %1585 = vmatpush.msrb.mxu1 %v1313_v35  ;;  %v1262_v2 = vadd.f32 %v4159_v34, %v1239_v4  ;;  %v1263_v20 = vadd.f32 %v4159_v34, %v1240_v38  ;;  %v1264_v57 = vadd.f32 %v4159_v34, %v1241_v62  ;;  %v6681_v38 = vld [vmem:[#allocation15_spill] sm:$0xff] }
 0x180   : > { %3345 = vmatmul.msk.f32.vlgmr.msrb.gmra.mxu0 %vm387_vm0, %v4402_v63  ;;  %vm1279_vm3 = vcmp.gt.f32.partialorder %v1261_v61, 0.0  ;;  %v1297_v46 = vmul.f32 %v6643_v36, %v1261_v61 }
 0x181   : > { %vm1280_vm4 = vcmp.gt.f32.partialorder %v1262_v2, 0.0  ;;  %v1298_v54 = vmul.f32 %v6643_v36, %v1262_v2  ;;  %vm1281_vm5 = vcmp.gt.f32.partialorder %v1263_v20, 0.0  ;;  %v1299_v27 = vmul.f32 %v6643_v36, %v1263_v20 }
 0x182   : > { %v1314_v6 = vsel %vm1279_vm3, %v1261_v61, %v1297_v46  ;;  %vm1282_vm6 = vcmp.gt.f32.partialorder %v1264_v57, 0.0  ;;  %v1300_v15 = vmul.f32 %v6643_v36, %v1264_v57  ;;  %v4642_v36 = vpop.permute.xlu0 %1324 }
 0x183   : > { %1605 = vmatpush.msrb.mxu2 %v1314_v6  ;;  %v1315_v59 = vsel %vm1280_vm4, %v1262_v2, %v1298_v54  ;;  %v1316_v8 = vsel %vm1281_vm5, %v1263_v20, %v1299_v27  ;;  %v6682_v2 = vld [vmem:[#allocation16_spill] sm:$0xff] }
 0x184   : > { %3347 = vmatmul.msk.f32.vlgmr.msrb.gmra.mxu2 %vm387_vm0, %v4402_v63  ;;  %1625 = vmatpush.msrb.mxu3 %v1315_v59  ;;  %v1317_v34 = vsel %vm1282_vm6, %v1264_v57, %v1300_v15  ;;  %v6683_v57 = vld [vmem:[#allocation29_spill] sm:$0xff]  ;;  %v6684_v59 = vld [vmem:[#allocation19_spill] sm:$0xff] }
 0x185   : > { %3346 = vmatmul.msk.f32.vlgmr.msrb.gmra.mxu1 %vm387_vm0, %v4402_v63  ;;  %1645 = vmatpush.msra.mxu0 %v1316_v8 }
 0x186   : > { %1665 = vmatpush.msra.mxu1 %v1317_v34  ;;  %3348 = vmatmul.msk.f32.vlgmr.msrb.gmra.mxu3 %vm387_vm0, %v4402_v63  ;;  %v6685_v34 = vld [vmem:[#allocation20_spill] sm:$0xff] }
 0x188   : > { %3349 = vmatmul.msk.f32.vlgmr.msra.gmra.mxu0 %vm387_vm0, %v4402_v63 }
 0x18d   : > { %3350 = vmatmul.msk.f32.vlgmr.msra.gmra.mxu1 %vm387_vm0, %v4402_v63 }
 0x1cf   : > { %v1407_v16 = vpop.f32.mrf.mxu0 }
 0x1d0   : > { %v1408_v60 = vadd.f32 %v1407_v16, %v4642_v36 }
 0x1d2   : > { %v4646_v25 = vmul.f32 %v1408_v60, %v6671_v45  ;;  %v1367_v58 = vpop.f32.mrf.mxu2  ;;  %v3465_v60 = vld [vmem:[#allocation6 + $0x10] ss:$0 sm:$0xff] }
 0x1d3   : > { %v1387_v33 = vpop.f32.mrf.mxu3  ;;  %v1368_v5 = vadd.f32 %v1367_v58, %v4642_v36  ;;  %v4782_v58 = vpop.permute.xlu1 %1899 }
 0x1d4   : > { %1693 = vrot.lane.b32.xlu1 %v4646_v25, %s3604_s24  ;;  %v1388_v26 = vadd.f32 %v1387_v33, %v4642_v36 }
 0x1d5   : > { %v4694_v53 = vmul.f32 %v1368_v5, %v6679_v29  ;;  %v3386_v5 = vld [vmem:[%s6516_s5 + $0xb8] sm:$0xff] }
 0x1d6   : > { %v4652_v3 = vmul.f32 %v1388_v26, %v6672_v17 }
 0x1d8   : > { %1742 = vrot.lane.b32.xlu2 %v4652_v3, %s3605_s25  ;;  %1691 = vrot.lane.b32.xlu0 %v4652_v3, %s3604_s24 }
 0x1dc   : > { %1744 = vrot.lane.b32.xlu1 %v4646_v25, %s3605_s25 }
 0x1df   : > { %v1447_v51 = vpop.f32.mrf.mxu2 }
 0x1e0   : > { %v1448_v35 = vadd.f32 %v1447_v51, %v4642_v36  ;;  %v3381_v51 = vld [vmem:[%s6516_s5 + $0x90] sm:$0xff] }
 0x1e2   : > { %v1467_v63 = vpop.f32.mrf.mxu3  ;;  %v4719_v20 = vmul.f32 %v1448_v35, %v6682_v2 }
 0x1e3   : > { %v1468_v49 = vadd.f32 %v1467_v63, %v4642_v36  ;;  %v1487_v47 = vpop.f32.mrf.mxu0  ;;  %v6686_v63 = vld [vmem:[#allocation27_spill] sm:$0xff] }
 0x1e4   : > { %v1488_v21 = vadd.f32 %v1487_v47, %v4642_v36  ;;  %v3360_v47 = vld [vmem:[%s6517_s6 + $0x8] sm:$0xff] }
 0x1e5   : > { %v4663_v23 = vmul.f32 %v1468_v49, %v6673_v55 }
 0x1e6   : > { %v4666_v56 = vmul.f32 %v1488_v21, %v6674_v9 }
 0x1e7   : > { %1699 = vrot.lane.b32.xlu1 %v4663_v23, %s3604_s24 }
 0x1e8   : > { %1701 = vrot.lane.b32.xlu2 %v4666_v56, %s3604_s24 }
 0x1ea   : > { %v1347_v42 = vpop.f32.mrf.mxu1 }
 0x1eb   : > { %v1348_v43 = vadd.f32 %v1347_v42, %v4642_v36 }
 0x1ed   : > { %v4688_v1 = vmul.f32 %v1348_v43, %v6677_v10 }
 0x1f2   : > { %v1427_v13 = vpop.f32.mrf.mxu1 }
 0x1f3   : > { %v1428_v22 = vadd.f32 %v1427_v13, %v4642_v36 }
 0x1f5   : > { %v4708_v62 = vmul.f32 %v1428_v22, %v6681_v38 }
 0x1fa   : > { %v1507_v0 = vpop.f32.mrf.mxu1 }
 0x1fb   : > { %v1527_v40 = vpop.f32.mrf.mxu2  ;;  %v1508_v27 = vadd.f32 %v1507_v0, %v4642_v36 }
 0x1fc   : > { %v1528_v6 = vadd.f32 %v1527_v40, %v4642_v36  ;;  %v3383_v40 = vld [vmem:[%s6516_s5 + $0xa0] sm:$0xff] }
 0x1fd   : > { %v1567_v14 = vpop.f32.mrf.mxu0  ;;  %v4734_v8 = vmul.f32 %v1508_v27, %v6684_v59 }
 0x1fe   : > { %v1568_v11 = vadd.f32 %v1567_v14, %v4642_v36  ;;  %v4737_v16 = vmul.f32 %v1528_v6, %v6685_v34  ;;  %v3363_v14 = vld [vmem:[%s6515_s4 + $0x10] sm:$0xff] }
 0x1ff   : > { %v1547_v37 = vpop.f32.mrf.mxu3 }
 0x200   : > { %v4674_v28 = vmul.f32 %v1568_v11, %v6675_v50  ;;  %v1548_v41 = vadd.f32 %v1547_v37, %v4642_v36  ;;  %v3384_v11 = vld [vmem:[%s6516_s5 + $0xa8] sm:$0xff]  ;;  %v4798_v37 = vpop.permute.xlu0 %1817 }
 0x201   : > { %v4937_v10 = vmul.f32 %v4798_v37, %v4734_v8 }
 0x202   : > { %v4678_v52 = vmul.f32 %v1548_v41, %v6676_v30  ;;  %1709 = vrot.lane.b32.xlu0 %v4674_v28, %s3604_s24  ;;  %v1587_v4 = vpop.f32.mrf.mxu1  ;;  %v4800_v41 = vpop.permute.xlu1 %1858  ;;  %v4957_v30 = vmul.f32 %v4798_v37, %v4737_v16 }
 0x203   : > { %v1588_v26 = vadd.f32 %v1587_v4, %v4642_v36  ;;  %6694 = vst [vmem:[#allocation25_spill] sm:$0xff] %v4937_v10 }
 0x204   : > { %1707 = vrot.lane.b32.xlu2 %v4678_v52, %s3604_s24  ;;  %6697 = vst [vmem:[#allocation31_spill] sm:$0xff] %v4957_v30 }
 0x205   : > { %v1647_v24 = vpop.f32.mrf.mxu0  ;;  %v4749_v49 = vmul.f32 %v1588_v26, %v6686_v63  ;;  %v4853_v26 = vmul.f32 %v4798_v37, %v4694_v53  ;;  %v4905_v63 = vmul.f32 %v4798_v37, %v4666_v56 }
 0x206   : > { %v1648_v39 = vadd.f32 %v1647_v24, %v4642_v36  ;;  %v3382_v24 = vld [vmem:[%s6516_s5 + $0x98] sm:$0xff] }
 0x207   : > { %v1607_v31 = vpop.f32.mrf.mxu2 }
 0x208   : > { %v4691_v32 = vmul.f32 %v1648_v39, %v6678_v18  ;;  %v1608_v61 = vadd.f32 %v1607_v31, %v4642_v36  ;;  %v3385_v39 = vld [vmem:[%s6516_s5 + $0xb0] sm:$0xff]  ;;  %v4816_v0 = vpop.permute.xlu0 %2005 }
 0x209   : > { %v1627_v44 = vpop.f32.mrf.mxu3 }
 0x20a   : > { %1738 = vrot.lane.b32.xlu0 %v4688_v1, %s3605_s25  ;;  %1717 = vrot.lane.b32.xlu1 %v4691_v32, %s3604_s24  ;;  %v1628_v7 = vadd.f32 %v1627_v44, %v4642_v36  ;;  %v4722_v46 = vmul.f32 %v1608_v61, %v6683_v57  ;;  %v1667_v54 = vpop.f32.mrf.mxu1  ;;  %v4818_v44 = vpop.permute.xlu1 %2029 }
 0x20b   : > { %v1668_v15 = vadd.f32 %v1667_v54, %v4642_v36  ;;  %v4760_v36 = vpop.permute.xlu2 %1793  ;;  %v4835_v54 = vmul.f32 %v4798_v37, %v4646_v25  ;;  %v4843_v6 = vmul.f32 %v4818_v44, %v4646_v25  ;;  %v4901_v57 = vmul.f32 %v4818_v44, %v4666_v56 }
 0x20c   : > { %1689 = vrot.lane.b32.xlu2 %v4694_v53, %s3604_s24  ;;  %v4705_v48 = vmul.f32 %v1628_v7, %v6680_v19  ;;  %v4931_v38 = vmul.f32 %v4818_v44, %v4708_v62  ;;  %v1831_v19 = vmul.f32 %v4798_v37, %v4674_v28  ;;  %v2043_v9 = vmul.f32 %v4818_v44, %v4674_v28 }
 0x20d   : > { %v4739_v33 = vmul.f32 %v3465_v60, %v1668_v15  ;;  %v4849_v60 = vmul.f32 %v4798_v37, %v4652_v3 }
 0x210   : > { %v4827_v4 = vpop.permute.xlu0 %2070 }
 0x212   : > { %1715 = vrot.lane.b32.xlu0 %v4705_v48, %s3604_s24  ;;  %1687 = vrot.lane.b32.xlu1 %v4688_v1, %s3604_s24 }
 0x213   : > { %v4770_v21 = vpop.permute.xlu2 %1923 }
 0x214   : > { %1695 = vrot.lane.b32.xlu2 %v4708_v62, %s3604_s24  ;;  %v4839_v27 = vmul.f32 %v4770_v21, %v4646_v25  ;;  %v4865_v25 = vmul.f32 %v4770_v21, %v4652_v3  ;;  %v4917_v34 = vmul.f32 %v4770_v21, %v4708_v62  ;;  %v4921_v59 = vmul.f32 %v4770_v21, %v4688_v1 }
 0x215   : > { %v4941_v18 = vmul.f32 %v4770_v21, %v4734_v8  ;;  %v4976_v30 = vmul.f32 %v4770_v21, %v4678_v52 }
 0x217   : > { %6695 = vst [vmem:[#allocation30_spill] sm:$0xff] %v4941_v18 }
 0x218   : > { %6700 = vst [vmem:[#allocation50_spill] sm:$0xff] %v4976_v30  ;;  %v4996_v30 = vmul.f32 %v4818_v44, %v4678_v52 }
 0x21a   : > { %1697 = vrot.lane.b32.xlu0 %v4719_v20, %s3604_s24  ;;  %1740 = vrot.lane.b32.xlu1 %v4694_v53, %s3605_s25  ;;  %6705 = vst [vmem:[#allocation33_spill] sm:$0xff] %v4996_v30 }
 0x21b   : > { %v4780_v42 = vpop.permute.xlu2 %1964 }
 0x21c   : > { %1713 = vrot.lane.b32.xlu2 %v4722_v46, %s3604_s24 }
 0x222   : > { %1703 = vrot.lane.b32.xlu0 %v4734_v8, %s3604_s24  ;;  %1705 = vrot.lane.b32.xlu1 %v4737_v16, %s3604_s24 }
 0x224   : > { %1719 = vrot.lane.b32.xlu2 %v4739_v33, %s3604_s24 }
 0x22a   : > { %1748 = vrot.lane.b32.xlu0 %v4719_v20, %s3605_s25  ;;  %1711 = vrot.lane.b32.xlu1 %v4749_v49, %s3604_s24 }
 0x22c   : > { %1746 = vrot.lane.b32.xlu2 %v4708_v62, %s3605_s25 }
 0x232   : > { %1770 = vrot.lane.b32.xlu0 %v4739_v33, %s3605_s25  ;;  %2145 = vperm.xlu1 %3463, %v3360_v47   ;;  %v4790_v13 = vpop.permute.xlu2 %1742  ;;  %v4857_v47 = vmul.f32 %v4770_v21, %v4694_v53 }
 0x234   : > { %1750 = vrot.lane.b32.xlu2 %v4663_v23, %s3605_s25 }
 0x23a   : > { %1752 = vrot.lane.b32.xlu0 %v4666_v56, %s3605_s25  ;;  %1754 = vrot.lane.b32.xlu1 %v4734_v8, %s3605_s25 }
 0x23c   : > { %1756 = vrot.lane.b32.xlu2 %v4737_v16, %s3605_s25 }
 0x242   : > { %1758 = vrot.lane.b32.xlu0 %v4678_v52, %s3605_s25  ;;  %1760 = vrot.lane.b32.xlu1 %v4674_v28, %s3605_s25  ;;  %v4805_v43 = vpop.permute.xlu2 %1701 }
 0x243   : > { %6687 = vst [vmem:[#allocation23_spill] sm:$0xff] %v4805_v43 }
 0x244   : > { %1762 = vrot.lane.b32.xlu2 %v4749_v49, %s3605_s25 }
 0x246   : > { %v4825_v22 = vpop.permute.xlu1 %1693 }
 0x24a   : > { %1764 = vrot.lane.b32.xlu0 %v4722_v46, %s3605_s25  ;;  %1766 = vrot.lane.b32.xlu1 %v4705_v48, %s3605_s25  ;;  %v1692_v35 = vpop.permute.xlu0 %1691 }
 0x24c   : > { %1768 = vrot.lane.b32.xlu2 %v4691_v32, %s3605_s25 }
 0x24e   : > { %v4831_v61 = vpop.permute.xlu1 %1744 }
 0x24f   : > { %v1785_v30 = vsel %vm873_vm2, %v4790_v13, %v4831_v61 }
 0x252   : > { %2224 = vperm.xlu0 %3461, %v3363_v14   ;;  %2799 = vperm.xlu1 %3463, %v3384_v11   ;;  %v4861_v14 = vmul.f32 %v4818_v44, %v4694_v53  ;;  %v4869_v11 = vmul.f32 %v4818_v44, %v4652_v3  ;;  %v4881_v53 = vmul.f32 %v4798_v37, %v4663_v23 }
 0x253   : > { %v4889_v3 = vmul.f32 %v4818_v44, %v4663_v23 }
 0x254   : > { %2693 = vperm.xlu2 %3462, %v3381_v51   ;;  %v4873_v51 = vmul.f32 %v4798_v37, %v4719_v20 }
 0x255   : > { %6691 = vst [vmem:[#allocation57_spill] sm:$0xff] %v4889_v3 }
 0x256   : > { %6689 = vst [vmem:[#allocation24_spill] sm:$0xff] %v4873_v51 }
 0x259   : > { %v4927_v2 = vpop.permute.xlu1 %1699 }
 0x25a   : > { %2717 = vperm.xlu0 %3461, %v3382_v24   ;;  %2864 = vperm.xlu1 %3463, %v3386_v5   ;;  %v4877_v24 = vmul.f32 %v4770_v21, %v4719_v20  ;;  %v4885_v5 = vmul.f32 %v4770_v21, %v4663_v23  ;;  %v4909_v23 = vmul.f32 %v4798_v37, %v4688_v1 }
 0x25c   : > { %2823 = vperm.xlu2 %3462, %v3385_v39   ;;  %6690 = vst [vmem:[#allocation47_spill] sm:$0xff] %v4877_v24  ;;  %v4893_v39 = vmul.f32 %v4818_v44, %v4719_v20  ;;  %v4913_v20 = vmul.f32 %v4798_v37, %v4708_v62  ;;  %v1937_v62 = vmul.f32 %v4770_v21, %v4674_v28 }
 0x25d   : > { %v4980_v28 = vmul.f32 %v4818_v44, %v4737_v16 }
 0x25e   : > { %v4820_v7 = vpop.permute.xlu2 %1707  ;;  %6692 = vst [vmem:[#allocation48_spill] sm:$0xff] %v4893_v39 }
 0x25f   : > { %6688 = vst [vmem:[#allocation21_spill] sm:$0xff] %v4820_v7 }
 0x260   : > { %6701 = vst [vmem:[#allocation40_spill] sm:$0xff] %v4980_v28  ;;  %v2046_v28 = vmul.f32 %v4818_v44, %v4705_v48 }
 0x262   : > { %2758 = vperm.xlu0 %3461, %v3383_v40   ;;  %v4897_v40 = vmul.f32 %v4770_v21, %v4666_v56  ;;  %v4925_v56 = vmul.f32 %v4818_v44, %v4688_v1  ;;  %v4945_v1 = vmul.f32 %v4818_v44, %v4734_v8 }
 0x264   : > { %6696 = vst [vmem:[#allocation28_spill] sm:$0xff] %v4945_v1  ;;  %v4968_v1 = vmul.f32 %v4798_v37, %v4678_v52  ;;  %v5020_v52 = vmul.f32 %v4818_v44, %v4749_v49 }
 0x266   : > { %v4829_v31 = vpop.permute.xlu2 %1689  ;;  %6698 = vst [vmem:[#allocation58_spill] sm:$0xff] %v4968_v1 }
 0x267   : > { %6708 = vst [vmem:[#allocation36_spill] sm:$0xff] %v5020_v52  ;;  %v1834_v52 = vmul.f32 %v4798_v37, %v4705_v48 }
 0x26e   : > { %v4845_v15 = vpop.permute.xlu2 %1695 }
 0x274   : > { %v4933_v29 = vpop.permute.xlu0 %1709 }
 0x275   : > { %6693 = vst [vmem:[#allocation46_spill] sm:$0xff] %v4933_v29  ;;  %v1726_v50 = vsel %vm821_vm1, %v4820_v7, %v4933_v29  ;;  %v4972_v29 = vmul.f32 %v4770_v21, %v4737_v16  ;;  %v5000_v16 = vmul.f32 %v4798_v37, %v4749_v49 }
 0x276   : > { %v1807_v8 = vmul.f32 %v4760_v36, %v1726_v50  ;;  %v1913_v55 = vmul.f32 %v4782_v58, %v1726_v50  ;;  %v2019_v45 = vmul.f32 %v4816_v0, %v1726_v50  ;;  %v4964_v17 = vpop.permute.xlu2 %1713  ;;  %v1735_v50 = vsel %vm821_vm1, %v4829_v31, %v1692_v35 }
 0x277   : > { %6699 = vst [vmem:[#allocation49_spill] sm:$0xff] %v4972_v29  ;;  %v1734_v29 = vsel %vm821_vm1, %v1692_v35, %v4825_v22  ;;  %v1730_v35 = vsel %vm821_vm1, %v4927_v2, %v4805_v43  ;;  %v2010_v3 = vmul.f32 %v4816_v0, %v1735_v50 }
 0x278   : > { %v4985_v18 = vadd.f32 %v1831_v19, %v1807_v8  ;;  %v4987_v10 = vadd.f32 %v1937_v62, %v1913_v55  ;;  %v4989_v1 = vadd.f32 %v2043_v9, %v2019_v45  ;;  %6706 = vst [vmem:[#allocation51_spill] sm:$0xff] %v5000_v16  ;;  %v5004_v19 = vmul.f32 %v4770_v21, %v4749_v49 }
 0x279   : > { %v5008_v45 = vmul.f32 %v4798_v37, %v4691_v32  ;;  %v5012_v55 = vmul.f32 %v4770_v21, %v4691_v32  ;;  %v5016_v9 = vmul.f32 %v4818_v44, %v4691_v32  ;;  %v1798_v62 = vmul.f32 %v4760_v36, %v1735_v50 }
 0x27a   : > { %6702 = vst [vmem:[#allocation41_spill] sm:$0xff] %v4985_v18  ;;  %v5029_v8 = vmul.f32 %v4798_v37, %v4722_v46  ;;  %v1799_v32 = vmul.f32 %v4760_v36, %v1734_v29  ;;  %v1904_v49 = vmul.f32 %v4782_v58, %v1735_v50  ;;  %v2011_v16 = vmul.f32 %v4816_v0, %v1734_v29 }
 0x27b   : > { %6703 = vst [vmem:[#allocation52_spill] sm:$0xff] %v4987_v10  ;;  %v1803_v7 = vmul.f32 %v4760_v36, %v1730_v35  ;;  %v1839_v39 = vadd.f32 %v4849_v60, %v1798_v62  ;;  %v2075_v62 = vmul.f32 %v4827_v4, %v1785_v30 }
 0x27c   : > { %6704 = vst [vmem:[#allocation32_spill] sm:$0xff] %v4989_v1  ;;  %v5033_v1 = vmul.f32 %v4770_v21, %v4722_v46  ;;  %v5037_v10 = vpop.permute.xlu0 %1738  ;;  %v1718_v18 = vpop.permute.xlu1 %1717  ;;  %v5065_v24 = vadd.f32 %v4835_v54, %v1799_v32  ;;  %v1945_v51 = vadd.f32 %v4865_v25, %v1904_v49  ;;  %v5078_v50 = vadd.f32 %v4843_v6, %v2011_v16 }
 0x27d   : > { %6707 = vst [vmem:[#allocation35_spill] sm:$0xff] %v5004_v19  ;;  %v5043_v19 = vmul.f32 %v4818_v44, %v4722_v46  ;;  %v1909_v46 = vmul.f32 %v4782_v58, %v1730_v35  ;;  %v1969_v25 = vmul.f32 %v4780_v42, %v1785_v30  ;;  %v2051_v6 = vadd.f32 %v4869_v11, %v2010_v3 }
 0x27e   : > { %6709 = vst [vmem:[#allocation37_spill] sm:$0xff] %v5029_v8  ;;  %v1905_v8 = vmul.f32 %v4782_v58, %v1734_v29  ;;  %v1720_v43 = vpop.permute.xlu2 %1719  ;;  %v2015_v29 = vmul.f32 %v4816_v0, %v1730_v35  ;;  %v2048_v35 = vmul.f32 %v4818_v44, %v4739_v33 }
 0x27f   : > { %6710 = vst [vmem:[#allocation39_spill] sm:$0xff] %v5033_v1  ;;  %v1940_v1 = vmul.f32 %v4770_v21, %v4705_v48  ;;  %v1942_v48 = vmul.f32 %v4770_v21, %v4739_v33  ;;  %v1863_v21 = vmul.f32 %v4800_v41, %v1785_v30  ;;  %v1721_v54 = vsel %vm821_vm1, %v1718_v18, %v1720_v43 }
 0x280   : > { %6711 = vst [vmem:[#allocation53_spill] sm:$0xff] %v5043_v19  ;;  %v1836_v19 = vmul.f32 %v4798_v37, %v4739_v33  ;;  %v1733_v37 = vsel %vm821_vm1, %v4825_v22, %v4845_v15  ;;  %v5075_v60 = vadd.f32 %v4839_v27, %v1905_v8  ;;  %v5086_v22 = vadd.f32 %v4905_v63, %v1803_v7 }
 0x281   : > { %v5089_v33 = vadd.f32 %v4897_v40, %v1909_v46  ;;  %v5092_v44 = vadd.f32 %v4901_v57, %v2015_v29  ;;  %v1880_v27 = vadd.f32 %v1863_v21, %v1839_v39  ;;  %v1800_v16 = vmul.f32 %v4760_v36, %v1733_v37 }
 0x282   : > { %v5096_v8 = vadd.f32 %v1969_v25, %v1945_v51  ;;  %v1906_v32 = vmul.f32 %v4782_v58, %v1733_v37  ;;  %v2012_v30 = vmul.f32 %v4816_v0, %v1733_v37  ;;  %v1812_v63 = vmul.f32 %v4760_v36, %v1721_v54 }
 0x283   : > { %6712 = vst [vmem:[#allocation54_spill] sm:$0xff] %v5089_v33  ;;  %v1918_v40 = vmul.f32 %v4782_v58, %v1721_v54  ;;  %v2024_v3 = vmul.f32 %v4816_v0, %v1721_v54  ;;  %v5120_v21 = vadd.f32 %v4913_v20, %v1800_v16 }
 0x284   : > { %6713 = vst [vmem:[#allocation42_spill] sm:$0xff] %v5092_v44  ;;  %v1716_v7 = vpop.permute.xlu0 %1715  ;;  %v1688_v49 = vpop.permute.xlu1 %1687  ;;  %v5125_v54 = vadd.f32 %v4917_v34, %v1906_v32 }
 0x285   : > { %v1722_v57 = vsel %vm821_vm1, %v1716_v7, %v1718_v18  ;;  %v1723_v11 = vsel %vm821_vm1, %v4964_v17, %v1716_v7  ;;  %v1737_v51 = vsel %vm821_vm1, %v1720_v43, %v1688_v49  ;;  %v1736_v29 = vsel %vm821_vm1, %v1688_v49, %v4829_v31 }
 0x286   : > { %v1810_v39 = vmul.f32 %v4760_v36, %v1723_v11  ;;  %v1811_v46 = vmul.f32 %v4760_v36, %v1722_v57  ;;  %v5115_v37 = vpop.permute.xlu2 %1746  ;;  %v5117_v18 = vadd.f32 %v2075_v62, %v2051_v6  ;;  %v1916_v25 = vmul.f32 %v4782_v58, %v1723_v11 }
 0x287   : > { %v1917_v43 = vmul.f32 %v4782_v58, %v1722_v57  ;;  %v2022_v7 = vmul.f32 %v4816_v0, %v1723_v11  ;;  %v2023_v44 = vmul.f32 %v4816_v0, %v1722_v57  ;;  %v1796_v31 = vmul.f32 %v4760_v36, %v1737_v51 }
 0x288   : > { %v5131_v49 = vadd.f32 %v4931_v38, %v2012_v30  ;;  %v5133_v62 = vadd.f32 %v1836_v19, %v1812_v63  ;;  %v5135_v20 = vadd.f32 %v1942_v48, %v1918_v40  ;;  %v1797_v6 = vmul.f32 %v4760_v36, %v1736_v29 }
 0x289   : > { %v5138_v16 = vadd.f32 %v2048_v35, %v2024_v3  ;;  %v5140_v33 = vadd.f32 %v1834_v52, %v1810_v39  ;;  %v5143_v34 = vadd.f32 %v5008_v45, %v1811_v46  ;;  %v1902_v32 = vmul.f32 %v4782_v58, %v1737_v51 }
 0x28a   : > { %v5146_v57 = vadd.f32 %v1940_v1, %v1916_v25  ;;  %v5149_v38 = vadd.f32 %v5012_v55, %v1917_v43  ;;  %v1903_v19 = vmul.f32 %v4782_v58, %v1736_v29  ;;  %v1784_v48 = vsel %vm873_vm2, %v4831_v61, %v5115_v37 }
 0x28b   : > { %6714 = vst [vmem:[#allocation43_spill] sm:$0xff] %v5140_v33  ;;  %v5156_v35 = vadd.f32 %v2046_v28, %v2022_v7  ;;  %v5159_v52 = vadd.f32 %v5016_v9, %v2023_v44  ;;  %v1837_v45 = vadd.f32 %v4909_v23, %v1796_v31  ;;  %v2008_v1 = vmul.f32 %v4816_v0, %v1737_v51  ;;  %v6734_v33 = vld [vmem:[#allocation40_spill] sm:$0xff] }
 0x28c   : > { %6715 = vst [vmem:[#allocation44_spill] sm:$0xff] %v5146_v57  ;;  %v1698_v30 = vpop.permute.xlu0 %1697  ;;  %v1741_v63 = vpop.permute.xlu1 %1740  ;;  %v1838_v55 = vadd.f32 %v4853_v26, %v1797_v6  ;;  %v2009_v40 = vmul.f32 %v4816_v0, %v1736_v29  ;;  %v1970_v11 = vmul.f32 %v4780_v42, %v1784_v48  ;;  %v1943_v28 = vadd.f32 %v4921_v59, %v1902_v32  ;;  %v6717_v32 = vld [vmem:[#allocation24_spill] sm:$0xff] }
 0x28d   : > { %6716 = vst [vmem:[#allocation45_spill] sm:$0xff] %v5156_v35  ;;  %v1731_v61 = vsel %vm821_vm1, %v1698_v30, %v4927_v2  ;;  %v1864_v9 = vmul.f32 %v4800_v41, %v1784_v48  ;;  %v2076_v23 = vmul.f32 %v4827_v4, %v1784_v48  ;;  %v1732_v44 = vsel %vm821_vm1, %v4845_v15, %v1698_v30  ;;  %v6733_v35 = vld [vmem:[#allocation49_spill] sm:$0xff] }
 0x28e   : > { %v5175_v51 = vpop.permute.xlu2 %1750  ;;  %v1944_v26 = vadd.f32 %v4857_v47, %v1903_v19  ;;  %v1987_v3 = vadd.f32 %v1970_v11, %v5075_v60  ;;  %v1802_v39 = vmul.f32 %v4760_v36, %v1731_v61  ;;  %v1908_v2 = vmul.f32 %v4782_v58, %v1731_v61  ;;  %v6718_v19 = vld [vmem:[#allocation47_spill] sm:$0xff] }
 0x28f   : > { %v2049_v59 = vadd.f32 %v4925_v56, %v2008_v1  ;;  %v1801_v46 = vmul.f32 %v4760_v36, %v1732_v44  ;;  %v1907_v29 = vmul.f32 %v4782_v58, %v1732_v44  ;;  %v2014_v25 = vmul.f32 %v4816_v0, %v1731_v61  ;;  %v6719_v1 = vld [vmem:[#allocation57_spill] sm:$0xff] }
 0x290   : > { %v2050_v15 = vadd.f32 %v4861_v14, %v2009_v40  ;;  %v5186_v43 = vadd.f32 %v1987_v3, %v1880_v27  ;;  %v2013_v47 = vmul.f32 %v4816_v0, %v1732_v44  ;;  %v1786_v60 = vsel %vm873_vm2, %v1741_v63, %v4790_v13 }
 0x291   : > { %v5193_v7 = vadd.f32 %v1864_v9, %v5065_v24  ;;  %v2093_v56 = vadd.f32 %v2076_v23, %v5078_v50  ;;  %v1787_v31 = vsel %vm873_vm2, %v5037_v10, %v1741_v63  ;;  %v1862_v6 = vmul.f32 %v4800_v41, %v1786_v60 }
 0x292   : > { %v5203_v14 = vadd.f32 %v4881_v53, %v1802_v39  ;;  %v5206_v27 = vadd.f32 %v4885_v5, %v1908_v2  ;;  %v1861_v13 = vmul.f32 %v4800_v41, %v1787_v31  ;;  %v1968_v24 = vmul.f32 %v4780_v42, %v1786_v60  ;;  %v6720_v53 = vld [vmem:[#allocation48_spill] sm:$0xff]  ;;  %v6721_v39 = vld [vmem:[#allocation23_spill] sm:$0xff] }
 0x293   : > { %v5211_v50 = vadd.f32 %v6717_v32, %v1801_v46  ;;  %v1948_v48 = vadd.f32 %v6718_v19, %v1907_v29  ;;  %v5215_v30 = vadd.f32 %v6719_v1, %v2014_v25  ;;  %v1879_v63 = vadd.f32 %v1862_v6, %v1838_v55  ;;  %v6722_v46 = vld [vmem:[#allocation21_spill] sm:$0xff]  ;;  %v6724_v19 = vld [vmem:[#allocation30_spill] sm:$0xff] }
 0x294   : > { %v1704_v40 = vpop.permute.xlu0 %1703  ;;  %v1706_v11 = vpop.permute.xlu1 %1705  ;;  %v2054_v61 = vadd.f32 %v6720_v53, %v2013_v47  ;;  %v1878_v9 = vadd.f32 %v1861_v13, %v1837_v45  ;;  %v1967_v5 = vmul.f32 %v4780_v42, %v1787_v31  ;;  %v1985_v23 = vadd.f32 %v1968_v24, %v1944_v26  ;;  %v6723_v24 = vld [vmem:[#allocation25_spill] sm:$0xff] }
 0x295   : > { %v2073_v44 = vmul.f32 %v4827_v4, %v1787_v31  ;;  %v2109_v3 = vadd.f32 %v5096_v8, %v1879_v63  ;;  %v1729_v2 = vsel %vm821_vm1, %v6721_v39, %v1704_v40  ;;  %v1727_v55 = vsel %vm821_vm1, %v1706_v11, %v6722_v46  ;;  %v6725_v63 = vld [vmem:[#allocation28_spill] sm:$0xff] }
 0x296   : > { %v5227_v29 = vpop.permute.xlu2 %1756  ;;  %v2108_v25 = vadd.f32 %v1985_v23, %v1878_v9  ;;  %v1804_v45 = vmul.f32 %v4760_v36, %v1729_v2  ;;  %v1910_v26 = vmul.f32 %v4782_v58, %v1729_v2  ;;  %v2016_v47 = vmul.f32 %v4816_v0, %v1729_v2  ;;  %v6727_v2 = vld [vmem:[#allocation50_spill] sm:$0xff] }
 0x297   : > { %v2074_v8 = vmul.f32 %v4827_v4, %v1786_v60  ;;  %v1806_v31 = vmul.f32 %v4760_v36, %v1727_v55  ;;  %v1912_v6 = vmul.f32 %v4782_v58, %v1727_v55  ;;  %v2018_v13 = vmul.f32 %v4816_v0, %v1727_v55  ;;  %v6726_v60 = vld [vmem:[#allocation58_spill] sm:$0xff] }
 0x298   : > { %v5237_v32 = vadd.f32 %v6723_v24, %v1804_v45  ;;  %v5240_v1 = vadd.f32 %v6724_v19, %v1910_v26  ;;  %v5243_v53 = vadd.f32 %v6725_v63, %v2016_v47  ;;  %v1728_v9 = vsel %vm821_vm1, %v1704_v40, %v1706_v11  ;;  %v6729_v26 = vld [vmem:[#allocation33_spill] sm:$0xff] }
 0x299   : > { %v5247_v23 = vadd.f32 %v1967_v5, %v1943_v28  ;;  %v5250_v39 = vadd.f32 %v6726_v60, %v1806_v31  ;;  %v5253_v46 = vadd.f32 %v6727_v2, %v1912_v6  ;;  %v5256_v55 = vstv %s5200_s14  ;;  %v6732_v2 = vld [vmem:[#allocation31_spill] sm:$0xff]  ;;  %s3210_s14 = scalar_lea.hbm %s6520_s9, %s3397_s29 }
 0x29a   : > { %v5258_v45 = vadd.f32 %v2073_v44, %v2049_v59  ;;  %v5261_v24 = vadd.f32 %v6729_v26, %v2018_v13  ;;  %v2125_v47 = vadd.f32 %v2108_v25, %v5117_v18  ;;  %v2126_v19 = vadd.f32 %v2109_v3, %v2093_v56  ;;  %s3214_s16 = sshll.u32 %s3210_s14, 4  ;;  %s3215_s16 = int_to_ptr.hbm [resolvable:$true] %s3214_s16 }
 0x29b   : > { %6728 = vst [vmem:[#allocation55_spill] sm:$0xff] %v5253_v46  ;;  %v5264_v63 = vadd.f32 %v2074_v8, %v2050_v15  ;;  %v1805_v28 = vmul.f32 %v4760_v36, %v1728_v9  ;;  %v1911_v40 = vmul.f32 %v4782_v58, %v1728_v9  ;;  %v2017_v11 = vmul.f32 %v4816_v0, %v1728_v9  ;;  %v6731_v15 = vld [vmem:[#allocation46_spill] sm:$0xff]  ;;  %s3543_s21 = sshra.s32 %s3215_s16, 4  ;;  %s3544_s21 = int_to_ptr.hbm [resolvable:$true] %s3543_s21 }
 0x29c   : > { %6730 = vst [vmem:[#allocation56_spill] sm:$0xff] %v5261_v24  ;;  %v1749_v5 = vpop.permute.xlu0 %1748  ;;  %v1712_v31 = vpop.permute.xlu1 %1711  ;;  %p3550_p3 = scmp.lt.s32.totalorder %s3544_s21, %s6520_s9 }
 0x29d   : > { %v1782_v59 = vsel %vm873_vm2, %v1749_v5, %v5175_v51  ;;  %v1783_v44 = vsel %vm873_vm2, %v5115_v37, %v1749_v5  ;;  %v1724_v18 = vsel %vm821_vm1, %v1712_v31, %v4964_v17  ;;  %v1725_v56 = vsel %vm821_vm1, %v6731_v15, %v1712_v31 }
 0x29e   : > { %v1865_v3 = vmul.f32 %v4800_v41, %v1783_v44  ;;  %v1866_v25 = vmul.f32 %v4800_v41, %v1782_v59  ;;  %v1971_v8 = vmul.f32 %v4780_v42, %v1783_v44  ;;  %v1972_v6 = vmul.f32 %v4780_v42, %v1782_v59  ;;  %v5285_v13 = vpop.permute.xlu2 %1762 }
 0x29f   : > { %v2077_v37 = vmul.f32 %v4827_v4, %v1783_v44  ;;  %v2078_v9 = vmul.f32 %v4827_v4, %v1782_v59  ;;  %v1808_v17 = vmul.f32 %v4760_v36, %v1725_v56  ;;  %v1809_v60 = vmul.f32 %v4760_v36, %v1724_v18  ;;  %v6735_v44 = vld [vmem:[#allocation51_spill] sm:$0xff] }
 0x2a0   : > { %v5292_v26 = vadd.f32 %v6732_v2, %v1805_v28  ;;  %v1882_v5 = vadd.f32 %v1865_v3, %v5120_v21  ;;  %v1988_v31 = vadd.f32 %v1971_v8, %v5125_v54  ;;  %v1989_v15 = vadd.f32 %v1972_v6, %v1948_v48  ;;  %v6736_v48 = vld [vmem:[#allocation37_spill] sm:$0xff] }
 0x2a1   : > { %v5297_v57 = vadd.f32 %v6733_v35, %v1911_v40  ;;  %v5300_v24 = vadd.f32 %v6734_v33, %v2017_v11  ;;  %v2094_v59 = vadd.f32 %v2077_v37, %v5131_v49  ;;  %v5304_v46 = vadd.f32 %v6735_v44, %v1808_v17 }
 0x2a2   : > { %v2095_v36 = vadd.f32 %v2078_v9, %v2054_v61  ;;  %v2111_v28 = vadd.f32 %v1988_v31, %v5193_v7  ;;  %v1914_v2 = vmul.f32 %v4782_v58, %v1725_v56  ;;  %v1915_v21 = vmul.f32 %v4782_v58, %v1724_v18  ;;  %v6737_v61 = vld [vmem:[#allocation35_spill] sm:$0xff] }
 0x2a3   : > { %v5310_v54 = vadd.f32 %v1866_v25, %v5211_v50  ;;  %v2127_v35 = vadd.f32 %v5186_v43, %v2094_v59  ;;  %v5314_v33 = vadd.f32 %v6736_v48, %v1809_v60  ;;  %v2020_v49 = vmul.f32 %v4816_v0, %v1725_v56  ;;  %v6738_v50 = vld [vmem:[#allocation39_spill] sm:$0xff]  ;;  %v6739_v43 = vld [vmem:[#allocation36_spill] sm:$0xff] }
 0x2a4   : > { %v5317_v40 = vadd.f32 %v1989_v15, %v1882_v5  ;;  %v2128_v11 = vadd.f32 %v2111_v28, %v2095_v36  ;;  %v5320_v3 = vadd.f32 %v6737_v61, %v1914_v2  ;;  %v2021_v7 = vmul.f32 %v4816_v0, %v1724_v18  ;;  %v1771_v8 = vpop.permute.xlu0 %1770  ;;  %v5323_v58 = vpop.permute.xlu1 %2145 }
 0x2a5   : > { %v5326_v25 = vadd.f32 %v6738_v50, %v1915_v21  ;;  %v5329_v6 = vadd.f32 %v6739_v43, %v2020_v49  ;;  %v1788_v56 = vsel %vm873_vm2, %v1771_v8, %v5037_v10  ;;  %v2149_v37 = vadd.f32 %v5323_v58, %v2125_v47  ;;  %v6740_v47 = vld [vmem:[#allocation53_spill] sm:$0xff] }
 0x2a6   : > { %v1877_v9 = vmul.f32 %v4800_v41, %v1788_v56  ;;  %v1983_v17 = vmul.f32 %v4780_v42, %v1788_v56  ;;  %v2089_v0 = vmul.f32 %v4827_v4, %v1788_v56  ;;  %v5338_v18 = vpop.permute.xlu2 %1768  ;;  %v2150_v60 = vadd.f32 %v5323_v58, %v2126_v19  ;;  %v5355_v19 = vld [vmem:[%s6514_s3 + $0x10] sm:$0xff] }
 0x2a7   : > { %v1772_v5 = vsel %vm873_vm2, %v5338_v18, %v1771_v8  ;;  %vm2167_vm7 = vcmp.gt.f32.partialorder %v2149_v37, 0.0  ;;  %v2185_v31 = vmul.f32 %v5256_v55, %v2149_v37  ;;  %v2151_v10 = vadd.f32 %v5323_v58, %v2127_v35 }
 0x2a8   : > { %v5347_v15 = vadd.f32 %v6740_v47, %v2021_v7  ;;  %v1894_v59 = vadd.f32 %v1877_v9, %v5133_v62  ;;  %v2000_v44 = vadd.f32 %v1983_v17, %v5135_v20  ;;  %v1876_v36 = vmul.f32 %v4800_v41, %v1772_v5 }
 0x2a9   : > { %v1982_v28 = vmul.f32 %v4780_v42, %v1772_v5  ;;  %v2088_v2 = vmul.f32 %v4827_v4, %v1772_v5  ;;  %v2202_v21 = vsel %vm2167_vm7, %v2149_v37, %v2185_v31  ;;  %vm2168_vm8 = vcmp.gt.f32.partialorder %v2150_v60, 0.0 }
 0x2aa   : > { %v2107_v35 = vadd.f32 %v5247_v23, %v1894_v59  ;;  %v1893_v48 = vadd.f32 %v1876_v36, %v5143_v34  ;;  %2265 = vmatpush.msra.mxu3 %v2202_v21  ;;  %v2186_v62 = vmul.f32 %v5256_v55, %v2150_v60  ;;  %vm2169_vm9 = vcmp.gt.f32.partialorder %v2151_v10, 0.0  ;;  %v6741_v36 = vld [vmem:[#allocation54_spill] sm:$0xff] }
 0x2ab   : > { %v5363_v20 = vadd.f32 %v2089_v0, %v5138_v16  ;;  %v5366_v49 = vadd.f32 %v1982_v28, %v5149_v38  ;;  %v2187_v61 = vmul.f32 %v5256_v55, %v2151_v10  ;;  %3365 = vmatmul.msk.f32.vlgmr.msra.gmra.mxu3 %vm387_vm0, %v5355_v19  ;;  %v2152_v7 = vadd.f32 %v5323_v58, %v2128_v11 }
 0x2ac   : > { %v5373_v23 = vadd.f32 %v2088_v2, %v5159_v52  ;;  %v2123_v34 = vadd.f32 %v2000_v44, %v1893_v48  ;;  %v1753_v8 = vpop.permute.xlu0 %1752  ;;  %v2203_v50 = vsel %vm2168_vm8, %v2150_v60, %v2186_v62  ;;  %v1755_v43 = vpop.permute.xlu1 %1754  ;;  %v2124_v16 = vadd.f32 %v2107_v35, %v5264_v63  ;;  %v6742_v48 = vld [vmem:[#allocation42_spill] sm:$0xff] }
 0x2ad   : > { %v1781_v38 = vsel %vm873_vm2, %v5175_v51, %v1753_v8  ;;  %2285 = vmatpush.msrb.mxu0 %v2203_v50  ;;  %v2204_v56 = vsel %vm2169_vm9, %v2151_v10, %v2187_v61  ;;  %v1779_v37 = vsel %vm873_vm2, %v1755_v43, %v5227_v29  ;;  %v1780_v52 = vsel %vm873_vm2, %v1753_v8, %v1755_v43 }
 0x2ae   : > { %v1867_v11 = vmul.f32 %v4800_v41, %v1781_v38  ;;  %v1973_v9 = vmul.f32 %v4780_v42, %v1781_v38  ;;  %v2079_v17 = vmul.f32 %v4827_v4, %v1781_v38  ;;  %2305 = vmatpush.msrb.mxu1 %v2204_v56  ;;  %3366 = vmatmul.msk.f32.vlgmr.msrb.gmra.mxu0 %vm387_vm0, %v5355_v19  ;;  %vm2170_vm10 = vcmp.gt.f32.partialorder %v2152_v7, 0.0 }
 0x2af   : > { %3367 = vmatmul.msk.f32.vlgmr.msrb.gmra.mxu1 %vm387_vm0, %v5355_v19  ;;  %v1868_v51 = vmul.f32 %v4800_v41, %v1780_v52  ;;  %v1869_v63 = vmul.f32 %v4800_v41, %v1779_v37  ;;  %v1974_v0 = vmul.f32 %v4780_v42, %v1780_v52  ;;  %v1975_v60 = vmul.f32 %v4780_v42, %v1779_v37 }
 0x2b0   : > { %v1884_v5 = vadd.f32 %v1867_v11, %v5203_v14  ;;  %v1990_v31 = vadd.f32 %v1973_v9, %v5206_v27  ;;  %v2096_v10 = vadd.f32 %v2079_v17, %v5215_v30  ;;  %v2080_v47 = vmul.f32 %v4827_v4, %v1780_v52 }
 0x2b1   : > { %v1885_v59 = vadd.f32 %v1868_v51, %v5086_v22  ;;  %v1886_v44 = vadd.f32 %v1869_v63, %v5237_v32  ;;  %v1991_v28 = vadd.f32 %v1974_v0, %v6741_v36  ;;  %v1992_v2 = vadd.f32 %v1975_v60, %v5240_v1  ;;  %v6745_v36 = vld [vmem:[#allocation52_spill] sm:$0xff] }
 0x2b2   : > { %v2113_v21 = vadd.f32 %v1990_v31, %v5310_v54  ;;  %v2129_v35 = vadd.f32 %v5317_v40, %v2096_v10  ;;  %v2081_v14 = vmul.f32 %v4827_v4, %v1779_v37  ;;  %v2097_v27 = vadd.f32 %v2080_v47, %v6742_v48  ;;  %v6744_v47 = vld [vmem:[#allocation55_spill] sm:$0xff] }
 0x2b3   : > { %v2114_v62 = vadd.f32 %v1991_v28, %v1884_v5  ;;  %v2115_v30 = vadd.f32 %v1992_v2, %v1885_v59  ;;  %v2148_v61 = vadd.f32 %v5323_v58, %v2124_v16  ;;  %v2188_v22 = vmul.f32 %v5256_v55, %v2152_v7  ;;  %v6746_v2 = vld [vmem:[#allocation56_spill] sm:$0xff] }
 0x2b4   : > { %v2098_v32 = vadd.f32 %v2081_v14, %v5243_v53  ;;  %v2130_v8 = vadd.f32 %v2113_v21, %v2097_v27  ;;  %v1759_v50 = vpop.permute.xlu0 %1758  ;;  %v1761_v43 = vpop.permute.xlu1 %1760  ;;  %v2153_v1 = vadd.f32 %v5323_v58, %v2129_v35  ;;  %v5412_v54 = vadd.f32 %v2123_v34, %v5258_v45  ;;  %v6747_v35 = vld [vmem:[#allocation32_spill] sm:$0xff] }
 0x2b5   : > { %vm2166_vm11 = vcmp.gt.f32.partialorder %v2148_v61, 0.0  ;;  %v2184_v40 = vmul.f32 %v5256_v55, %v2148_v61  ;;  %v1778_v38 = vsel %vm873_vm2, %v5227_v29, %v1759_v50  ;;  %v2205_v16 = vsel %vm2170_vm10, %v2152_v7, %v2188_v22 }
 0x2b6   : > { %v2131_v56 = vadd.f32 %v2114_v62, %v2098_v32  ;;  %v1870_v53 = vmul.f32 %v4800_v41, %v1778_v38  ;;  %v1976_v37 = vmul.f32 %v4780_v42, %v1778_v38  ;;  %v2082_v52 = vmul.f32 %v4827_v4, %v1778_v38 }
 0x2b7   : > { %v2201_v11 = vsel %vm2166_vm11, %v2148_v61, %v2184_v40  ;;  %v1776_v45 = vsel %vm873_vm2, %v1761_v43, %v5285_v13  ;;  %v1777_v34 = vsel %vm873_vm2, %v1759_v50, %v1761_v43  ;;  %vm2171_vm12 = vcmp.gt.f32.partialorder %v2153_v1, 0.0 }
 0x2b8   : > { %2245 = vmatpush.msra.mxu2 %v2201_v11  ;;  %v1887_v29 = vadd.f32 %v1870_v53, %v5292_v26  ;;  %v1993_v7 = vadd.f32 %v1976_v37, %v5297_v57  ;;  %v2099_v9 = vadd.f32 %v2082_v52, %v5300_v24  ;;  %v1871_v17 = vmul.f32 %v4800_v41, %v1777_v34  ;;  %v6743_v26 = vld [vmem:[#allocation41_spill] sm:$0xff] }
 0x2b9   : > { %3364 = vmatmul.msk.f32.vlgmr.msra.gmra.mxu2 %vm387_vm0, %v5355_v19  ;;  %v1872_v51 = vmul.f32 %v4800_v41, %v1776_v45  ;;  %v1977_v63 = vmul.f32 %v4780_v42, %v1777_v34  ;;  %v1978_v0 = vmul.f32 %v4780_v42, %v1776_v45  ;;  %v2083_v60 = vmul.f32 %v4827_v4, %v1777_v34 }
 0x2ba   : > { %v2116_v5 = vadd.f32 %v1993_v7, %v1886_v44  ;;  %v2132_v31 = vadd.f32 %v2115_v30, %v2099_v9  ;;  %2325 = vmatpush.msrb.mxu2 %v2205_v16  ;;  %v1888_v57 = vadd.f32 %v1871_v17, %v5250_v39  ;;  %v2084_v24 = vmul.f32 %v4827_v4, %v1776_v45  ;;  %v6748_v17 = vld [vmem:[#allocation43_spill] sm:$0xff] }
 0x2bb   : > { %v1889_v10 = vadd.f32 %v1872_v51, %v6743_v26  ;;  %v1994_v59 = vadd.f32 %v1977_v63, %v6744_v47  ;;  %v1995_v28 = vadd.f32 %v1978_v0, %v6745_v36  ;;  %v2100_v21 = vadd.f32 %v2083_v60, %v6746_v2 }
 0x2bc   : > { %v2101_v14 = vadd.f32 %v2084_v24, %v6747_v35  ;;  %v2189_v48 = vmul.f32 %v5256_v55, %v2153_v1  ;;  %v2154_v44 = vadd.f32 %v5323_v58, %v2130_v8  ;;  %v1765_v27 = vpop.permute.xlu0 %1764  ;;  %v2155_v62 = vadd.f32 %v5323_v58, %v2131_v56  ;;  %v1767_v32 = vpop.permute.xlu1 %1766  ;;  %v6750_v24 = vld [vmem:[#allocation45_spill] sm:$0xff] }
 0x2bd   : > { %v2117_v39 = vadd.f32 %v1994_v59, %v1887_v29  ;;  %v2118_v30 = vadd.f32 %v1995_v28, %v1888_v57  ;;  %v2133_v61 = vadd.f32 %v2116_v5, %v2100_v21  ;;  %v1775_v22 = vsel %vm873_vm2, %v5285_v13, %v1765_v27 }
 0x2be   : > { %v2206_v50 = vsel %vm2171_vm12, %v2153_v1, %v2189_v48  ;;  %vm2172_vm13 = vcmp.gt.f32.partialorder %v2154_v44, 0.0  ;;  %v2190_v43 = vmul.f32 %v5256_v55, %v2154_v44  ;;  %v1873_v40 = vmul.f32 %v4800_v41, %v1775_v22 }
 0x2bf   : > { %v2134_v38 = vadd.f32 %v2117_v39, %v2101_v14  ;;  %2345 = vmatpush.msrb.mxu3 %v2206_v50  ;;  %v1979_v8 = vmul.f32 %v4780_v42, %v1775_v22  ;;  %v2085_v16 = vmul.f32 %v4827_v4, %v1775_v22  ;;  %vm2173_vm14 = vcmp.gt.f32.partialorder %v2155_v62, 0.0 }
 0x2c0   : > { %3369 = vmatmul.msk.f32.vlgmr.msrb.gmra.mxu3 %vm387_vm0, %v5355_v19  ;;  %v2207_v56 = vsel %vm2172_vm13, %v2154_v44, %v2190_v43  ;;  %v1890_v13 = vadd.f32 %v1873_v40, %v5304_v46  ;;  %v2191_v1 = vmul.f32 %v5256_v55, %v2155_v62  ;;  %v1773_v53 = vsel %vm873_vm2, %v1767_v32, %v5338_v18 }
 0x2c1   : > { %2365 = vmatpush.msra.mxu0 %v2207_v56  ;;  %v1996_v37 = vadd.f32 %v1979_v8, %v5320_v3  ;;  %v2102_v52 = vadd.f32 %v2085_v16, %v5329_v6  ;;  %3368 = vmatmul.msk.f32.vlgmr.msrb.gmra.mxu2 %vm387_vm0, %v5355_v19  ;;  %v1774_v11 = vsel %vm873_vm2, %v1765_v27, %v1767_v32 }
 0x2c2   : > { %3370 = vmatmul.msk.f32.vlgmr.msra.gmra.mxu0 %vm387_vm0, %v5355_v19  ;;  %v2208_v46 = vsel %vm2173_vm14, %v2155_v62, %v2191_v1  ;;  %v1874_v45 = vmul.f32 %v4800_v41, %v1774_v11  ;;  %v1875_v34 = vmul.f32 %v4800_v41, %v1773_v53  ;;  %v1980_v18 = vmul.f32 %v4780_v42, %v1774_v11  ;;  %v6749_v41 = vld [vmem:[#allocation44_spill] sm:$0xff]  ;;  %v6751_v1 = vld [vmem:[#allocation13_spill] sm:$0xff] }
 0x2c3   : > { %v2119_v29 = vadd.f32 %v1996_v37, %v1889_v10  ;;  %v2135_v3 = vadd.f32 %v2118_v30, %v2102_v52  ;;  %2385 = vmatpush.msra.mxu1 %v2208_v46  ;;  %v1981_v6 = vmul.f32 %v4780_v42, %v1773_v53  ;;  %v2086_v7 = vmul.f32 %v4827_v4, %v1774_v11  ;;  %v6753_v37 = vld [vmem:[#allocation14_spill] sm:$0xff] }
 0x2c4   : > { %v1891_v9 = vadd.f32 %v1874_v45, %v5314_v33  ;;  %v1892_v51 = vadd.f32 %v1875_v34, %v6748_v17  ;;  %v1997_v63 = vadd.f32 %v1980_v18, %v5326_v25  ;;  %v2087_v0 = vmul.f32 %v4827_v4, %v1773_v53  ;;  %3371 = vmatmul.msk.f32.vlgmr.msra.gmra.mxu1 %vm387_vm0, %v5355_v19  ;;  %v6755_v45 = vld [vmem:[#allocation17_spill] sm:$0xff]  ;;  %v6759_v17 = vld [vmem:[#allocation22_spill] sm:$0xff] }
 0x2c5   : > { %v1998_v60 = vadd.f32 %v1981_v6, %v6749_v41  ;;  %v2103_v5 = vadd.f32 %v2086_v7, %v5347_v15  ;;  %v2156_v57 = vadd.f32 %v5323_v58, %v2132_v31  ;;  %v2157_v42 = vadd.f32 %v5323_v58, %v2133_v61 }
 0x2c6   : > { %v2104_v26 = vadd.f32 %v2087_v0, %v6750_v24  ;;  %v2120_v33 = vadd.f32 %v1997_v63, %v1890_v13  ;;  %v2122_v10 = vadd.f32 %v5366_v49, %v1892_v51  ;;  %v2158_v25 = vadd.f32 %v5323_v58, %v2134_v38  ;;  %v6761_v0 = vld [vmem:[#allocation26_spill] sm:$0xff] }
 0x2c7   : > { %v2121_v47 = vadd.f32 %v1998_v60, %v1891_v9  ;;  %v2136_v4 = vadd.f32 %v2119_v29, %v2103_v5  ;;  %vm2174_vm15 = vcmp.gt.f32.partialorder %v2156_v57, 0.0  ;;  %v2192_v59 = vmul.f32 %v5256_v55, %v2156_v57  ;;  %v6757_v29 = vld [vmem:[#allocation18_spill] sm:$0xff] }
 0x2c8   : > { %v2137_v36 = vadd.f32 %v2120_v33, %v2104_v26  ;;  %vm2175_vm3 = vcmp.gt.f32.partialorder %v2157_v42, 0.0  ;;  %v2193_v15 = vmul.f32 %v5256_v55, %v2157_v42  ;;  %vm2176_vm4 = vcmp.gt.f32.partialorder %v2158_v25, 0.0  ;;  %v6763_v24 = vld [vmem:[#allocation34_spill] sm:$0xff] }
 0x2c9   : > { %v2209_v31 = vsel %vm2174_vm15, %v2156_v57, %v2192_v59  ;;  %v2194_v28 = vmul.f32 %v5256_v55, %v2158_v25  ;;  %v2159_v2 = vadd.f32 %v5323_v58, %v2135_v3  ;;  %v2160_v21 = vadd.f32 %v5323_v58, %v2136_v4  ;;  %v6765_v33 = vld [vmem:[#allocation38_spill] sm:$0xff] }
 0x2ca   : > { %2405 = vmatpush.msra.mxu2 %v2209_v31  ;;  %v2210_v49 = vsel %vm2175_vm3, %v2157_v42, %v2193_v15  ;;  %v2164_v35 = vadd.f32 %v5323_v58, %v5412_v54  ;;  %v2161_v14 = vadd.f32 %v5323_v58, %v2137_v36  ;;  %v2138_v48 = vadd.f32 %v2121_v47, %v5373_v23  ;;  %v6767_v36 = vld [vmem:[#allocation11_spill] sm:$0xff]  ;;  %v6769_v31 = vld [vmem:[#allocation12_spill] sm:$0xff] }
 0x2cb   : > { %2425 = vmatpush.msra.mxu3 %v2210_v49  ;;  %3372 = vmatmul.msk.f32.vlgmr.msra.gmra.mxu2 %vm387_vm0, %v5355_v19  ;;  %v2211_v44 = vsel %vm2176_vm4, %v2158_v25, %v2194_v28  ;;  %vm2177_vm5 = vcmp.gt.f32.partialorder %v2159_v2, 0.0  ;;  %v2195_v27 = vmul.f32 %v5256_v55, %v2159_v2  ;;  %vm2178_vm6 = vcmp.gt.f32.partialorder %v2160_v21, 0.0 }
 0x2cc   : > { %3373 = vmatmul.msk.f32.vlgmr.msra.gmra.mxu3 %vm387_vm0, %v5355_v19  ;;  %2445 = vmatpush.msrb.mxu0 %v2211_v44  ;;  %v2196_v62 = vmul.f32 %v5256_v55, %v2160_v21  ;;  %vm2182_vm7 = vcmp.gt.f32.partialorder %v2164_v35, 0.0  ;;  %v2200_v54 = vmul.f32 %v5256_v55, %v2164_v35  ;;  %vm2179_vm8 = vcmp.gt.f32.partialorder %v2161_v14, 0.0  ;;  %v6773_v44 = vld [vmem:[#allocation16_spill] sm:$0xff] }
 0x2cd   : > { %3374 = vmatmul.msk.f32.vlgmr.msrb.gmra.mxu0 %vm387_vm0, %v5355_v19  ;;  %v2212_v23 = vsel %vm2177_vm5, %v2159_v2, %v2195_v27  ;;  %v2197_v39 = vmul.f32 %v5256_v55, %v2161_v14  ;;  %v2162_v30 = vadd.f32 %v5323_v58, %v2138_v48  ;;  %v2139_v61 = vadd.f32 %v2122_v10, %v5363_v20 }
 0x2ce   : > { %2465 = vmatpush.msrb.mxu1 %v2212_v23  ;;  %v2213_v22 = vsel %vm2178_vm6, %v2160_v21, %v2196_v62  ;;  %v2217_v32 = vsel %vm2182_vm7, %v2164_v35, %v2200_v54 }
 0x2cf   : > { %3375 = vmatmul.msk.f32.vlgmr.msrb.gmra.mxu1 %vm387_vm0, %v5355_v19  ;;  %2485 = vmatpush.msrb.mxu2 %v2213_v22  ;;  %v2214_v50 = vsel %vm2179_vm8, %v2161_v14, %v2197_v39  ;;  %vm2180_vm9 = vcmp.gt.f32.partialorder %v2162_v30, 0.0  ;;  %v2198_v43 = vmul.f32 %v5256_v55, %v2162_v30  ;;  %v2163_v40 = vadd.f32 %v5323_v58, %v2139_v61  ;;  %v5524_v58 = vpop.permute.xlu0 %2224  ;;  %v6771_v14 = vld [vmem:[#allocation15_spill] sm:$0xff]  ;;  %v6777_v22 = vld [vmem:[#allocation20_spill] sm:$0xff] }
 0x2d0   : > { %2505 = vmatpush.msrb.mxu3 %v2214_v50 }
 0x2d1   : > { %2565 = vmatpush.msra.mxu2 %v2217_v32  ;;  %v2215_v38 = vsel %vm2180_vm9, %v2162_v30, %v2198_v43  ;;  %vm2181_vm10 = vcmp.gt.f32.partialorder %v2163_v40, 0.0  ;;  %v2199_v8 = vmul.f32 %v5256_v55, %v2163_v40  ;;  %v6775_v30 = vld [vmem:[#allocation19_spill] sm:$0xff] }
 0x2d2   : > { %2525 = vmatpush.msra.mxu0 %v2215_v38 }
 0x2d3   : > { %3376 = vmatmul.msk.f32.vlgmr.msrb.gmra.mxu2 %vm387_vm0, %v5355_v19  ;;  %v2216_v20 = vsel %vm2181_vm10, %v2163_v40, %v2199_v8  ;;  %v6779_v8 = vld [vmem:[#allocation27_spill] sm:$0xff] }
 0x2d4   : > { %2545 = vmatpush.msra.mxu1 %v2216_v20  ;;  %3377 = vmatmul.msk.f32.vlgmr.msrb.gmra.mxu3 %vm387_vm0, %v5355_v19 }
 0x2d5   : > { %3378 = vmatmul.msk.f32.vlgmr.msra.gmra.mxu0 %vm387_vm0, %v5355_v19 }
 0x2d7   : > { %3379 = vmatmul.msk.f32.vlgmr.msra.gmra.mxu1 %vm387_vm0, %v5355_v19 }
 0x2db   : > { %3380 = vmatmul.msk.f32.vlgmr.msra.gmra.mxu2 %vm387_vm0, %v5355_v19 }
 0x32b   : > { %v2287_v55 = vpop.f32.mrf.mxu0 }
 0x32c   : > { %v2288_v16 = vadd.f32 %v2287_v55, %v5524_v58  ;;  %v2307_v56 = vpop.f32.mrf.mxu1  ;;  %v6781_v55 = vld [vmem:[#allocation29_spill] sm:$0xff] }
 0x32d   : > { %v2308_v13 = vadd.f32 %v2307_v56, %v5524_v58  ;;  %v5648_v56 = vpop.permute.xlu2 %2693 }
 0x32e   : > { %v5529_v53 = vmul.f32 %v2288_v16, %v6751_v1  ;;  %v2267_v47 = vpop.f32.mrf.mxu3 }
 0x32f   : > { %v5532_v52 = vmul.f32 %v2308_v13, %v6753_v37  ;;  %v2268_v59 = vadd.f32 %v2267_v47, %v5524_v58  ;;  %v3466_v37 = vld [vmem:[#allocation6 + $0x10] ss:$0 sm:$0xff] }
 0x330   : > { %6752 = vst [vmem:[#allocation24_spill] sm:$0xff] %v5529_v53  ;;  %2642 = vrot.lane.b32.xlu2 %v5529_v53, %s3605_s25  ;;  %2591 = vrot.lane.b32.xlu0 %v5529_v53, %s3604_s24 }
 0x331   : > { %6754 = vst [vmem:[#allocation47_spill] sm:$0xff] %v5532_v52  ;;  %2593 = vrot.lane.b32.xlu1 %v5532_v52, %s3604_s24  ;;  %v5598_v28 = vmul.f32 %v2268_v59, %v6769_v31 }
 0x333   : > { %6770 = vst [vmem:[#allocation58_spill] sm:$0xff] %v5598_v28 }
 0x338   : > { %2644 = vrot.lane.b32.xlu0 %v5532_v52, %s3605_s25 }
 0x33c   : > { %v2247_v25 = vpop.f32.mrf.mxu2 }
 0x33d   : > { %v2248_v4 = vadd.f32 %v2247_v25, %v5524_v58 }
 0x33f   : > { %v2367_v19 = vpop.f32.mrf.mxu0  ;;  %v5593_v15 = vmul.f32 %v2248_v4, %v6767_v36 }
 0x340   : > { %v2368_v11 = vadd.f32 %v2367_v19, %v5524_v58 }
 0x341   : > { %v2387_v46 = vpop.f32.mrf.mxu1  ;;  %6768 = vst [vmem:[#allocation28_spill] sm:$0xff] %v5593_v15 }
 0x342   : > { %v5544_v34 = vmul.f32 %v2368_v11, %v6755_v45  ;;  %v2388_v18 = vadd.f32 %v2387_v46, %v5524_v58  ;;  %v3388_v11 = vld [vmem:[%s6516_s5 + $0xc8] sm:$0xff]  ;;  %v5664_v46 = vpop.permute.xlu2 %2823  ;;  %v5666_v45 = vpop.permute.xlu0 %2717 }
 0x343   : > { %v2347_v21 = vpop.f32.mrf.mxu3 }
 0x344   : > { %6756 = vst [vmem:[#allocation57_spill] sm:$0xff] %v5544_v34  ;;  %v5548_v3 = vmul.f32 %v2388_v18, %v6757_v29  ;;  %2599 = vrot.lane.b32.xlu1 %v5544_v34, %s3604_s24  ;;  %2650 = vrot.lane.b32.xlu0 %v5544_v34, %s3605_s25  ;;  %v2327_v2 = vpop.f32.mrf.mxu2  ;;  %v2348_v35 = vadd.f32 %v2347_v21, %v5524_v58  ;;  %v3387_v18 = vld [vmem:[%s6516_s5 + $0xc0] sm:$0xff] }
 0x345   : > { %v2328_v49 = vadd.f32 %v2327_v2, %v5524_v58  ;;  %v3118_v29 = vld [vmem:[%s6518_s7] sm:$0xff] }
 0x346   : > { %6758 = vst [vmem:[#allocation48_spill] sm:$0xff] %v5548_v3  ;;  %2601 = vrot.lane.b32.xlu2 %v5548_v3, %s3604_s24  ;;  %v5612_v27 = vmul.f32 %v2348_v35, %v6773_v44 }
 0x347   : > { %v5609_v48 = vmul.f32 %v2328_v49, %v6771_v14  ;;  %v2722_v14 = vmul.f32 %v5666_v45, %v5529_v53 }
 0x348   : > { %6774 = vst [vmem:[#allocation33_spill] sm:$0xff] %v5612_v27 }
 0x349   : > { %6772 = vst [vmem:[#allocation50_spill] sm:$0xff] %v5609_v48 }
 0x34a   : > { %v2447_v6 = vpop.f32.mrf.mxu0 }
 0x34b   : > { %v2448_v7 = vadd.f32 %v2447_v6, %v5524_v58 }
 0x34c   : > { %2652 = vrot.lane.b32.xlu1 %v5548_v3, %s3605_s25  ;;  %v2467_v9 = vpop.f32.mrf.mxu1 }
 0x34d   : > { %v5560_v51 = vmul.f32 %v2448_v7, %v6759_v17  ;;  %v2468_v63 = vadd.f32 %v2467_v9, %v5524_v58  ;;  %v3389_v7 = vld [vmem:[%s6516_s5 + $0xd0] sm:$0xff]  ;;  %v5683_v9 = vpop.permute.xlu0 %2758 }
 0x34e   : > { %v2407_v62 = vpop.f32.mrf.mxu2 }
 0x34f   : > { %6760 = vst [vmem:[#allocation23_spill] sm:$0xff] %v5560_v51  ;;  %v5564_v41 = vmul.f32 %v2468_v63, %v6761_v0  ;;  %2607 = vrot.lane.b32.xlu2 %v5560_v51, %s3604_s24  ;;  %v2408_v54 = vadd.f32 %v2407_v62, %v5524_v58  ;;  %v2427_v23 = vpop.f32.mrf.mxu3  ;;  %v3390_v63 = vld [vmem:[%s6517_s6 + $0x10] sm:$0xff]  ;;  %v2828_v62 = vmul.f32 %v5664_v46, %v5529_v53 }
 0x350   : > { %v2428_v39 = vadd.f32 %v2427_v23, %v5524_v58  ;;  %v5827_v53 = vmul.f32 %v5666_v45, %v5560_v51 }
 0x351   : > { %6762 = vst [vmem:[#allocation21_spill] sm:$0xff] %v5564_v41  ;;  %2609 = vrot.lane.b32.xlu0 %v5564_v41, %s3604_s24  ;;  %v5623_v61 = vmul.f32 %v2408_v54, %v6775_v30 }
 0x352   : > { %v2527_v60 = vpop.f32.mrf.mxu0  ;;  %v5630_v32 = vmul.f32 %v2428_v39, %v6777_v22  ;;  %6793 = vst [vmem:[#allocation52_spill] sm:$0xff] %v5827_v53 }
 0x353   : > { %v2528_v5 = vadd.f32 %v2527_v60, %v5524_v58  ;;  %6776 = vst [vmem:[#allocation46_spill] sm:$0xff] %v5623_v61  ;;  %v3141_v60 = vld [vmem:[%s6519_s8] sm:$0xff] }
 0x354   : > { %2658 = vrot.lane.b32.xlu1 %v5560_v51, %s3605_s25  ;;  %v2547_v57 = vpop.f32.mrf.mxu1  ;;  %6778 = vst [vmem:[#allocation31_spill] sm:$0xff] %v5630_v32 }
 0x355   : > { %v2548_v42 = vadd.f32 %v2547_v57, %v5524_v58  ;;  %v5575_v26 = vmul.f32 %v2528_v5, %v6763_v24 }
 0x356   : > { %v2487_v50 = vpop.f32.mrf.mxu2 }
 0x357   : > { %6764 = vst [vmem:[#allocation25_spill] sm:$0xff] %v5575_v26  ;;  %2660 = vrot.lane.b32.xlu2 %v5564_v41, %s3605_s25  ;;  %v5582_v10 = vmul.f32 %v2548_v42, %v6765_v33  ;;  %v2488_v43 = vadd.f32 %v2487_v50, %v5524_v58  ;;  %v2507_v40 = vpop.f32.mrf.mxu3 }
 0x358   : > { %v2508_v38 = vadd.f32 %v2507_v40, %v5524_v58 }
 0x359   : > { %2615 = vrot.lane.b32.xlu0 %v5575_v26, %s3604_s24  ;;  %6766 = vst [vmem:[#allocation30_spill] sm:$0xff] %v5582_v10  ;;  %v5641_v20 = vmul.f32 %v2488_v43, %v6779_v8 }
 0x35a   : > { %v5646_v16 = vmul.f32 %v2508_v38, %v6781_v55 }
 0x35b   : > { %6780 = vst [vmem:[#allocation49_spill] sm:$0xff] %v5641_v20 }
 0x35c   : > { %2617 = vrot.lane.b32.xlu1 %v5582_v10, %s3604_s24  ;;  %6782 = vst [vmem:[#allocation40_spill] sm:$0xff] %v5646_v16 }
 0x35e   : > { %v2567_v13 = vpop.f32.mrf.mxu2 }
 0x35f   : > { %2666 = vrot.lane.b32.xlu2 %v5575_v26, %s3605_s25  ;;  %v2568_v1 = vadd.f32 %v2567_v13, %v5524_v58  ;;  %v5668_v58 = vpop.permute.xlu1 %2799 }
 0x361   : > { %2668 = vrot.lane.b32.xlu0 %v5582_v10, %s3605_s25  ;;  %v5657_v19 = vmul.f32 %v3466_v37, %v2568_v1 }
 0x363   : > { %6783 = vst [vmem:[#allocation51_spill] sm:$0xff] %v5657_v19 }
 0x364   : > { %2587 = vrot.lane.b32.xlu1 %v5593_v15, %s3604_s24 }
 0x367   : > { %2589 = vrot.lane.b32.xlu2 %v5598_v28, %s3604_s24  ;;  %v5685_v17 = vpop.permute.xlu1 %2864 }
 0x369   : > { %2638 = vrot.lane.b32.xlu0 %v5593_v15, %s3605_s25 }
 0x36c   : > { %2640 = vrot.lane.b32.xlu1 %v5598_v28, %s3605_s25 }
 0x36f   : > { %2595 = vrot.lane.b32.xlu2 %v5609_v48, %s3604_s24 }
 0x371   : > { %2597 = vrot.lane.b32.xlu0 %v5612_v27, %s3604_s24 }
 0x374   : > { %2646 = vrot.lane.b32.xlu1 %v5609_v48, %s3605_s25 }
 0x377   : > { %2648 = vrot.lane.b32.xlu2 %v5612_v27, %s3605_s25 }
 0x379   : > { %2603 = vrot.lane.b32.xlu0 %v5623_v61, %s3604_s24 }
 0x37c   : > { %2605 = vrot.lane.b32.xlu1 %v5630_v32, %s3604_s24 }
 0x37f   : > { %2654 = vrot.lane.b32.xlu2 %v5623_v61, %s3605_s25 }
 0x381   : > { %2656 = vrot.lane.b32.xlu0 %v5630_v32, %s3605_s25 }
 0x384   : > { %2611 = vrot.lane.b32.xlu1 %v5641_v20, %s3604_s24 }
 0x387   : > { %2613 = vrot.lane.b32.xlu2 %v5646_v16, %s3604_s24 }
 0x389   : > { %2662 = vrot.lane.b32.xlu0 %v5641_v20, %s3605_s25 }
 0x38a   : > { %v5678_v6 = vpop.permute.xlu2 %2642 }
 0x38c   : > { %2664 = vrot.lane.b32.xlu1 %v5646_v16, %s3605_s25 }
 0x38f   : > { %2619 = vrot.lane.b32.xlu2 %v5657_v19, %s3604_s24 }
 0x391   : > { %2929 = vperm.xlu0 %3461, %v3388_v11   ;;  %v2723_v11 = vmul.f32 %v5666_v45, %v5532_v52 }
 0x394   : > { %2670 = vrot.lane.b32.xlu1 %v5657_v19, %s3605_s25  ;;  %s3212_s25 = sshll.u32 %s6431_s28, 4  ;;  %s3213_s25 = int_to_ptr.vmem [resolvable:$true] %s3212_s25 }
 0x397   : > { %2905 = vperm.xlu2 %3462, %v3387_v18   ;;  %v2829_v18 = vmul.f32 %v5664_v46, %v5532_v52 }
 0x399   : > { %3121 = vperm.xlu0 %3461, %v3118_v29   ;;  %v2721_v29 = vmul.f32 %v5666_v45, %v5598_v28 }
 0x39c   : > { %2970 = vperm.xlu1 %3463, %v3389_v7  }
 0x39f   : > { %3045 = vperm.xlu2 %3462, %v3390_v63  }
 0x3a0   : > { %v5690_v0 = vpop.permute.xlu2 %2601 }
 0x3a2   : > { %v2592_v5 = vpop.permute.xlu0 %2591 }
 0x3a3   : > { %v5695_v57 = vpop.permute.xlu1 %2593 }
 0x3a4   : > { %3144 = vperm.xlu1 %3463, %v3141_v60   ;;  %v5700_v42 = vsel %vm821_vm1, %v2592_v5, %v5695_v57  ;;  %v5785_v60 = vmul.f32 %v5664_v46, %v5598_v28  ;;  %v2837_v28 = vmul.f32 %v5664_v46, %v5564_v41 }
 0x3a5   : > { %6784 = vst [vmem:[#allocation37_spill] sm:$0xff] %v5700_v42 }
 0x3a9   : > { %v5702_v24 = vpop.permute.xlu2 %2607 }
 0x3aa   : > { %v5704_v33 = vpop.permute.xlu0 %2644 }
 0x3ab   : > { %v5710_v25 = vsel %vm873_vm2, %v5678_v6, %v5704_v33 }
 0x3ac   : > { %6785 = vst [vmem:[#allocation35_spill] sm:$0xff] %v5710_v25  ;;  %v2763_v39 = vmul.f32 %v5683_v9, %v5710_v25  ;;  %v2869_v30 = vmul.f32 %v5685_v17, %v5710_v25  ;;  %v5817_v25 = vmul.f32 %v5664_v46, %v5612_v27 }
 0x3b1   : > { %v5712_v47 = vpop.permute.xlu2 %2660 }
 0x3b6   : > { %v5714_v4 = vpop.permute.xlu1 %2599  ;;  %v5718_v36 = vpop.permute.xlu0 %2650 }
 0x3b7   : > { %v5779_v7 = vsel %vm821_vm1, %v5714_v4, %v5690_v0 }
 0x3b8   : > { %6791 = vst [vmem:[#allocation41_spill] sm:$0xff] %v5779_v7 }
 0x3b9   : > { %v5716_v59 = vpop.permute.xlu2 %2666 }
 0x3ba   : > { %6786 = vst [vmem:[#allocation39_spill] sm:$0xff] %v5716_v59 }
 0x3be   : > { %v2653_v31 = vpop.permute.xlu1 %2652 }
 0x3bf   : > { %v5723_v2 = vsel %vm873_vm2, %v5718_v36, %v2653_v31 }
 0x3c0   : > { %6787 = vst [vmem:[#allocation36_spill] sm:$0xff] %v5723_v2 }
 0x3c1   : > { %v2590_v21 = vpop.permute.xlu2 %2589 }
 0x3c2   : > { %v5727_v49 = vsel %vm821_vm1, %v2590_v21, %v2592_v5  ;;  %v5789_v5 = vmul.f32 %v5666_v45, %v5593_v15 }
 0x3c3   : > { %6788 = vst [vmem:[#allocation53_spill] sm:$0xff] %v5727_v49  ;;  %v2698_v35 = vmul.f32 %v5648_v56, %v5727_v49  ;;  %v2804_v44 = vmul.f32 %v5668_v58, %v5727_v49  ;;  %v5737_v54 = vpop.permute.xlu0 %2609  ;;  %v2734_v49 = vmul.f32 %v5666_v45, %v5575_v26 }
 0x3c4   : > { %6789 = vst [vmem:[#allocation54_spill] sm:$0xff] %v5737_v54  ;;  %v5743_v23 = vsel %vm821_vm1, %v5702_v24, %v5737_v54  ;;  %v5843_v54 = vmul.f32 %v5664_v46, %v5623_v61 }
 0x3c5   : > { %6790 = vst [vmem:[#allocation42_spill] sm:$0xff] %v5743_v23  ;;  %v2739_v22 = vadd.f32 %v2722_v14, %v2698_v35  ;;  %v2845_v50 = vadd.f32 %v2828_v62, %v2804_v44  ;;  %v5793_v35 = vmul.f32 %v5664_v46, %v5593_v15  ;;  %v2727_v14 = vmul.f32 %v5666_v45, %v5548_v3 }
 0x3c6   : > { %v5749_v43 = vpop.permute.xlu1 %2658  ;;  %v2833_v44 = vmul.f32 %v5664_v46, %v5548_v3  ;;  %v5801_v62 = vmul.f32 %v5666_v45, %v5544_v34  ;;  %v2703_v3 = vmul.f32 %v5648_v56, %v5779_v7  ;;  %v5839_v15 = vmul.f32 %v5666_v45, %v5623_v61  ;;  %6796 = vst [vmem:[#allocation43_spill] sm:$0xff] %v5843_v54 }
 0x3c7   : > { %v5751_v40 = vadd.f32 %v2763_v39, %v2739_v22  ;;  %v5753_v38 = vadd.f32 %v2869_v30, %v2845_v50  ;;  %v5805_v39 = vmul.f32 %v5664_v46, %v5544_v34  ;;  %v2724_v30 = vmul.f32 %v5666_v45, %v5609_v48 }
 0x3c8   : > { %v2830_v22 = vmul.f32 %v5664_v46, %v5609_v48  ;;  %v5813_v50 = vmul.f32 %v5666_v45, %v5612_v27  ;;  %v2731_v34 = vmul.f32 %v5666_v45, %v5564_v41  ;;  %v5831_v48 = vmul.f32 %v5664_v46, %v5560_v51  ;;  %6795 = vst [vmem:[#allocation32_spill] sm:$0xff] %v5839_v15 }
 0x3c9   : > { %v5755_v8 = vpop.permute.xlu2 %2595  ;;  %v2809_v27 = vmul.f32 %v5668_v58, %v5779_v7  ;;  %v2840_v51 = vmul.f32 %v5664_v46, %v5575_v26  ;;  %v5851_v7 = vmul.f32 %v5666_v45, %v5630_v32  ;;  %v5855_v41 = vmul.f32 %v5664_v46, %v5630_v32 }
 0x3ca   : > { %6794 = vst [vmem:[#allocation56_spill] sm:$0xff] %v5831_v48  ;;  %v5859_v15 = vmul.f32 %v5666_v45, %v5582_v10  ;;  %v5863_v61 = vmul.f32 %v5664_v46, %v5582_v10  ;;  %v2699_v32 = vmul.f32 %v5648_v56, %v5700_v42  ;;  %v2744_v48 = vadd.f32 %v2727_v14, %v2703_v3 }
 0x3cb   : > { %v5757_v55 = vpop.permute.xlu0 %2615  ;;  %6797 = vst [vmem:[#allocation44_spill] sm:$0xff] %v5851_v7  ;;  %v5874_v7 = vmul.f32 %v5666_v45, %v5641_v20  ;;  %v5889_v53 = vsel %vm821_vm1, %v5695_v57, %v5755_v8  ;;  %v5909_v57 = vmul.f32 %v5664_v46, %v5646_v16  ;;  %v2707_v14 = vmul.f32 %v5648_v56, %v5743_v23 }
 0x3cc   : > { %6798 = vst [vmem:[#allocation45_spill] sm:$0xff] %v5855_v41  ;;  %v2805_v41 = vmul.f32 %v5668_v58, %v5700_v42 }
 0x3cd   : > { %6799 = vst [vmem:[#allocation13_spill] sm:$0xff] %v5863_v61 }
 0x3ce   : > { %v5759_v13 = vpop.permute.xlu1 %2617  ;;  %6801 = vst [vmem:[#allocation17_spill] sm:$0xff] %v5874_v7 }
 0x3cf   : > { %v5765_v1 = vsel %vm821_vm1, %v5757_v55, %v5759_v13  ;;  %6805 = vst [vmem:[#allocation34_spill] sm:$0xff] %v5909_v57 }
 0x3d1   : > { %v5767_v37 = vpop.permute.xlu2 %2648 }
 0x3d3   : > { %v5781_v63 = vpop.permute.xlu0 %2668 }
 0x3d4   : > { %6792 = vst [vmem:[#allocation55_spill] sm:$0xff] %v5781_v63 }
 0x3d6   : > { %v5823_v52 = vpop.permute.xlu1 %2587 }
 0x3d7   : > { %v5868_v26 = vsel %vm821_vm1, %v5823_v52, %v2590_v21  ;;  %v2850_v21 = vadd.f32 %v2833_v44, %v2809_v27  ;;  %v5901_v27 = vmul.f32 %v5666_v45, %v5646_v16  ;;  %v2813_v44 = vmul.f32 %v5668_v58, %v5743_v23 }
 0x3d8   : > { %v2697_v3 = vmul.f32 %v5648_v56, %v5868_v26  ;;  %v2806_v16 = vmul.f32 %v5668_v58, %v5889_v53  ;;  %v5931_v23 = vmul.f32 %v5666_v45, %v5657_v19  ;;  %v5949_v45 = vsel %vm873_vm2, %v5716_v59, %v5781_v63 }
 0x3d9   : > { %v5870_v54 = vpop.permute.xlu2 %2654  ;;  %6803 = vst [vmem:[#allocation22_spill] sm:$0xff] %v5901_v27  ;;  %v5921_v27 = vsel %vm873_vm2, %v5749_v43, %v5712_v47 }
 0x3da   : > { %6800 = vst [vmem:[#allocation14_spill] sm:$0xff] %v5870_v54  ;;  %v5883_v10 = vsel %vm873_vm2, %v2653_v31, %v5870_v54  ;;  %v5905_v31 = vmul.f32 %v5664_v46, %v5641_v20  ;;  %v2700_v20 = vmul.f32 %v5648_v56, %v5889_v53  ;;  %v2847_v63 = vadd.f32 %v2830_v22, %v2806_v16 }
 0x3db   : > { %6802 = vst [vmem:[#allocation18_spill] sm:$0xff] %v5883_v10  ;;  %v2768_v7 = vmul.f32 %v5683_v9, %v5883_v10  ;;  %v2874_v61 = vmul.f32 %v5685_v17, %v5883_v10  ;;  %v5895_v42 = vpop.permute.xlu0 %2638 }
 0x3dc   : > { %6804 = vst [vmem:[#allocation26_spill] sm:$0xff] %v5905_v31  ;;  %v2741_v31 = vadd.f32 %v2724_v30, %v2700_v20 }
 0x3dd   : > { %v5915_v10 = vadd.f32 %v2768_v7, %v2744_v48  ;;  %v2891_v54 = vadd.f32 %v2874_v61, %v2850_v21  ;;  %v2740_v48 = vadd.f32 %v2723_v11, %v2699_v32  ;;  %v2846_v61 = vadd.f32 %v2829_v18, %v2805_v41  ;;  %6807 = vst [vmem:[#allocation11_spill] sm:$0xff] %v5949_v45 }
 0x3de   : > { %v5927_v57 = vpop.permute.xlu1 %2640  ;;  %v5941_v21 = vmul.f32 %v5664_v46, %v5657_v19  ;;  %v2738_v41 = vadd.f32 %v2721_v29, %v2697_v3  ;;  %v5955_v11 = vadd.f32 %v2731_v34, %v2707_v14  ;;  %v5957_v46 = vadd.f32 %v2837_v28, %v2813_v44 }
 0x3df   : > { %6806 = vst [vmem:[#allocation38_spill] sm:$0xff] %v5915_v10  ;;  %v5937_v7 = vsel %vm873_vm2, %v5927_v57, %v5678_v6  ;;  %v2767_v10 = vmul.f32 %v5683_v9, %v5723_v2  ;;  %v2873_v6 = vmul.f32 %v5685_v17, %v5723_v2  ;;  %v5961_v18 = vmul.f32 %v5683_v9, %v5921_v27 }
 0x3e0   : > { %v2762_v32 = vmul.f32 %v5683_v9, %v5937_v7  ;;  %v5975_v34 = vsel %vm873_vm2, %v5767_v37, %v5718_v36  ;;  %v2775_v28 = vmul.f32 %v5683_v9, %v5949_v45 }
 0x3e1   : > { %v5963_v19 = vpop.permute.xlu2 %2613 }
 0x3e2   : > { %v2779_v59 = vadd.f32 %v2762_v32, %v2738_v41  ;;  %v5969_v29 = vsel %vm821_vm1, %v5963_v19, %v5757_v55  ;;  %v2881_v55 = vmul.f32 %v5685_v17, %v5949_v45 }
 0x3e3   : > { %v2710_v20 = vmul.f32 %v5648_v56, %v5969_v29  ;;  %v2816_v16 = vmul.f32 %v5668_v58, %v5969_v29  ;;  %v2598_v30 = vpop.permute.xlu0 %2597 }
 0x3e4   : > { %v5986_v22 = vadd.f32 %v5753_v38, %v2779_v59  ;;  %v5991_v36 = vsel %vm821_vm1, %v2598_v30, %v5714_v4  ;;  %v5996_v3 = vsel %vm821_vm1, %v5755_v8, %v2598_v30  ;;  %v2766_v59 = vmul.f32 %v5683_v9, %v5975_v34 }
 0x3e5   : > { %v2751_v14 = vadd.f32 %v2734_v49, %v2710_v20  ;;  %v2857_v44 = vadd.f32 %v2840_v51, %v2816_v16  ;;  %v2701_v41 = vmul.f32 %v5648_v56, %v5996_v3  ;;  %v2702_v32 = vmul.f32 %v5648_v56, %v5991_v36 }
 0x3e6   : > { %6808 = vst [vmem:[#allocation12_spill] sm:$0xff] %v5986_v22  ;;  %v2872_v4 = vmul.f32 %v5685_v17, %v5975_v34  ;;  %v2807_v38 = vmul.f32 %v5668_v58, %v5996_v3  ;;  %v2808_v8 = vmul.f32 %v5668_v58, %v5991_v36  ;;  %v2647_v49 = vpop.permute.xlu1 %2646 }
 0x3e7   : > { %v6010_v51 = vadd.f32 %v2775_v28, %v2751_v14  ;;  %v6012_v20 = vadd.f32 %v2881_v55, %v2857_v44  ;;  %v2742_v16 = vadd.f32 %v5813_v50, %v2701_v41  ;;  %v2743_v30 = vadd.f32 %v5801_v62, %v2702_v32 }
 0x3e8   : > { %v2848_v22 = vadd.f32 %v5817_v25, %v2807_v38  ;;  %v2849_v45 = vadd.f32 %v5805_v39, %v2808_v8  ;;  %v6021_v2 = vsel %vm873_vm2, %v2647_v49, %v5767_v37  ;;  %v6026_v28 = vsel %vm873_vm2, %v5704_v33, %v2647_v49 }
 0x3e9   : > { %v2783_v55 = vadd.f32 %v2766_v59, %v2742_v16  ;;  %v2784_v14 = vadd.f32 %v2767_v10, %v2743_v30  ;;  %v2764_v50 = vmul.f32 %v5683_v9, %v6026_v28  ;;  %v2765_v25 = vmul.f32 %v5683_v9, %v6021_v2  ;;  %v2620_v62 = vpop.permute.xlu2 %2619 }
 0x3ea   : > { %v2889_v39 = vadd.f32 %v2872_v4, %v2848_v22  ;;  %v2890_v44 = vadd.f32 %v2873_v6, %v2849_v45  ;;  %v2870_v37 = vmul.f32 %v5685_v17, %v6026_v28  ;;  %v2871_v41 = vmul.f32 %v5685_v17, %v6021_v2 }
 0x3eb   : > { %v2711_v33 = vmul.f32 %v5648_v56, %v5765_v1  ;;  %v6038_v32 = vadd.f32 %v2891_v54, %v2784_v14  ;;  %v2781_v10 = vadd.f32 %v2764_v50, %v2740_v48  ;;  %v2782_v59 = vadd.f32 %v2765_v25, %v2741_v31  ;;  %v2604_v38 = vpop.permute.xlu0 %2603 }
 0x3ec   : > { %v6040_v8 = vadd.f32 %v2890_v44, %v2783_v55  ;;  %v2887_v49 = vadd.f32 %v2870_v37, %v2846_v61  ;;  %v2888_v16 = vadd.f32 %v2871_v41, %v2847_v63  ;;  %v2637_v45 = vsel %vm821_vm1, %v2620_v62, %v5823_v52 }
 0x3ed   : > { %6809 = vst [vmem:[#allocation15_spill] sm:$0xff] %v6038_v32  ;;  %v6049_v6 = vsel %vm873_vm2, %v5895_v42, %v5927_v57  ;;  %v6051_v22 = vadd.f32 %v2889_v39, %v2782_v59  ;;  %v2696_v54 = vmul.f32 %v5648_v56, %v2637_v45  ;;  %v2802_v31 = vmul.f32 %v5668_v58, %v2637_v45 }
 0x3ee   : > { %6810 = vst [vmem:[#allocation16_spill] sm:$0xff] %v6040_v8  ;;  %v2877_v48 = vmul.f32 %v5685_v17, %v5921_v27  ;;  %v6058_v63 = vadd.f32 %v2887_v49, %v5751_v40  ;;  %v6060_v61 = vadd.f32 %v2888_v16, %v2781_v10  ;;  %v6065_v52 = vsel %vm821_vm1, %v5759_v13, %v2620_v62  ;;  %v2606_v57 = vpop.permute.xlu1 %2605  ;;  %v6814_v49 = vld [vmem:[#allocation13_spill] sm:$0xff] }
 0x3ef   : > { %6811 = vst [vmem:[#allocation19_spill] sm:$0xff] %v6051_v22  ;;  %v2817_v4 = vmul.f32 %v5668_v58, %v5765_v1  ;;  %v2803_v30 = vmul.f32 %v5668_v58, %v5868_v26  ;;  %v2737_v55 = vadd.f32 %v5789_v5, %v2696_v54  ;;  %v2629_v40 = vsel %vm821_vm1, %v5690_v0, %v2604_v38 }
 0x3f0   : > { %6812 = vst [vmem:[#allocation20_spill] sm:$0xff] %v6058_v63  ;;  %v6076_v14 = vadd.f32 %v5859_v15, %v2711_v33  ;;  %v2761_v13 = vmul.f32 %v5683_v9, %v6049_v6  ;;  %v2627_v50 = vsel %vm821_vm1, %v2606_v57, %v5702_v24  ;;  %v2628_v25 = vsel %vm821_vm1, %v2604_v38, %v2606_v57  ;;  %v6816_v57 = vld [vmem:[#allocation56_spill] sm:$0xff] }
 0x3f1   : > { %6813 = vst [vmem:[#allocation27_spill] sm:$0xff] %v6060_v61  ;;  %v2868_v5 = vmul.f32 %v5685_v17, %v5937_v7  ;;  %v2712_v62 = vmul.f32 %v5648_v56, %v6065_v52  ;;  %v2818_v15 = vmul.f32 %v5668_v58, %v6065_v52  ;;  %v2843_v0 = vadd.f32 %v5793_v35, %v2802_v31  ;;  %v6815_v35 = vld [vmem:[#allocation52_spill] sm:$0xff]  ;;  %v6106_v8 = vpop.permute.xlu2 %2905 }
 0x3f2   : > { %v2704_v39 = vmul.f32 %v5648_v56, %v2629_v40  ;;  %v2810_v44 = vmul.f32 %v5668_v58, %v2629_v40  ;;  %v2706_v24 = vmul.f32 %v5648_v56, %v2627_v50  ;;  %v2812_v37 = vmul.f32 %v5668_v58, %v2627_v50 }
 0x3f3   : > { %v2844_v41 = vadd.f32 %v5785_v60, %v2803_v30  ;;  %v2867_v33 = vmul.f32 %v5685_v17, %v6049_v6  ;;  %v2778_v10 = vadd.f32 %v2761_v13, %v2737_v55  ;;  %v2705_v59 = vmul.f32 %v5648_v56, %v2628_v25  ;;  %v2657_v38 = vpop.permute.xlu0 %2656  ;;  %v6820_v13 = vld [vmem:[#allocation32_spill] sm:$0xff] }
 0x3f4   : > { %v6101_v16 = vadd.f32 %v6814_v49, %v2817_v4  ;;  %v2747_v54 = vadd.f32 %v6815_v35, %v2706_v24  ;;  %v2811_v31 = vmul.f32 %v5668_v58, %v2628_v25  ;;  %v2853_v32 = vadd.f32 %v6816_v57, %v2812_v37  ;;  %v6821_v49 = vld [vmem:[#allocation43_spill] sm:$0xff]  ;;  %v6823_v57 = vld [vmem:[#allocation44_spill] sm:$0xff] }
 0x3f5   : > { %v2885_v22 = vadd.f32 %v2868_v5, %v2844_v41  ;;  %v6109_v60 = vadd.f32 %v5931_v23, %v2712_v62  ;;  %v6112_v30 = vadd.f32 %v5941_v21, %v2818_v15  ;;  %v6114_v55 = vadd.f32 %v2867_v33, %v2843_v0  ;;  %v6824_v62 = vld [vmem:[#allocation45_spill] sm:$0xff] }
 0x3f6   : > { %v2745_v4 = vadd.f32 %v6820_v13, %v2704_v39  ;;  %v2851_v61 = vadd.f32 %v6821_v49, %v2810_v44  ;;  %v2788_v24 = vadd.f32 %v5961_v18, %v2747_v54  ;;  %v2894_v35 = vadd.f32 %v2877_v48, %v2853_v32  ;;  %v2612_v63 = vpop.permute.xlu1 %2611  ;;  %v6825_v0 = vld [vmem:[#allocation53_spill] sm:$0xff]  ;;  %v6826_v32 = vld [vmem:[#allocation14_spill] sm:$0xff] }
 0x3f7   : > { %6817 = vst [vmem:[#allocation29_spill] sm:$0xff] %v6109_v60  ;;  %v6119_v37 = vadd.f32 %v2885_v22, %v2778_v10  ;;  %v2746_v5 = vadd.f32 %v6823_v57, %v2705_v59  ;;  %v6123_v23 = vmul.f32 %v6106_v8, %v2637_v45  ;;  %v6127_v21 = vmul.f32 %v6106_v8, %v5868_v26  ;;  %v6828_v22 = vld [vmem:[#allocation37_spill] sm:$0xff]  ;;  %v6829_v59 = vld [vmem:[#allocation54_spill] sm:$0xff] }
 0x3f8   : > { %6818 = vst [vmem:[#allocation13_spill] sm:$0xff] %v6112_v30  ;;  %v2852_v15 = vadd.f32 %v6824_v62, %v2811_v31  ;;  %v6132_v39 = vmul.f32 %v6106_v8, %v6825_v0  ;;  %v6137_v18 = vsel %vm873_vm2, %v2657_v38, %v5749_v43  ;;  %v6142_v45 = vsel %vm873_vm2, %v6826_v32, %v2657_v38  ;;  %v6830_v31 = vld [vmem:[#allocation41_spill] sm:$0xff] }
 0x3f9   : > { %6819 = vst [vmem:[#allocation52_spill] sm:$0xff] %v6114_v55  ;;  %v6146_v26 = vmul.f32 %v6106_v8, %v6828_v22  ;;  %v6150_v48 = vmul.f32 %v6106_v8, %v5889_v53  ;;  %v2769_v44 = vmul.f32 %v5683_v9, %v6142_v45  ;;  %v2770_v43 = vmul.f32 %v5683_v9, %v6137_v18  ;;  %v6833_v55 = vld [vmem:[#allocation22_spill] sm:$0xff] }
 0x3fa   : > { %6822 = vst [vmem:[#allocation56_spill] sm:$0xff] %v6119_v37  ;;  %v2875_v41 = vmul.f32 %v5685_v17, %v6142_v45  ;;  %v2876_v33 = vmul.f32 %v5685_v17, %v6137_v18  ;;  %v2624_v10 = vsel %vm821_vm1, %v2612_v63, %v5963_v19  ;;  %v2625_v53 = vsel %vm821_vm1, %v6829_v59, %v2612_v63  ;;  %v6832_v59 = vld [vmem:[#allocation17_spill] sm:$0xff] }
 0x3fb   : > { %6827 = vst [vmem:[#allocation32_spill] sm:$0xff] %v6142_v45  ;;  %v6168_v38 = vmul.f32 %v6106_v8, %v5996_v3  ;;  %v6172_v54 = vmul.f32 %v6106_v8, %v5991_v36  ;;  %v6176_v13 = vmul.f32 %v6106_v8, %v6830_v31  ;;  %v2787_v49 = vadd.f32 %v2770_v43, %v2746_v5  ;;  %v2663_v57 = vpop.permute.xlu0 %2662 }
 0x3fc   : > { %v6179_v19 = vmul.f32 %v6106_v8, %v2629_v40  ;;  %v6182_v62 = vmul.f32 %v6106_v8, %v2628_v25  ;;  %v2708_v63 = vmul.f32 %v5648_v56, %v2625_v53  ;;  %v2709_v3 = vmul.f32 %v5648_v56, %v2624_v10 }
 0x3fd   : > { %v6187_v0 = vmul.f32 %v6106_v8, %v2627_v50  ;;  %v6189_v36 = vadd.f32 %v2894_v35, %v2787_v49  ;;  %v2814_v32 = vmul.f32 %v5668_v58, %v2625_v53  ;;  %v2815_v5 = vmul.f32 %v5668_v58, %v2624_v10  ;;  %v6834_v50 = vld [vmem:[#allocation39_spill] sm:$0xff] }
 0x3fe   : > { %v2786_v22 = vadd.f32 %v2769_v44, %v2745_v4  ;;  %v2892_v43 = vadd.f32 %v2875_v41, %v2851_v61  ;;  %v2893_v40 = vadd.f32 %v2876_v33, %v2852_v15  ;;  %v2749_v31 = vadd.f32 %v6832_v59, %v2708_v63  ;;  %v2665_v25 = vpop.permute.xlu1 %2664  ;;  %v6835_v15 = vld [vmem:[#allocation26_spill] sm:$0xff] }
 0x3ff   : > { %6831 = vst [vmem:[#allocation43_spill] sm:$0xff] %v6189_v36  ;;  %v2750_v37 = vadd.f32 %v6833_v55, %v2709_v3  ;;  %v6198_v56 = vsel %vm873_vm2, %v5712_v47, %v2663_v57  ;;  %v6203_v35 = vsel %vm873_vm2, %v2665_v25, %v6834_v50  ;;  %v6207_v58 = vsel %vm873_vm2, %v2663_v57, %v2665_v25  ;;  %v6836_v41 = vld [vmem:[#allocation34_spill] sm:$0xff] }
 0x400   : > { %v2772_v61 = vmul.f32 %v5683_v9, %v6198_v56  ;;  %v2878_v55 = vmul.f32 %v5685_v17, %v6198_v56  ;;  %v2773_v4 = vmul.f32 %v5683_v9, %v6207_v58  ;;  %v2774_v47 = vmul.f32 %v5683_v9, %v6203_v35  ;;  %v6837_v63 = vld [vmem:[#allocation42_spill] sm:$0xff] }
 0x401   : > { %v2855_v44 = vadd.f32 %v6835_v15, %v2814_v32  ;;  %v2856_v33 = vadd.f32 %v6836_v41, %v2815_v5  ;;  %v2879_v49 = vmul.f32 %v5685_v17, %v6207_v58  ;;  %v2880_v57 = vmul.f32 %v5685_v17, %v6203_v35 }
 0x402   : > { %v2919_v3 = vmul.f32 %v6106_v8, %v6837_v63  ;;  %v2895_v59 = vadd.f32 %v2878_v55, %v5957_v46  ;;  %v2790_v25 = vadd.f32 %v2773_v4, %v2749_v31  ;;  %v2791_v50 = vadd.f32 %v2774_v47, %v2750_v37  ;;  %v6840_v37 = vld [vmem:[#allocation38_spill] sm:$0xff]  ;;  %v6844_v4 = vld [vmem:[#allocation28_spill] sm:$0xff] }
 0x403   : > { %v2922_v36 = vmul.f32 %v6106_v8, %v5969_v29  ;;  %v2789_v32 = vadd.f32 %v2772_v61, %v5955_v11  ;;  %v2896_v15 = vadd.f32 %v2879_v49, %v2855_v44  ;;  %v2897_v5 = vadd.f32 %v2880_v57, %v2856_v33  ;;  %v2930_v41 = vpop.permute.xlu0 %2929  ;;  %v6847_v49 = vld [vmem:[#allocation47_spill] sm:$0xff]  ;;  %v6848_v57 = vld [vmem:[#allocation50_spill] sm:$0xff] }
 0x404   : > { %v2923_v45 = vmul.f32 %v6106_v8, %v5765_v1  ;;  %v2924_v30 = vmul.f32 %v6106_v8, %v6065_v52  ;;  %v6233_v60 = vadd.f32 %v2895_v59, %v2788_v24  ;;  %v6236_v46 = vadd.f32 %v6012_v20, %v2791_v50  ;;  %v6845_v24 = vld [vmem:[#allocation58_spill] sm:$0xff]  ;;  %v6846_v20 = vld [vmem:[#allocation24_spill] sm:$0xff]  ;;  %v6850_v59 = vld [vmem:[#allocation57_spill] sm:$0xff] }
 0x405   : > { %v6239_v31 = vadd.f32 %v2892_v43, %v6840_v37  ;;  %v6241_v29 = vadd.f32 %v2893_v40, %v2786_v22  ;;  %v6243_v11 = vadd.f32 %v2896_v15, %v2789_v32  ;;  %v6245_v61 = vadd.f32 %v2897_v5, %v2790_v25  ;;  %v6849_v40 = vld [vmem:[#allocation33_spill] sm:$0xff]  ;;  %v6851_v50 = vld [vmem:[#allocation48_spill] sm:$0xff]  ;;  %v6854_v5 = vld [vmem:[#allocation23_spill] sm:$0xff] }
 0x406   : > { %6838 = vst [vmem:[#allocation44_spill] sm:$0xff] %v6233_v60  ;;  %v2920_v55 = vmul.f32 %v6106_v8, %v2625_v53  ;;  %v2921_v1 = vmul.f32 %v6106_v8, %v2624_v10  ;;  %v2932_v52 = vmul.f32 %v2930_v41, %v6844_v4  ;;  %v2933_v47 = vmul.f32 %v2930_v41, %v6845_v24  ;;  %v2671_v44 = vpop.permute.xlu1 %2670  ;;  %v6852_v53 = vld [vmem:[#allocation46_spill] sm:$0xff]  ;;  %v6853_v8 = vld [vmem:[#allocation31_spill] sm:$0xff]  ;;  %v6855_v4 = vld [vmem:[#allocation21_spill] sm:$0xff] }
 0x407   : > { %6839 = vst [vmem:[#allocation45_spill] sm:$0xff] %v6236_v46  ;;  %v2934_v33 = vmul.f32 %v2930_v41, %v6846_v20  ;;  %v2935_v43 = vmul.f32 %v2930_v41, %v6847_v49  ;;  %v2936_v22 = vmul.f32 %v2930_v41, %v6848_v57  ;;  %v2937_v63 = vmul.f32 %v2930_v41, %v6849_v40  ;;  %v6856_v46 = vld [vmem:[#allocation49_spill] sm:$0xff]  ;;  %v6859_v60 = vld [vmem:[#allocation30_spill] sm:$0xff] }
 0x408   : > { %6841 = vst [vmem:[#allocation53_spill] sm:$0xff] %v6241_v29  ;;  %v2938_v25 = vmul.f32 %v2930_v41, %v6850_v59  ;;  %v2939_v32 = vmul.f32 %v2930_v41, %v6851_v50  ;;  %v2940_v15 = vmul.f32 %v2930_v41, %v6852_v53  ;;  %v2941_v10 = vmul.f32 %v2930_v41, %v6853_v8  ;;  %v6860_v29 = vld [vmem:[#allocation51_spill] sm:$0xff] }
 0x409   : > { %6842 = vst [vmem:[#allocation14_spill] sm:$0xff] %v6243_v11  ;;  %v2942_v37 = vmul.f32 %v2930_v41, %v6854_v5  ;;  %v2943_v24 = vmul.f32 %v2930_v41, %v6855_v4  ;;  %v2944_v20 = vmul.f32 %v2930_v41, %v6856_v46  ;;  %v6858_v11 = vld [vmem:[#allocation25_spill] sm:$0xff]  ;;  %v2947_v40 = vmul.f32 %v2930_v41, %v6859_v60 }
 0x40a   : > { %6843 = vst [vmem:[#allocation37_spill] sm:$0xff] %v6245_v61  ;;  %v6857_v61 = vld [vmem:[#allocation40_spill] sm:$0xff]  ;;  %v2946_v57 = vmul.f32 %v2930_v41, %v6858_v11  ;;  %v2948_v59 = vmul.f32 %v2930_v41, %v6860_v29  ;;  %v6267_v50 = vadd.f32 %v2932_v52, %v6123_v23  ;;  %v2950_v53 = vadd.f32 %v2933_v47, %v6127_v21  ;;  %v6861_v29 = vld [vmem:[#allocation55_spill] sm:$0xff] }
 0x40b   : > { %v2945_v49 = vmul.f32 %v2930_v41, %v6857_v61  ;;  %v2951_v8 = vadd.f32 %v2934_v33, %v6132_v39  ;;  %v2952_v5 = vadd.f32 %v2935_v43, %v6146_v26  ;;  %v2953_v4 = vadd.f32 %v2936_v22, %v6150_v48  ;;  %v6864_v22 = vld [vmem:[#allocation18_spill] sm:$0xff] }
 0x40c   : > { %v2954_v46 = vadd.f32 %v2937_v63, %v6168_v38  ;;  %v2955_v61 = vadd.f32 %v2938_v25, %v6172_v54  ;;  %v2956_v11 = vadd.f32 %v2939_v32, %v6176_v13  ;;  %v2957_v60 = vadd.f32 %v2940_v15, %v6179_v19  ;;  %v6865_v25 = vld [vmem:[#allocation11_spill] sm:$0xff] }
 0x40d   : > { %v2958_v41 = vadd.f32 %v2941_v10, %v6182_v62  ;;  %v2959_v23 = vadd.f32 %v2942_v37, %v6187_v0  ;;  %v2672_v21 = vsel %vm873_vm2, %v6861_v29, %v2671_v44  ;;  %v2688_v39 = vsel %vm873_vm2, %v2671_v44, %v5895_v42  ;;  %v6863_v44 = vld [vmem:[#allocation36_spill] sm:$0xff]  ;;  %v6867_v10 = vld [vmem:[#allocation13_spill] sm:$0xff] }
 0x40e   : > { %v2960_v26 = vadd.f32 %v2943_v24, %v2919_v3  ;;  %v2961_v48 = vadd.f32 %v2944_v20, %v2920_v55  ;;  %v2962_v38 = vadd.f32 %v2945_v49, %v2921_v1  ;;  %v2882_v54 = vmul.f32 %v5685_v17, %v2672_v21  ;;  %v2971_v13 = vpop.permute.xlu1 %2970  ;;  %v6862_v3 = vld [vmem:[#allocation35_spill] sm:$0xff] }
 0x40f   : > { %v2963_v52 = vadd.f32 %v2946_v57, %v2922_v36  ;;  %v2964_v19 = vadd.f32 %v2947_v40, %v2923_v45  ;;  %v2965_v47 = vadd.f32 %v2948_v59, %v2924_v30  ;;  %v2776_v62 = vmul.f32 %v5683_v9, %v2672_v21 }
 0x410   : > { %v2777_v0 = vmul.f32 %v5683_v9, %v2688_v39  ;;  %v2883_v33 = vmul.f32 %v5685_v17, %v2688_v39  ;;  %v2899_v43 = vadd.f32 %v2882_v54, %v6101_v16  ;;  %v2973_v12 = vmul.f32 %v2971_v13, %v6049_v6 }
 0x411   : > { %v2974_v42 = vmul.f32 %v2971_v13, %v5937_v7  ;;  %v2975_v55 = vmul.f32 %v2971_v13, %v6862_v3  ;;  %v2976_v1 = vmul.f32 %v2971_v13, %v6026_v28  ;;  %v2977_v36 = vmul.f32 %v2971_v13, %v6021_v2 }
 0x412   : > { %v3022_v30 = vadd.f32 %v2899_v43, %v6010_v51  ;;  %v2978_v45 = vmul.f32 %v2971_v13, %v5975_v34  ;;  %v2979_v9 = vmul.f32 %v2971_v13, %v6863_v44  ;;  %v2980_v17 = vmul.f32 %v2971_v13, %v6864_v22  ;;  %v6866_v34 = vld [vmem:[#allocation29_spill] sm:$0xff]  ;;  %v6881_v22 = vld [vmem:[#allocation52_spill] sm:$0xff] }
 0x413   : > { %v2793_v16 = vadd.f32 %v2776_v62, %v6076_v14  ;;  %v2982_v6 = vmul.f32 %v2971_v13, %v6137_v18  ;;  %v2983_v7 = vmul.f32 %v2971_v13, %v5921_v27  ;;  %v2984_v63 = vmul.f32 %v2971_v13, %v6198_v56  ;;  %v6868_v27 = vld [vmem:[#allocation32_spill] sm:$0xff]  ;;  %v6880_v44 = vld [vmem:[#allocation45_spill] sm:$0xff] }
 0x414   : > { %v2985_v28 = vmul.f32 %v2971_v13, %v6207_v58  ;;  %v2986_v2 = vmul.f32 %v2971_v13, %v6203_v35  ;;  %v2987_v51 = vmul.f32 %v2971_v13, %v6865_v25  ;;  %v2988_v32 = vmul.f32 %v2971_v13, %v2672_v21 }
 0x415   : > { %v2794_v15 = vadd.f32 %v2777_v0, %v6866_v34  ;;  %v2900_v37 = vadd.f32 %v2883_v33, %v6867_v10  ;;  %v2992_v24 = vadd.f32 %v2975_v55, %v2951_v8  ;;  %v2993_v20 = vadd.f32 %v2976_v1, %v2952_v5  ;;  %v6869_v0 = vld [vmem:[#allocation56_spill] sm:$0xff] }
 0x416   : > { %v2994_v14 = vadd.f32 %v2977_v36, %v2953_v4  ;;  %v2995_v49 = vadd.f32 %v2978_v45, %v2954_v46  ;;  %v2996_v18 = vadd.f32 %v2979_v9, %v2955_v61  ;;  %v2997_v57 = vadd.f32 %v2980_v17, %v2956_v11  ;;  %v6870_v33 = vld [vmem:[#allocation12_spill] sm:$0xff]  ;;  %v6872_v46 = vld [vmem:[#allocation27_spill] sm:$0xff]  ;;  %v6879_v36 = vld [vmem:[#allocation37_spill] sm:$0xff] }
 0x417   : > { %v2981_v40 = vmul.f32 %v2971_v13, %v6868_v27  ;;  %v2999_v56 = vadd.f32 %v2982_v6, %v2958_v41  ;;  %v3000_v59 = vadd.f32 %v2983_v7, %v2959_v23  ;;  %v3001_v58 = vadd.f32 %v2984_v63, %v2960_v26  ;;  %v6871_v5 = vld [vmem:[#allocation20_spill] sm:$0xff]  ;;  %v6873_v11 = vld [vmem:[#allocation19_spill] sm:$0xff] }
 0x418   : > { %v3002_v29 = vadd.f32 %v2985_v28, %v2961_v48  ;;  %v3003_v35 = vadd.f32 %v2986_v2, %v2962_v38  ;;  %v3004_v54 = vadd.f32 %v2987_v51, %v2963_v52  ;;  %v3005_v62 = vadd.f32 %v2988_v32, %v2964_v19  ;;  %v6874_v41 = vld [vmem:[#allocation16_spill] sm:$0xff]  ;;  %v6875_v38 = vld [vmem:[#allocation53_spill] sm:$0xff]  ;;  %v3046_v2 = vpop.permute.xlu2 %3045 }
 0x419   : > { %v2989_v21 = vmul.f32 %v2971_v13, %v2688_v39  ;;  %v2991_v43 = vadd.f32 %v2974_v42, %v2950_v53  ;;  %v3025_v3 = vadd.f32 %v6869_v0, %v2992_v24  ;;  %v3026_v8 = vadd.f32 %v6870_v33, %v2993_v20  ;;  %v6876_v39 = vld [vmem:[#allocation43_spill] sm:$0xff]  ;;  %v6877_v13 = vld [vmem:[#allocation44_spill] sm:$0xff]  ;;  %v6878_v42 = vld [vmem:[#allocation14_spill] sm:$0xff] }
 0x41a   : > { %v3027_v4 = vadd.f32 %v6871_v5, %v2994_v14  ;;  %v3028_v61 = vadd.f32 %v6872_v46, %v2995_v49  ;;  %v3029_v55 = vadd.f32 %v6873_v11, %v2996_v18  ;;  %v3030_v23 = vadd.f32 %v6874_v41, %v2997_v57 }
 0x41b   : > { %v2998_v26 = vadd.f32 %v2981_v40, %v2957_v60  ;;  %v3032_v48 = vadd.f32 %v6239_v31, %v2999_v56  ;;  %v3033_v52 = vadd.f32 %v6875_v38, %v3000_v59  ;;  %v3034_v53 = vadd.f32 %v6876_v39, %v3001_v58  ;;  %v6882_v31 = vld [vmem:[#allocation15_spill] sm:$0xff] }
 0x41c   : > { %v3035_v19 = vadd.f32 %v6877_v13, %v3002_v29  ;;  %v3036_v1 = vadd.f32 %v6878_v42, %v3003_v35  ;;  %v3037_v45 = vadd.f32 %v6879_v36, %v3004_v54  ;;  %v3038_v9 = vadd.f32 %v6880_v44, %v3005_v62  ;;  %v6380_v42 = vpop.permute.xlu1 %3144 }
 0x41d   : > { %v3007_v17 = vadd.f32 %v6881_v22, %v2794_v15  ;;  %v2990_v6 = vadd.f32 %v2973_v12, %v6267_v50  ;;  %v3006_v7 = vadd.f32 %v2989_v21, %v2965_v47  ;;  %v3023_v63 = vadd.f32 %v2900_v37, %v2793_v16 }
 0x41e   : > { %v3031_v28 = vadd.f32 %v6882_v31, %v2998_v26  ;;  %v6325_v25 = vstv %s3391_s22  ;;  %v3049_v10 = vadd.f32 %v3046_v2, %v3025_v3  ;;  %v3050_v24 = vadd.f32 %v3046_v2, %v3026_v8  ;;  %v6355_v8 = vpop.permute.xlu0 %3121  ;;  %s3545_s22 = scalar_lea.hbm %s3544_s21, 136 }
 0x41f   : > { %v3024_v60 = vadd.f32 %v3007_v17, %v2991_v43  ;;  %v3039_v51 = vadd.f32 %v3022_v30, %v3006_v7  ;;  %v3040_v32 = vadd.f32 %v3023_v63, %v2990_v6  ;;  %v3051_v20 = vadd.f32 %v3046_v2, %v3027_v4  ;;  %p3546_p0 = scmp.ne.s32.totalorder %s3544_s21, %s3545_s22 }
 0x420   : > { %v3052_v14 = vadd.f32 %v3046_v2, %v3028_v61  ;;  %v3053_v49 = vadd.f32 %v3046_v2, %v3029_v55  ;;  %v3054_v18 = vadd.f32 %v3046_v2, %v3030_v23  ;;  %v3055_v15 = vadd.f32 %v3046_v2, %v3031_v28 }
 0x421   : > { %v3048_v34 = vadd.f32 %v3046_v2, %v3024_v60  ;;  %v3056_v57 = vadd.f32 %v3046_v2, %v3032_v48  ;;  %v3057_v50 = vadd.f32 %v3046_v2, %v3033_v52  ;;  %v3058_v47 = vadd.f32 %v3046_v2, %v3034_v53  ;;  %p3547_p1 = pnand %p3546_p0, %p3694_p5 }
 0x422   : > { %v6327_v12 = vadd.f32 %v3046_v2, %v3035_v19  ;;  %v6329_v16 = vadd.f32 %v3046_v2, %v3036_v1  ;;  %v6331_v37 = vadd.f32 %v3046_v2, %v3037_v45  ;;  %v6333_v27 = vadd.f32 %v3046_v2, %v3038_v9 }
 0x423   : > { %v6335_v30 = vadd.f32 %v3046_v2, %v3039_v51  ;;  %v6337_v40 = vadd.f32 %v3046_v2, %v3040_v32  ;;  %vm3066_vm0 = vcmp.gt.f32.partialorder %v3048_v34, 0.0  ;;  %vm3067_vm1 = vcmp.gt.f32.partialorder %v3049_v10, 0.0  ;;  %p3548_p2 = pneg %p3547_p1 }
 0x424   : > { %vm3068_vm2 = vcmp.gt.f32.partialorder %v3050_v24, 0.0  ;;  %vm3069_vm11 = vcmp.gt.f32.partialorder %v3051_v20, 0.0  ;;  %v3084_v56 = vmul.f32 %v6325_v25, %v3048_v34  ;;  %v3085_v59 = vmul.f32 %v6325_v25, %v3049_v10 }
 0x425   : > { %v3086_v58 = vmul.f32 %v6325_v25, %v3050_v24  ;;  %vm3070_vm12 = vcmp.gt.f32.partialorder %v3052_v14, 0.0  ;;  %vm3071_vm13 = vcmp.gt.f32.partialorder %v3053_v49, 0.0  ;;  %vm3072_vm14 = vcmp.gt.f32.partialorder %v3054_v18, 0.0 }
 0x426   : > { %v3087_v29 = vmul.f32 %v6325_v25, %v3051_v20  ;;  %vm3073_vm15 = vcmp.gt.f32.partialorder %v3055_v15, 0.0  ;;  %vm3074_vm3 = vcmp.gt.f32.partialorder %v3056_v57, 0.0  ;;  %vm3075_vm4 = vcmp.gt.f32.partialorder %v3057_v50, 0.0 }
 0x427   : > { %v3088_v35 = vmul.f32 %v6325_v25, %v3052_v14  ;;  %vm3076_vm5 = vcmp.gt.f32.partialorder %v3058_v47, 0.0  ;;  %vm3077_vm6 = vcmp.gt.f32.partialorder %v6327_v12, 0.0  ;;  %vm3078_vm7 = vcmp.gt.f32.partialorder %v6329_v16, 0.0 }
 0x428   : > { %v3089_v54 = vmul.f32 %v6325_v25, %v3053_v49  ;;  %v3090_v62 = vmul.f32 %v6325_v25, %v3054_v18  ;;  %v3101_v21 = vsel %vm3066_vm0, %v3048_v34, %v3084_v56  ;;  %v3102_v43 = vsel %vm3067_vm1, %v3049_v10, %v3085_v59 }
 0x429   : > { %v3103_v0 = vsel %vm3068_vm2, %v3050_v24, %v3086_v58  ;;  %vm3079_vm8 = vcmp.gt.f32.partialorder %v6331_v37, 0.0  ;;  %vm3080_vm9 = vcmp.gt.f32.partialorder %v6333_v27, 0.0  ;;  %v3091_v3 = vmul.f32 %v6325_v25, %v3055_v15 }
 0x42a   : > { %v3104_v33 = vsel %vm3069_vm11, %v3051_v20, %v3087_v29  ;;  %vm3081_vm10 = vcmp.gt.f32.partialorder %v6335_v30, 0.0  ;;  %v3092_v5 = vmul.f32 %v6325_v25, %v3056_v57  ;;  %v3093_v4 = vmul.f32 %v6325_v25, %v3057_v50 }
 0x42b   : > { %v3094_v46 = vmul.f32 %v6325_v25, %v3058_v47  ;;  %v3105_v61 = vsel %vm3070_vm12, %v3052_v14, %v3088_v35  ;;  %vm3082_vm0 = vcmp.gt.f32.partialorder %v6337_v40, 0.0  ;;  %v3106_v11 = vsel %vm3071_vm13, %v3053_v49, %v3089_v54  ;;  %v3467_v14 = vld [vmem:[%s3732_s26] sm:$0xff] }
 0x42c   : > { %v3124_v55 = vmul.f32 %v6355_v8, %v3101_v21  ;;  %v3125_v41 = vmul.f32 %v6355_v8, %v3102_v43  ;;  %v3126_v23 = vmul.f32 %v6355_v8, %v3103_v0  ;;  %v3095_v26 = vmul.f32 %v6325_v25, %v6327_v12  ;;  %v3471_v35 = vld [vmem:[%s3732_s26 + $0x20] sm:$0xff]  ;;  %v3472_v21 = vld [vmem:[%s3732_s26 + $0x28] sm:$0xff] }
 0x42d   : > { %v3096_v48 = vmul.f32 %v6325_v25, %v6329_v16  ;;  %v3107_v38 = vsel %vm3072_vm14, %v3054_v18, %v3090_v62  ;;  %v3127_v52 = vmul.f32 %v6355_v8, %v3104_v33  ;;  %v3097_v39 = vmul.f32 %v6325_v25, %v6331_v37  ;;  %v3468_v18 = vld [vmem:[%s3732_s26 + $0x8] sm:$0xff]  ;;  %v3473_v33 = vld [vmem:[%s3732_s26 + $0x30] sm:$0xff] }
 0x42e   : > { %v3098_v53 = vmul.f32 %v6325_v25, %v6333_v27  ;;  %v3108_v13 = vsel %vm3073_vm15, %v3055_v15, %v3091_v3  ;;  %v3128_v19 = vmul.f32 %v6355_v8, %v3105_v61  ;;  %v3109_v1 = vsel %vm3074_vm3, %v3056_v57, %v3092_v5  ;;  %v3469_v57 = vld [vmem:[%s3732_s26 + $0x10] sm:$0xff] }
 0x42f   : > { %v3110_v36 = vsel %vm3075_vm4, %v3057_v50, %v3093_v4  ;;  %v3111_v45 = vsel %vm3076_vm5, %v3058_v47, %v3094_v46  ;;  %v3129_v44 = vmul.f32 %v6355_v8, %v3106_v11  ;;  %v3130_v9 = vmul.f32 %v6355_v8, %v3107_v38  ;;  %v3474_v46 = vld [vmem:[%s3732_s26 + $0x38] sm:$0xff] }
 0x430   : > { %v3147_v22 = vadd.f32 %v6380_v42, %v3124_v55  ;;  %v3148_v17 = vadd.f32 %v6380_v42, %v3125_v41  ;;  %v3149_v6 = vadd.f32 %v6380_v42, %v3126_v23  ;;  %v3099_v7 = vmul.f32 %v6325_v25, %v6335_v30  ;;  %v3475_v41 = vld [vmem:[%s3732_s26 + $0x40] sm:$0xff] }
 0x431   : > { %v3100_v60 = vmul.f32 %v6325_v25, %v6337_v40  ;;  %v3131_v63 = vmul.f32 %v6355_v8, %v3108_v13  ;;  %v3150_v31 = vadd.f32 %v6380_v42, %v3127_v52  ;;  %v3112_v28 = vsel %vm3077_vm6, %v6327_v12, %v3095_v26  ;;  %v3478_v13 = vld [vmem:[%s3732_s26 + $0x58] sm:$0xff] }
 0x432   : > { %v3113_v2 = vsel %vm3078_vm7, %v6329_v16, %v3096_v48  ;;  %v3132_v51 = vmul.f32 %v6355_v8, %v3109_v1  ;;  %v3151_v32 = vadd.f32 %v6380_v42, %v3128_v19  ;;  %v3114_v25 = vsel %vm3079_vm8, %v6331_v37, %v3097_v39  ;;  %v3470_v37 = vld [vmem:[%s3732_s26 + $0x18] sm:$0xff]  ;;  %v3476_v48 = vld [vmem:[%s3732_s26 + $0x48] sm:$0xff] }
 0x433   : > { %v3133_v34 = vmul.f32 %v6355_v8, %v3110_v36  ;;  %v3134_v10 = vmul.f32 %v6355_v8, %v3111_v45  ;;  %v3152_v24 = vadd.f32 %v6380_v42, %v3129_v44  ;;  %v3153_v20 = vadd.f32 %v6380_v42, %v3130_v9  ;;  %v3479_v36 = vld [vmem:[%s3732_s26 + $0x60] sm:$0xff]  ;;  %v3480_v44 = vld [vmem:[%s3732_s26 + $0x68] sm:$0xff] }
 0x434   : > { %v3164_v49 = vadd.f32 %v3467_v14, %v3147_v22  ;;  %v3165_v15 = vadd.f32 %v3468_v18, %v3148_v17  ;;  %v3166_v50 = vadd.f32 %v3469_v57, %v3149_v6  ;;  %v3115_v47 = vsel %vm3080_vm9, %v6333_v27, %v3098_v53  ;;  %v3481_v22 = vld [vmem:[%s3732_s26 + $0x70] sm:$0xff] }
 0x435   : > { %v3135_v12 = vmul.f32 %v6355_v8, %v3112_v28  ;;  %v3154_v16 = vadd.f32 %v6380_v42, %v3131_v63  ;;  %v3167_v56 = vadd.f32 %v3470_v37, %v3150_v31  ;;  %v3116_v59 = vsel %vm3081_vm10, %v6335_v30, %v3099_v7  ;;  %v3483_v7 = vld [vmem:[%s3732_s26 + $0x80] sm:$0xff] }
 0x436   : > { %v3136_v58 = vmul.f32 %v6355_v8, %v3113_v2  ;;  %v3155_v29 = vadd.f32 %v6380_v42, %v3132_v51  ;;  %v3168_v54 = vadd.f32 %v3471_v35, %v3151_v32  ;;  %3181 = vst [vmem:[%s6431_s28] sm:$0xff] %v3164_v49  ;;  %v3117_v27 = vsel %vm3082_vm0, %v6337_v40, %v3100_v60 }
 0x437   : > { %v3137_v30 = vmul.f32 %v6355_v8, %v3114_v25  ;;  %v3156_v62 = vadd.f32 %v6380_v42, %v3133_v34  ;;  %v3169_v43 = vadd.f32 %v3472_v21, %v3152_v24  ;;  %3182 = vst [vmem:[%s6431_s28 + $0x8] sm:$0xff] %v3165_v15  ;;  %v3138_v0 = vmul.f32 %v6355_v8, %v3115_v47 }
 0x438   : > { %v3157_v3 = vadd.f32 %v6380_v42, %v3134_v10  ;;  %v3170_v5 = vadd.f32 %v3473_v33, %v3153_v20  ;;  %3183 = vst [vmem:[%s6431_s28 + $0x10] sm:$0xff] %v3166_v50  ;;  %v3139_v40 = vmul.f32 %v6355_v8, %v3116_v59  ;;  %v3158_v4 = vadd.f32 %v6380_v42, %v3135_v12 }
 0x439   : > { %v3171_v61 = vadd.f32 %v3474_v46, %v3154_v16  ;;  %3184 = vst [vmem:[%s6431_s28 + $0x18] sm:$0xff] %v3167_v56  ;;  %v3140_v11 = vmul.f32 %v6355_v8, %v3117_v27  ;;  %v3159_v55 = vadd.f32 %v6380_v42, %v3136_v58  ;;  %v3172_v23 = vadd.f32 %v3475_v41, %v3155_v29  ;;  %v3477_v8 = vld [vmem:[%s3732_s26 + $0x50] sm:$0xff] }
 0x43a   : > { %3185 = vst [vmem:[%s6431_s28 + $0x20] sm:$0xff] %v3168_v54  ;;  %v3160_v26 = vadd.f32 %v6380_v42, %v3137_v30  ;;  %v3173_v38 = vadd.f32 %v3476_v48, %v3156_v62  ;;  %v3161_v52 = vadd.f32 %v6380_v42, %v3138_v0  ;;  %v3174_v39 = vadd.f32 %v3477_v8, %v3157_v3 }
 0x43b   : > { %3186 = vst [vmem:[%s6431_s28 + $0x28] sm:$0xff] %v3169_v43  ;;  %v3162_v53 = vadd.f32 %v6380_v42, %v3139_v40  ;;  %v3175_v19 = vadd.f32 %v3478_v13, %v3158_v4  ;;  %v3163_v1 = vadd.f32 %v6380_v42, %v3140_v11  ;;  %v3176_v45 = vadd.f32 %v3479_v36, %v3159_v55  ;;  %v3482_v42 = vld [vmem:[%s3732_s26 + $0x78] sm:$0xff]  ;;  %s3549_s26 = scalar_lea.hbm %s6520_s9, 272 }
 0x43c   : > { %3187 = vst [vmem:[%s6431_s28 + $0x30] sm:$0xff] %v3170_v5  ;;  %v3177_v9 = vadd.f32 %v3480_v44, %v3160_v26  ;;  %v3178_v17 = vadd.f32 %v3481_v22, %v3161_v52  ;;  %p3551_p4 = scmp.lt.s32.totalorder %s3549_s26, %s3545_s22 }
 0x43d   : > { %3188 = vst [vmem:[%s6431_s28 + $0x38] sm:$0xff] %v3171_v61  ;;  %v3179_v6 = vadd.f32 %v3482_v42, %v3162_v53  ;;  %v3180_v60 = vadd.f32 %v3483_v7, %v3163_v1 }
 0x43e   : > { %3189 = vst [vmem:[%s6431_s28 + $0x40] sm:$0xff] %v3172_v23  ;;  %p3552_p7 = por %p3551_p4, %p3550_p3 }
 0x43f   : > { %3190 = vst [vmem:[%s6431_s28 + $0x48] sm:$0xff] %v3173_v38 }
 0x440   : > { %3191 = vst [vmem:[%s6431_s28 + $0x50] sm:$0xff] %v3174_v39  ;;  %p3553_p8 = pnand %p3552_p7, %p3548_p2 }
 0x441   : > { %3192 = vst [vmem:[%s6431_s28 + $0x58] sm:$0xff] %v3175_v19 }
 0x442   : > { %3193 = vst [vmem:[%s6431_s28 + $0x60] sm:$0xff] %v3176_v45 }
 0x443   : > { %3194 = vst [vmem:[%s6431_s28 + $0x68] sm:$0xff] %v3177_v9 }
 0x444   : > { %3195 = vst [vmem:[%s6431_s28 + $0x70] sm:$0xff] %v3178_v17 }
 0x445   : > { %3196 = vst [vmem:[%s6431_s28 + $0x78] sm:$0xff] %v3179_v6 }
 0x446   : > { %3197 = vst [vmem:[%s6431_s28 + $0x80] sm:$0xff] %v3180_v60 }
 0x447   : > { %3556 = shalt.err (!%p3553_p8)
}
 0x448   : > { %3406 = dma.vmem_to_hbm [thread:$0]  (%p3694_p5), %s3213_s25, 2176, %s3215_s16, %s3199_s17  }
 0x449 PF: > { %p3423_p9 = scmp.ge.s32.totalorder %s3599_s12, 2  ;;  %s3226_s23 = sand.u32 1, %s3587_s30  }
 0x44a   : > { %s3227_s28 = scalar_lea.sflag [#allocation4], %s3226_s23 }
 0x44b   : > { %p3416_p10 = pnand %p3423_p9, %p3698_p6 }
 0x44d   : > { %p3417_p11 = pneg %p3416_p10 }
 0x44f   : > { %3582 = dma.done.wait (%p3417_p11), %s3227_s28, 2176  }
 0x450   : > { %3584 = vsyncadd (%p3417_p11), %s3227_s28, 4294965120  ;;  %p21_p12 = scmp.ge.s32.totalorder %s3681_s15, 4   ;;  %s6883_s30 = smov %s3591_s10 }
 0x451   : > { %s6884_s10 = smov %s3595_s11  ;;  %s6885_s11 = smov %s3692_s18 }
 0x452   : > { %s6886_s12 = smov %s3681_s15  ;;  %23 = sbr.rel (!%p21_p12) target bundleno = 5 (0x5), region = 133 }
 0x457   :  { %3233 = vsyncpa [#allocation3], 1 }
 0x458   :  { %3235 = vsyncpa [#allocation3 + $0x1], 1 }
 0x459   :  { %3236 = vsyncpa [#allocation4], 1 }
 0x45a   :  { %3238 = vsyncpa [#allocation4 + $0x1], 1 }
 0x45b   :  { %3239 = vsyncpa [#allocation5], 1 }
 0x45c   :  { %3241 = vsyncpa [#allocation5 + $0x1], 1 }

</bundles_post_ra>
